<compile_context>
chip_gen: v5e
topology: v5e:2x2
jax: 0.10.0
libtpu: 0.0.40
codegen_flags: <defaults>
</compile_context>

<pallas_src>
import functools

import jax
import jax.numpy as jnp
import numpy as np
from jax.experimental import pallas as pl
from jax.experimental.pallas import tpu as pltpu


def _unet_conv3_kernel(x_ref, w1_ref, w2_ref, idx_ref, o_ref, stk1_ref, stk2_ref,
                       *, Nb, Cin, Cout, D, H, W, S, S_pad, eps, mxu_dtype):
    """Fused UnetConv3 forward for Nb batch elements.

    x_ref   : (Nb, Cin, S_pad)   input, S_pad = round_up(D*H*W, 128), f32
    w1_ref  : (Cout, 9*Cin)      conv1 weights, taps folded into K (k = t*Cin + ci)
    w2_ref  : (Cout, 9*Cout)     conv2 weights
    idx_ref : (2, S_pad) int32   flattened (d, h) indices; -2 on spatial padding
    o_ref   : (Nb, Cout, S_pad)
    stk1_ref: (9*Cin, S_pad) f32 im2col scratch for block 1
    stk2_ref: (9*Cout, S_pad) f32 im2col scratch for block 2
    """
    HW = H * W
    inv_s = 1.0 / float(S)
    need_pad = S_pad != S

    # ---- tap-validity masks: a few hoisted VPU compares, not a 9*S f32 slab ----
    d_row = idx_ref[0:1, :]                      # (1, S_pad) int32
    h_row = idx_ref[1:2, :]

    def _ok(row, o, n):
        return jnp.logical_and(row + o >= 0, row + o < n)

    tap_scale = {}                               # (od, oh) -> (1, S_pad) f32 or None
    for od in (-1, 0, 1):
        for oh in (-1, 0, 1):
            if od == 0 and oh == 0 and not need_pad:
                tap_scale[(od, oh)] = None       # center tap, no halo, no padding
                continue
            m = _ok(d_row, od, D) if (od != 0 or need_pad) else None
            if oh != 0:
                vh = _ok(h_row, oh, H)
                m = vh if m is None else jnp.logical_and(m, vh)
            tap_scale[(od, oh)] = m.astype(jnp.float32)

    def build_stack(inp, stk_ref, C):
        # im2col: 9 lane-rolled + masked copies of the input stacked along the
        # contraction axis, so the whole 3x3 (D,H) conv is ONE MXU pass.
        # TODO(synk): on v6e, if the XLU becomes the bottleneck and H*W >= 128,
        # switch to a (C, D, H*W) block so the od=+-1 taps are plane slices.
        for od in (-1, 0, 1):
            for oh in (-1, 0, 1):
                t = (od + 1) * 3 + (oh + 1)
                off = od * HW + oh * W
                xt = inp if off == 0 else pltpu.roll(inp, shift=(-off) % S_pad, axis=1)
                scale = tap_scale[(od, oh)]
                if scale is not None:
                    xt = xt * scale              # (1, S_pad) broadcast, zero the halo
                stk_ref[t * C:(t + 1) * C, :] = xt

    def conv_in_relu(inp, w_ref, stk_ref, C):
        build_stack(inp, stk_ref, C)
        # Single folded matmul: bf16 operands on the MXU, f32 accumulation.
        a = jnp.dot(w_ref[...], stk_ref[...].astype(mxu_dtype),
                    preferred_element_type=jnp.float32)      # (Cout, S_pad) f32
        # InstanceNorm3d (no affine, biased variance), one-pass stats + ReLU.
        # Padding columns of `a` are exactly 0 (all taps masked), stats use 1/S.
        s1 = jnp.sum(a, axis=1, keepdims=True)
        s2 = jnp.sum(a * a, axis=1, keepdims=True)
        mean = s1 * inv_s
        var = jnp.maximum(s2 * inv_s - mean * mean, 0.0)
        y = (a - mean) * jax.lax.rsqrt(var + eps)
        return jnp.maximum(y, 0.0)

    for b in range(Nb):                          # static unroll; Nb kept small
        x = x_ref[b]                             # (Cin, S_pad)
        y1 = conv_in_relu(x, w1_ref, stk1_ref, Cin)    # conv1+IN+ReLU, stays on-chip
        y2 = conv_in_relu(y1, w2_ref, stk2_ref, Cout)  # conv2+IN+ReLU
        o_ref[b] = y2.astype(o_ref.dtype)


def unet_conv3_forward(x, params, *, eps=1e-5, mxu_dtype=jnp.bfloat16,
                       vmem_budget_bytes=24 << 20, max_batch_per_step=8):
    """UnetConv3.forward.  x: (N, Cin, D, H, W) (PyTorch NCDHW).  Returns same layout.

    Conv biases are accepted for interface parity but skipped: a per-channel
    constant added before a no-affine InstanceNorm is cancelled by the mean
    subtraction.
    """
    w1, b1, w2, b2 = params
    del b1, b2
    N, Cin, D, H, W = x.shape
    Cout = w1.shape[0]
    S = D * H * W
    S_pad = -(-S // 128) * 128                   # lane-dense spatial axis

    # Free contiguous reshape; only pad if D*H*W is not a multiple of 128.
    x2d = x.reshape(N, Cin, S)
    if S_pad != S:
        x2d = jnp.pad(x2d, ((0, 0), (0, 0), (0, S_pad - S)))

    # Fold the 9 (kd, kh) taps into the contraction axis: (Cout, 9*C), k = t*C + c.
    def fold(w):
        co, ci = w.shape[0], w.shape[1]
        return (jnp.transpose(w[:, :, :, :, 0], (0, 2, 3, 1))
                .reshape(co, 9 * ci).astype(mxu_dtype))

    w1_f = fold(w1)                              # (Cout, 9*Cin)
    w2_f = fold(w2)                              # (Cout, 9*Cout)

    # Compact (2, S_pad) flattened (d, h) index rows.  Padding gets -2 so every
    # tap compare (including od=0) fails -> conv output is exactly 0 there.
    d_idx = np.repeat(np.arange(D, dtype=np.int32), H * W)
    h_idx = np.tile(np.repeat(np.arange(H, dtype=np.int32), W), D)
    idx = np.full((2, S_pad), -2, dtype=np.int32)
    idx[0, :S] = d_idx
    idx[1, :S] = h_idx
    idx = jnp.asarray(idx)

    # ---- batch elements per grid step + VMEM limit from the block footprint ----
    io_bytes = (Cin + Cout) * S_pad * 4                   # x + out block per element
    stack_bytes = 9 * (Cin + Cout) * S_pad * 4            # im2col scratches (f32)
    work_bytes = 8 * Cout * S_pad * 4                     # a / y1 / y2 / temporaries
    wgt_bytes = 2 * (9 * Cin * Cout + 9 * Cout * Cout) * np.dtype(mxu_dtype).itemsize
    fixed = stack_bytes + work_bytes + wgt_bytes + 2 * S_pad * 4
    Nb = 1
    for cand in range(min(N, max_batch_per_step), 0, -1):
        if N % cand == 0 and 2 * cand * io_bytes + fixed <= vmem_budget_bytes:
            Nb = cand
            break
    est = 2 * Nb * io_bytes + fixed
    vmem_limit = int(min(max(int(est * 1.5), 32 << 20), 64 << 20))

    kernel = functools.partial(
        _unet_conv3_kernel, Nb=Nb, Cin=Cin, Cout=Cout, D=D, H=H, W=W,
        S=S, S_pad=S_pad, eps=eps, mxu_dtype=mxu_dtype)

    # TODO(synk): for realistic UNet stage sizes on v7x (64 MiB VMEM) add a
    # D-tiled grid axis with a 1-plane halo and partial-sum InstanceNorm; at
    # these demo sizes whole-volume-per-step blocks are the right choice.
    out = pl.pallas_call(
        kernel,
        out_shape=jax.ShapeDtypeStruct((N, Cout, S_pad), x.dtype),
        grid_spec=pltpu.PrefetchScalarGridSpec(
            num_scalar_prefetch=0,
            grid=(N // Nb,),
            in_specs=[
                pl.BlockSpec((Nb, Cin, S_pad), lambda g: (g, 0, 0)),
                pl.BlockSpec((Cout, 9 * Cin), lambda g: (0, 0)),
                pl.BlockSpec((Cout, 9 * Cout), lambda g: (0, 0)),
                pl.BlockSpec((2, S_pad), lambda g: (0, 0)),
            ],
            out_specs=pl.BlockSpec((Nb, Cout, S_pad), lambda g: (g, 0, 0)),
            scratch_shapes=[
                pltpu.VMEM((9 * Cin, S_pad), jnp.float32),
                pltpu.VMEM((9 * Cout, S_pad), jnp.float32),
            ],
        ),
        compiler_params=pltpu.CompilerParams(
            dimension_semantics=("parallel",),
            vmem_limit_bytes=vmem_limit,
        ),
    )(x2d, w1_f, w2_f, idx)
    return out[:, :, :S].reshape(N, Cout, D, H, W)


def init_params(key, in_size, out_size):
    """Kaiming-normal (fan_in, a=0 -> gain sqrt(2)) conv weights in PyTorch layout
    (Cout, Cin, 3, 3, 1); PyTorch-default uniform biases (kept only for parity)."""
    k1, k2, k3, k4 = jax.random.split(key, 4)
    fan_in1 = in_size * 3 * 3 * 1
    fan_in2 = out_size * 3 * 3 * 1
    std1 = float(np.sqrt(2.0 / fan_in1))
    std2 = float(np.sqrt(2.0 / fan_in2))
    w1 = std1 * jax.random.normal(k1, (out_size, in_size, 3, 3, 1), jnp.float32)
    w2 = std2 * jax.random.normal(k2, (out_size, out_size, 3, 3, 1), jnp.float32)
    bnd1 = float(1.0 / np.sqrt(fan_in1))
    bnd2 = float(1.0 / np.sqrt(fan_in2))
    b1 = jax.random.uniform(k3, (out_size,), jnp.float32, -bnd1, bnd1)
    b2 = jax.random.uniform(k4, (out_size,), jnp.float32, -bnd2, bnd2)
    return w1, b1, w2, b2


def _reference_forward(x, params, eps=1e-5):
    """Pure-JAX reference (NCDHW conv + bias + instance norm + relu)."""
    def block(x, w, b):
        y = jax.lax.conv_general_dilated(
            x, w,
            window_strides=(1, 1, 1),
            padding=((1, 1), (1, 1), (0, 0)),
            dimension_numbers=("NCDHW", "OIDHW", "NCDHW"),
        ) + b[None, :, None, None, None]
        mean = jnp.mean(y, axis=(2, 3, 4), keepdims=True)
        var = jnp.mean((y - mean) ** 2, axis=(2, 3, 4), keepdims=True)
        return jnp.maximum((y - mean) * jax.lax.rsqrt(var + eps), 0.0)

    w1, b1, w2, b2 = params
    return block(block(x, w1, b1), w2, b2)


if __name__ == "__main__":
    key = jax.random.PRNGKey(0)
    kx, kp = jax.random.split(key)

    # Small shapes: batch=2, in_channels=4, out_channels=8, spatial D=H=16, W=4.
    N, Cin, Cout, D, H, W = 2, 4, 8, 16, 16, 4
    x = jax.random.normal(kx, (N, Cin, D, H, W), jnp.float32)   # PyTorch NCDHW
    params = init_params(kp, Cin, Cout)

    ref = _reference_forward(x, params)

    # f32-operand build: tight correctness check against the XLA reference.
    fwd_f32 = jax.jit(functools.partial(unet_conv3_forward, mxu_dtype=jnp.float32))
    out_f32 = jax.block_until_ready(fwd_f32(x, params))
    np.testing.assert_allclose(np.asarray(out_f32), np.asarray(ref),
                               rtol=1e-3, atol=1e-3)

    # bf16-operand MXU build (default fast path on v6e/v7x): loosened tolerance.
    fwd_bf16 = jax.jit(unet_conv3_forward)
    out_bf16 = jax.block_until_ready(fwd_bf16(x, params))
    np.testing.assert_allclose(np.asarray(out_bf16), np.asarray(ref),
                               rtol=8e-2, atol=8e-2)

    print("KERNEL_OK")
</pallas_src>

<mosaic_0001>
module attributes {stable_mosaic.version = 11 : i64} {
  func.func @_unet_conv3_kernel(%arg0: i32, %arg1: memref<2x4x1024xf32, #tpu.memory_space<vmem>>, %arg2: memref<8x36xf32, #tpu.memory_space<vmem>>, %arg3: memref<8x72xf32, #tpu.memory_space<vmem>>, %arg4: memref<2x1024xi32, #tpu.memory_space<vmem>>, %arg5: memref<2x8x1024xf32, #tpu.memory_space<vmem>>, %arg6: memref<36x1024xf32, #tpu.memory_space<vmem>>, %arg7: memref<72x1024xf32, #tpu.memory_space<vmem>>) attributes {dimension_semantics = [#tpu.dimension_semantics<parallel>], iteration_bounds = array<i64: 1>, scalar_prefetch = 0 : i64, scratch_operands = 2 : i64, tpu.core_type = #tpu.core_type<tc>, window_params = [{transform_indices = @transform_0, window_bounds = array<i64: 2, 4, 1024>}, {pipeline_mode = #tpu.pipeline_mode<synchronous>, transform_indices = @transform_1, window_bounds = array<i64: 8, 36>}, {pipeline_mode = #tpu.pipeline_mode<synchronous>, transform_indices = @transform_2, window_bounds = array<i64: 8, 72>}, {pipeline_mode = #tpu.pipeline_mode<synchronous>, transform_indices = @transform_3, window_bounds = array<i64: 2, 1024>}, {transform_indices = @transform_4, window_bounds = array<i64: 2, 8, 1024>}]} {
    %c0 = arith.constant 0 : index
    %c0_0 = arith.constant 0 : index
    %0 = vector.load %arg4[%c0, %c0_0] : memref<2x1024xi32, #tpu.memory_space<vmem>>, vector<1x1024xi32>
    %c1 = arith.constant 1 : index
    %c0_1 = arith.constant 0 : index
    %1 = vector.load %arg4[%c1, %c0_1] : memref<2x1024xi32, #tpu.memory_space<vmem>>, vector<1x1024xi32>
    %c-1_i32 = arith.constant -1 : i32
    %2 = vector.broadcast %c-1_i32 : i32 to vector<1x1024xi32>
    %3 = arith.addi %0, %2 : vector<1x1024xi32>
    %c0_i32 = arith.constant 0 : i32
    %4 = vector.broadcast %c0_i32 : i32 to vector<1x1024xi32>
    %5 = arith.cmpi sge, %3, %4 : vector<1x1024xi32>
    %c-1_i32_2 = arith.constant -1 : i32
    %6 = vector.broadcast %c-1_i32_2 : i32 to vector<1x1024xi32>
    %7 = arith.addi %0, %6 : vector<1x1024xi32>
    %c16_i32 = arith.constant 16 : i32
    %8 = vector.broadcast %c16_i32 : i32 to vector<1x1024xi32>
    %9 = arith.cmpi slt, %7, %8 : vector<1x1024xi32>
    %10 = arith.andi %5, %9 : vector<1x1024xi1>
    %c-1_i32_3 = arith.constant -1 : i32
    %11 = vector.broadcast %c-1_i32_3 : i32 to vector<1x1024xi32>
    %12 = arith.addi %1, %11 : vector<1x1024xi32>
    %c0_i32_4 = arith.constant 0 : i32
    %13 = vector.broadcast %c0_i32_4 : i32 to vector<1x1024xi32>
    %14 = arith.cmpi sge, %12, %13 : vector<1x1024xi32>
    %c-1_i32_5 = arith.constant -1 : i32
    %15 = vector.broadcast %c-1_i32_5 : i32 to vector<1x1024xi32>
    %16 = arith.addi %1, %15 : vector<1x1024xi32>
    %c16_i32_6 = arith.constant 16 : i32
    %17 = vector.broadcast %c16_i32_6 : i32 to vector<1x1024xi32>
    %18 = arith.cmpi slt, %16, %17 : vector<1x1024xi32>
    %19 = arith.andi %14, %18 : vector<1x1024xi1>
    %20 = arith.andi %10, %19 : vector<1x1024xi1>
    %21 = arith.extui %20 : vector<1x1024xi1> to vector<1x1024xi32>
    %22 = arith.sitofp %21 : vector<1x1024xi32> to vector<1x1024xf32>
    %c-1_i32_7 = arith.constant -1 : i32
    %23 = vector.broadcast %c-1_i32_7 : i32 to vector<1x1024xi32>
    %24 = arith.addi %0, %23 : vector<1x1024xi32>
    %c0_i32_8 = arith.constant 0 : i32
    %25 = vector.broadcast %c0_i32_8 : i32 to vector<1x1024xi32>
    %26 = arith.cmpi sge, %24, %25 : vector<1x1024xi32>
    %c-1_i32_9 = arith.constant -1 : i32
    %27 = vector.broadcast %c-1_i32_9 : i32 to vector<1x1024xi32>
    %28 = arith.addi %0, %27 : vector<1x1024xi32>
    %c16_i32_10 = arith.constant 16 : i32
    %29 = vector.broadcast %c16_i32_10 : i32 to vector<1x1024xi32>
    %30 = arith.cmpi slt, %28, %29 : vector<1x1024xi32>
    %31 = arith.andi %26, %30 : vector<1x1024xi1>
    %32 = arith.extui %31 : vector<1x1024xi1> to vector<1x1024xi32>
    %33 = arith.sitofp %32 : vector<1x1024xi32> to vector<1x1024xf32>
    %c-1_i32_11 = arith.constant -1 : i32
    %34 = vector.broadcast %c-1_i32_11 : i32 to vector<1x1024xi32>
    %35 = arith.addi %0, %34 : vector<1x1024xi32>
    %c0_i32_12 = arith.constant 0 : i32
    %36 = vector.broadcast %c0_i32_12 : i32 to vector<1x1024xi32>
    %37 = arith.cmpi sge, %35, %36 : vector<1x1024xi32>
    %c-1_i32_13 = arith.constant -1 : i32
    %38 = vector.broadcast %c-1_i32_13 : i32 to vector<1x1024xi32>
    %39 = arith.addi %0, %38 : vector<1x1024xi32>
    %c16_i32_14 = arith.constant 16 : i32
    %40 = vector.broadcast %c16_i32_14 : i32 to vector<1x1024xi32>
    %41 = arith.cmpi slt, %39, %40 : vector<1x1024xi32>
    %42 = arith.andi %37, %41 : vector<1x1024xi1>
    %c1_i32 = arith.constant 1 : i32
    %43 = vector.broadcast %c1_i32 : i32 to vector<1x1024xi32>
    %44 = arith.addi %1, %43 : vector<1x1024xi32>
    %c0_i32_15 = arith.constant 0 : i32
    %45 = vector.broadcast %c0_i32_15 : i32 to vector<1x1024xi32>
    %46 = arith.cmpi sge, %44, %45 : vector<1x1024xi32>
    %c1_i32_16 = arith.constant 1 : i32
    %47 = vector.broadcast %c1_i32_16 : i32 to vector<1x1024xi32>
    %48 = arith.addi %1, %47 : vector<1x1024xi32>
    %c16_i32_17 = arith.constant 16 : i32
    %49 = vector.broadcast %c16_i32_17 : i32 to vector<1x1024xi32>
    %50 = arith.cmpi slt, %48, %49 : vector<1x1024xi32>
    %51 = arith.andi %46, %50 : vector<1x1024xi1>
    %52 = arith.andi %42, %51 : vector<1x1024xi1>
    %53 = arith.extui %52 : vector<1x1024xi1> to vector<1x1024xi32>
    %54 = arith.sitofp %53 : vector<1x1024xi32> to vector<1x1024xf32>
    %c-1_i32_18 = arith.constant -1 : i32
    %55 = vector.broadcast %c-1_i32_18 : i32 to vector<1x1024xi32>
    %56 = arith.addi %1, %55 : vector<1x1024xi32>
    %c0_i32_19 = arith.constant 0 : i32
    %57 = vector.broadcast %c0_i32_19 : i32 to vector<1x1024xi32>
    %58 = arith.cmpi sge, %56, %57 : vector<1x1024xi32>
    %c-1_i32_20 = arith.constant -1 : i32
    %59 = vector.broadcast %c-1_i32_20 : i32 to vector<1x1024xi32>
    %60 = arith.addi %1, %59 : vector<1x1024xi32>
    %c16_i32_21 = arith.constant 16 : i32
    %61 = vector.broadcast %c16_i32_21 : i32 to vector<1x1024xi32>
    %62 = arith.cmpi slt, %60, %61 : vector<1x1024xi32>
    %63 = arith.andi %58, %62 : vector<1x1024xi1>
    %64 = arith.extui %63 : vector<1x1024xi1> to vector<1x1024xi32>
    %65 = arith.sitofp %64 : vector<1x1024xi32> to vector<1x1024xf32>
    %c1_i32_22 = arith.constant 1 : i32
    %66 = vector.broadcast %c1_i32_22 : i32 to vector<1x1024xi32>
    %67 = arith.addi %1, %66 : vector<1x1024xi32>
    %c0_i32_23 = arith.constant 0 : i32
    %68 = vector.broadcast %c0_i32_23 : i32 to vector<1x1024xi32>
    %69 = arith.cmpi sge, %67, %68 : vector<1x1024xi32>
    %c1_i32_24 = arith.constant 1 : i32
    %70 = vector.broadcast %c1_i32_24 : i32 to vector<1x1024xi32>
    %71 = arith.addi %1, %70 : vector<1x1024xi32>
    %c16_i32_25 = arith.constant 16 : i32
    %72 = vector.broadcast %c16_i32_25 : i32 to vector<1x1024xi32>
    %73 = arith.cmpi slt, %71, %72 : vector<1x1024xi32>
    %74 = arith.andi %69, %73 : vector<1x1024xi1>
    %75 = arith.extui %74 : vector<1x1024xi1> to vector<1x1024xi32>
    %76 = arith.sitofp %75 : vector<1x1024xi32> to vector<1x1024xf32>
    %c1_i32_26 = arith.constant 1 : i32
    %77 = vector.broadcast %c1_i32_26 : i32 to vector<1x1024xi32>
    %78 = arith.addi %0, %77 : vector<1x1024xi32>
    %c0_i32_27 = arith.constant 0 : i32
    %79 = vector.broadcast %c0_i32_27 : i32 to vector<1x1024xi32>
    %80 = arith.cmpi sge, %78, %79 : vector<1x1024xi32>
    %c1_i32_28 = arith.constant 1 : i32
    %81 = vector.broadcast %c1_i32_28 : i32 to vector<1x1024xi32>
    %82 = arith.addi %0, %81 : vector<1x1024xi32>
    %c16_i32_29 = arith.constant 16 : i32
    %83 = vector.broadcast %c16_i32_29 : i32 to vector<1x1024xi32>
    %84 = arith.cmpi slt, %82, %83 : vector<1x1024xi32>
    %85 = arith.andi %80, %84 : vector<1x1024xi1>
    %c-1_i32_30 = arith.constant -1 : i32
    %86 = vector.broadcast %c-1_i32_30 : i32 to vector<1x1024xi32>
    %87 = arith.addi %1, %86 : vector<1x1024xi32>
    %c0_i32_31 = arith.constant 0 : i32
    %88 = vector.broadcast %c0_i32_31 : i32 to vector<1x1024xi32>
    %89 = arith.cmpi sge, %87, %88 : vector<1x1024xi32>
    %c-1_i32_32 = arith.constant -1 : i32
    %90 = vector.broadcast %c-1_i32_32 : i32 to vector<1x1024xi32>
    %91 = arith.addi %1, %90 : vector<1x1024xi32>
    %c16_i32_33 = arith.constant 16 : i32
    %92 = vector.broadcast %c16_i32_33 : i32 to vector<1x1024xi32>
    %93 = arith.cmpi slt, %91, %92 : vector<1x1024xi32>
    %94 = arith.andi %89, %93 : vector<1x1024xi1>
    %95 = arith.andi %85, %94 : vector<1x1024xi1>
    %96 = arith.extui %95 : vector<1x1024xi1> to vector<1x1024xi32>
    %97 = arith.sitofp %96 : vector<1x1024xi32> to vector<1x1024xf32>
    %c1_i32_34 = arith.constant 1 : i32
    %98 = vector.broadcast %c1_i32_34 : i32 to vector<1x1024xi32>
    %99 = arith.addi %0, %98 : vector<1x1024xi32>
    %c0_i32_35 = arith.constant 0 : i32
    %100 = vector.broadcast %c0_i32_35 : i32 to vector<1x1024xi32>
    %101 = arith.cmpi sge, %99, %100 : vector<1x1024xi32>
    %c1_i32_36 = arith.constant 1 : i32
    %102 = vector.broadcast %c1_i32_36 : i32 to vector<1x1024xi32>
    %103 = arith.addi %0, %102 : vector<1x1024xi32>
    %c16_i32_37 = arith.constant 16 : i32
    %104 = vector.broadcast %c16_i32_37 : i32 to vector<1x1024xi32>
    %105 = arith.cmpi slt, %103, %104 : vector<1x1024xi32>
    %106 = arith.andi %101, %105 : vector<1x1024xi1>
    %107 = arith.extui %106 : vector<1x1024xi1> to vector<1x1024xi32>
    %108 = arith.sitofp %107 : vector<1x1024xi32> to vector<1x1024xf32>
    %c1_i32_38 = arith.constant 1 : i32
    %109 = vector.broadcast %c1_i32_38 : i32 to vector<1x1024xi32>
    %110 = arith.addi %0, %109 : vector<1x1024xi32>
    %c0_i32_39 = arith.constant 0 : i32
    %111 = vector.broadcast %c0_i32_39 : i32 to vector<1x1024xi32>
    %112 = arith.cmpi sge, %110, %111 : vector<1x1024xi32>
    %c1_i32_40 = arith.constant 1 : i32
    %113 = vector.broadcast %c1_i32_40 : i32 to vector<1x1024xi32>
    %114 = arith.addi %0, %113 : vector<1x1024xi32>
    %c16_i32_41 = arith.constant 16 : i32
    %115 = vector.broadcast %c16_i32_41 : i32 to vector<1x1024xi32>
    %116 = arith.cmpi slt, %114, %115 : vector<1x1024xi32>
    %117 = arith.andi %112, %116 : vector<1x1024xi1>
    %c1_i32_42 = arith.constant 1 : i32
    %118 = vector.broadcast %c1_i32_42 : i32 to vector<1x1024xi32>
    %119 = arith.addi %1, %118 : vector<1x1024xi32>
    %c0_i32_43 = arith.constant 0 : i32
    %120 = vector.broadcast %c0_i32_43 : i32 to vector<1x1024xi32>
    %121 = arith.cmpi sge, %119, %120 : vector<1x1024xi32>
    %c1_i32_44 = arith.constant 1 : i32
    %122 = vector.broadcast %c1_i32_44 : i32 to vector<1x1024xi32>
    %123 = arith.addi %1, %122 : vector<1x1024xi32>
    %c16_i32_45 = arith.constant 16 : i32
    %124 = vector.broadcast %c16_i32_45 : i32 to vector<1x1024xi32>
    %125 = arith.cmpi slt, %123, %124 : vector<1x1024xi32>
    %126 = arith.andi %121, %125 : vector<1x1024xi1>
    %127 = arith.andi %117, %126 : vector<1x1024xi1>
    %128 = arith.extui %127 : vector<1x1024xi1> to vector<1x1024xi32>
    %129 = arith.sitofp %128 : vector<1x1024xi32> to vector<1x1024xf32>
    %c0_46 = arith.constant 0 : index
    %c0_47 = arith.constant 0 : index
    %c0_48 = arith.constant 0 : index
    %130 = vector.load %arg1[%c0_46, %c0_47, %c0_48] : memref<2x4x1024xf32, #tpu.memory_space<vmem>>, vector<1x4x1024xf32>
    %131 = vector.shape_cast %130 : vector<1x4x1024xf32> to vector<4x1024xf32>
    %c68_i32 = arith.constant 68 : i32
    %132 = tpu.dynamic_rotate %131 by %c68_i32 dim 1 : vector<4x1024xf32>, i32 -> vector<4x1024xf32>
    %133 = vector.broadcast %22 : vector<1x1024xf32> to vector<4x1024xf32>
    %134 = arith.mulf %132, %133 : vector<4x1024xf32>
    %c0_49 = arith.constant 0 : index
    %c0_50 = arith.constant 0 : index
    %135 = vector.load %arg6[%c0_49, %c0_50] : memref<36x1024xf32, #tpu.memory_space<vmem>>, vector<4x1024xf32>
    tpu.vector_store %arg6[%c0_49, %c0_50], %134 {strides = array<i32>} : memref<36x1024xf32, #tpu.memory_space<vmem>>, vector<4x1024xf32>,
    %c64_i32 = arith.constant 64 : i32
    %136 = tpu.dynamic_rotate %131 by %c64_i32 dim 1 : vector<4x1024xf32>, i32 -> vector<4x1024xf32>
    %137 = vector.broadcast %33 : vector<1x1024xf32> to vector<4x1024xf32>
    %138 = arith.mulf %136, %137 : vector<4x1024xf32>
    %c4 = arith.constant 4 : index
    %c0_51 = arith.constant 0 : index
    %139 = vector.load %arg6[%c4, %c0_51] : memref<36x1024xf32, #tpu.memory_space<vmem>>, vector<4x1024xf32>
    tpu.vector_store %arg6[%c4, %c0_51], %138 {strides = array<i32>} : memref<36x1024xf32, #tpu.memory_space<vmem>>, vector<4x1024xf32>,
    %c60_i32 = arith.constant 60 : i32
    %140 = tpu.dynamic_rotate %131 by %c60_i32 dim 1 : vector<4x1024xf32>, i32 -> vector<4x1024xf32>
    %141 = vector.broadcast %54 : vector<1x1024xf32> to vector<4x1024xf32>
    %142 = arith.mulf %140, %141 : vector<4x1024xf32>
    %c8 = arith.constant 8 : index
    %c0_52 = arith.constant 0 : index
    %143 = vector.load %arg6[%c8, %c0_52] : memref<36x1024xf32, #tpu.memory_space<vmem>>, vector<4x1024xf32>
    tpu.vector_store %arg6[%c8, %c0_52], %142 {strides = array<i32>} : memref<36x1024xf32, #tpu.memory_space<vmem>>, vector<4x1024xf32>,
    %c4_i32 = arith.constant 4 : i32
    %144 = tpu.dynamic_rotate %131 by %c4_i32 dim 1 : vector<4x1024xf32>, i32 -> vector<4x1024xf32>
    %145 = vector.broadcast %65 : vector<1x1024xf32> to vector<4x1024xf32>
    %146 = arith.mulf %144, %145 : vector<4x1024xf32>
    %c12 = arith.constant 12 : index
    %c0_53 = arith.constant 0 : index
    %147 = vector.load %arg6[%c12, %c0_53] : memref<36x1024xf32, #tpu.memory_space<vmem>>, vector<4x1024xf32>
    tpu.vector_store %arg6[%c12, %c0_53], %146 {strides = array<i32>} : memref<36x1024xf32, #tpu.memory_space<vmem>>, vector<4x1024xf32>,
    %c16 = arith.constant 16 : index
    %c0_54 = arith.constant 0 : index
    %148 = vector.load %arg6[%c16, %c0_54] : memref<36x1024xf32, #tpu.memory_space<vmem>>, vector<4x1024xf32>
    tpu.vector_store %arg6[%c16, %c0_54], %131 {strides = array<i32>} : memref<36x1024xf32, #tpu.memory_space<vmem>>, vector<4x1024xf32>,
    %c1020_i32 = arith.constant 1020 : i32
    %149 = tpu.dynamic_rotate %131 by %c1020_i32 dim 1 : vector<4x1024xf32>, i32 -> vector<4x1024xf32>
    %150 = vector.broadcast %76 : vector<1x1024xf32> to vector<4x1024xf32>
    %151 = arith.mulf %149, %150 : vector<4x1024xf32>
    %c20 = arith.constant 20 : index
    %c0_55 = arith.constant 0 : index
    %152 = vector.load %arg6[%c20, %c0_55] : memref<36x1024xf32, #tpu.memory_space<vmem>>, vector<4x1024xf32>
    tpu.vector_store %arg6[%c20, %c0_55], %151 {strides = array<i32>} : memref<36x1024xf32, #tpu.memory_space<vmem>>, vector<4x1024xf32>,
    %c964_i32 = arith.constant 964 : i32
    %153 = tpu.dynamic_rotate %131 by %c964_i32 dim 1 : vector<4x1024xf32>, i32 -> vector<4x1024xf32>
    %154 = vector.broadcast %97 : vector<1x1024xf32> to vector<4x1024xf32>
    %155 = arith.mulf %153, %154 : vector<4x1024xf32>
    %c24 = arith.constant 24 : index
    %c0_56 = arith.constant 0 : index
    %156 = vector.load %arg6[%c24, %c0_56] : memref<36x1024xf32, #tpu.memory_space<vmem>>, vector<4x1024xf32>
    tpu.vector_store %arg6[%c24, %c0_56], %155 {strides = array<i32>} : memref<36x1024xf32, #tpu.memory_space<vmem>>, vector<4x1024xf32>,
    %c960_i32 = arith.constant 960 : i32
    %157 = tpu.dynamic_rotate %131 by %c960_i32 dim 1 : vector<4x1024xf32>, i32 -> vector<4x1024xf32>
    %158 = vector.broadcast %108 : vector<1x1024xf32> to vector<4x1024xf32>
    %159 = arith.mulf %157, %158 : vector<4x1024xf32>
    %c28 = arith.constant 28 : index
    %c0_57 = arith.constant 0 : index
    %160 = vector.load %arg6[%c28, %c0_57] : memref<36x1024xf32, #tpu.memory_space<vmem>>, vector<4x1024xf32>
    tpu.vector_store %arg6[%c28, %c0_57], %159 {strides = array<i32>} : memref<36x1024xf32, #tpu.memory_space<vmem>>, vector<4x1024xf32>,
    %c956_i32 = arith.constant 956 : i32
    %161 = tpu.dynamic_rotate %131 by %c956_i32 dim 1 : vector<4x1024xf32>, i32 -> vector<4x1024xf32>
    %162 = vector.broadcast %129 : vector<1x1024xf32> to vector<4x1024xf32>
    %163 = arith.mulf %161, %162 : vector<4x1024xf32>
    %c32 = arith.constant 32 : index
    %c0_58 = arith.constant 0 : index
    %164 = vector.load %arg6[%c32, %c0_58] : memref<36x1024xf32, #tpu.memory_space<vmem>>, vector<4x1024xf32>
    tpu.vector_store %arg6[%c32, %c0_58], %163 {strides = array<i32>} : memref<36x1024xf32, #tpu.memory_space<vmem>>, vector<4x1024xf32>,
    %c0_59 = arith.constant 0 : index
    %c0_60 = arith.constant 0 : index
    %165 = vector.load %arg2[%c0_59, %c0_60] : memref<8x36xf32, #tpu.memory_space<vmem>>, vector<8x36xf32>
    %c0_61 = arith.constant 0 : index
    %c0_62 = arith.constant 0 : index
    %166 = vector.load %arg6[%c0_61, %c0_62] : memref<36x1024xf32, #tpu.memory_space<vmem>>, vector<36x1024xf32>
    %cst = arith.constant dense<0.000000e+00> : vector<8x1024xf32>
    %167 = tpu.matmul %165, %166, %cst {dimension_numbers = #tpu.dot_dimension_numbers<[1], [0], [0], [1], [0, 0, 1, 1], [], []>} : vector<8x36xf32>, vector<36x1024xf32>, vector<8x1024xf32> -> vector<8x1024xf32>
    %cst_63 = arith.constant dense<0.000000e+00> : vector<8xf32>
    %168 = vector.multi_reduction <add>, %167, %cst_63 [1] : vector<8x1024xf32> to vector<8xf32>
    %169 = vector.shape_cast %168 : vector<8xf32> to vector<8x1xf32>
    %170 = arith.mulf %167, %167 : vector<8x1024xf32>
    %cst_64 = arith.constant dense<0.000000e+00> : vector<8xf32>
    %171 = vector.multi_reduction <add>, %170, %cst_64 [1] : vector<8x1024xf32> to vector<8xf32>
    %172 = vector.shape_cast %171 : vector<8xf32> to vector<8x1xf32>
    %cst_65 = arith.constant 9.765625E-4 : f32
    %173 = vector.broadcast %cst_65 : f32 to vector<8x1xf32>
    %174 = arith.mulf %169, %173 : vector<8x1xf32>
    %cst_66 = arith.constant 9.765625E-4 : f32
    %175 = vector.broadcast %cst_66 : f32 to vector<8x1xf32>
    %176 = arith.mulf %172, %175 : vector<8x1xf32>
    %177 = arith.mulf %174, %174 : vector<8x1xf32>
    %178 = arith.subf %176, %177 : vector<8x1xf32>
    %cst_67 = arith.constant 0.000000e+00 : f32
    %179 = vector.broadcast %cst_67 : f32 to vector<8x1xf32>
    %180 = arith.maximumf %178, %179 : vector<8x1xf32>
    %181 = vector.broadcast %174 : vector<8x1xf32> to vector<8x1024xf32>
    %182 = arith.subf %167, %181 : vector<8x1024xf32>
    %cst_68 = arith.constant 9.99999974E-6 : f32
    %183 = vector.broadcast %cst_68 : f32 to vector<8x1xf32>
    %184 = arith.addf %180, %183 : vector<8x1xf32>
    %185 = math.rsqrt %184 : vector<8x1xf32>
    %186 = vector.broadcast %185 : vector<8x1xf32> to vector<8x1024xf32>
    %187 = arith.mulf %182, %186 : vector<8x1024xf32>
    %cst_69 = arith.constant 0.000000e+00 : f32
    %188 = vector.broadcast %cst_69 : f32 to vector<8x1024xf32>
    %189 = arith.maximumf %187, %188 : vector<8x1024xf32>
    %c68_i32_70 = arith.constant 68 : i32
    %190 = tpu.dynamic_rotate %189 by %c68_i32_70 dim 1 : vector<8x1024xf32>, i32 -> vector<8x1024xf32>
    %191 = vector.broadcast %22 : vector<1x1024xf32> to vector<8x1024xf32>
    %192 = arith.mulf %190, %191 : vector<8x1024xf32>
    %c0_71 = arith.constant 0 : index
    %c0_72 = arith.constant 0 : index
    %193 = vector.load %arg7[%c0_71, %c0_72] : memref<72x1024xf32, #tpu.memory_space<vmem>>, vector<8x1024xf32>
    tpu.vector_store %arg7[%c0_71, %c0_72], %192 {strides = array<i32>} : memref<72x1024xf32, #tpu.memory_space<vmem>>, vector<8x1024xf32>,
    %c64_i32_73 = arith.constant 64 : i32
    %194 = tpu.dynamic_rotate %189 by %c64_i32_73 dim 1 : vector<8x1024xf32>, i32 -> vector<8x1024xf32>
    %195 = vector.broadcast %33 : vector<1x1024xf32> to vector<8x1024xf32>
    %196 = arith.mulf %194, %195 : vector<8x1024xf32>
    %c8_74 = arith.constant 8 : index
    %c0_75 = arith.constant 0 : index
    %197 = vector.load %arg7[%c8_74, %c0_75] : memref<72x1024xf32, #tpu.memory_space<vmem>>, vector<8x1024xf32>
    tpu.vector_store %arg7[%c8_74, %c0_75], %196 {strides = array<i32>} : memref<72x1024xf32, #tpu.memory_space<vmem>>, vector<8x1024xf32>,
    %c60_i32_76 = arith.constant 60 : i32
    %198 = tpu.dynamic_rotate %189 by %c60_i32_76 dim 1 : vector<8x1024xf32>, i32 -> vector<8x1024xf32>
    %199 = vector.broadcast %54 : vector<1x1024xf32> to vector<8x1024xf32>
    %200 = arith.mulf %198, %199 : vector<8x1024xf32>
    %c16_77 = arith.constant 16 : index
    %c0_78 = arith.constant 0 : index
    %201 = vector.load %arg7[%c16_77, %c0_78] : memref<72x1024xf32, #tpu.memory_space<vmem>>, vector<8x1024xf32>
    tpu.vector_store %arg7[%c16_77, %c0_78], %200 {strides = array<i32>} : memref<72x1024xf32, #tpu.memory_space<vmem>>, vector<8x1024xf32>,
    %c4_i32_79 = arith.constant 4 : i32
    %202 = tpu.dynamic_rotate %189 by %c4_i32_79 dim 1 : vector<8x1024xf32>, i32 -> vector<8x1024xf32>
    %203 = vector.broadcast %65 : vector<1x1024xf32> to vector<8x1024xf32>
    %204 = arith.mulf %202, %203 : vector<8x1024xf32>
    %c24_80 = arith.constant 24 : index
    %c0_81 = arith.constant 0 : index
    %205 = vector.load %arg7[%c24_80, %c0_81] : memref<72x1024xf32, #tpu.memory_space<vmem>>, vector<8x1024xf32>
    tpu.vector_store %arg7[%c24_80, %c0_81], %204 {strides = array<i32>} : memref<72x1024xf32, #tpu.memory_space<vmem>>, vector<8x1024xf32>,
    %c32_82 = arith.constant 32 : index
    %c0_83 = arith.constant 0 : index
    %206 = vector.load %arg7[%c32_82, %c0_83] : memref<72x1024xf32, #tpu.memory_space<vmem>>, vector<8x1024xf32>
    tpu.vector_store %arg7[%c32_82, %c0_83], %189 {strides = array<i32>} : memref<72x1024xf32, #tpu.memory_space<vmem>>, vector<8x1024xf32>,
    %c1020_i32_84 = arith.constant 1020 : i32
    %207 = tpu.dynamic_rotate %189 by %c1020_i32_84 dim 1 : vector<8x1024xf32>, i32 -> vector<8x1024xf32>
    %208 = vector.broadcast %76 : vector<1x1024xf32> to vector<8x1024xf32>
    %209 = arith.mulf %207, %208 : vector<8x1024xf32>
    %c40 = arith.constant 40 : index
    %c0_85 = arith.constant 0 : index
    %210 = vector.load %arg7[%c40, %c0_85] : memref<72x1024xf32, #tpu.memory_space<vmem>>, vector<8x1024xf32>
    tpu.vector_store %arg7[%c40, %c0_85], %209 {strides = array<i32>} : memref<72x1024xf32, #tpu.memory_space<vmem>>, vector<8x1024xf32>,
    %c964_i32_86 = arith.constant 964 : i32
    %211 = tpu.dynamic_rotate %189 by %c964_i32_86 dim 1 : vector<8x1024xf32>, i32 -> vector<8x1024xf32>
    %212 = vector.broadcast %97 : vector<1x1024xf32> to vector<8x1024xf32>
    %213 = arith.mulf %211, %212 : vector<8x1024xf32>
    %c48 = arith.constant 48 : index
    %c0_87 = arith.constant 0 : index
    %214 = vector.load %arg7[%c48, %c0_87] : memref<72x1024xf32, #tpu.memory_space<vmem>>, vector<8x1024xf32>
    tpu.vector_store %arg7[%c48, %c0_87], %213 {strides = array<i32>} : memref<72x1024xf32, #tpu.memory_space<vmem>>, vector<8x1024xf32>,
    %c960_i32_88 = arith.constant 960 : i32
    %215 = tpu.dynamic_rotate %189 by %c960_i32_88 dim 1 : vector<8x1024xf32>, i32 -> vector<8x1024xf32>
    %216 = vector.broadcast %108 : vector<1x1024xf32> to vector<8x1024xf32>
    %217 = arith.mulf %215, %216 : vector<8x1024xf32>
    %c56 = arith.constant 56 : index
    %c0_89 = arith.constant 0 : index
    %218 = vector.load %arg7[%c56, %c0_89] : memref<72x1024xf32, #tpu.memory_space<vmem>>, vector<8x1024xf32>
    tpu.vector_store %arg7[%c56, %c0_89], %217 {strides = array<i32>} : memref<72x1024xf32, #tpu.memory_space<vmem>>, vector<8x1024xf32>,
    %c956_i32_90 = arith.constant 956 : i32
    %219 = tpu.dynamic_rotate %189 by %c956_i32_90 dim 1 : vector<8x1024xf32>, i32 -> vector<8x1024xf32>
    %220 = vector.broadcast %129 : vector<1x1024xf32> to vector<8x1024xf32>
    %221 = arith.mulf %219, %220 : vector<8x1024xf32>
    %c64 = arith.constant 64 : index
    %c0_91 = arith.constant 0 : index
    %222 = vector.load %arg7[%c64, %c0_91] : memref<72x1024xf32, #tpu.memory_space<vmem>>, vector<8x1024xf32>
    tpu.vector_store %arg7[%c64, %c0_91], %221 {strides = array<i32>} : memref<72x1024xf32, #tpu.memory_space<vmem>>, vector<8x1024xf32>,
    %c0_92 = arith.constant 0 : index
    %c0_93 = arith.constant 0 : index
    %223 = vector.load %arg3[%c0_92, %c0_93] : memref<8x72xf32, #tpu.memory_space<vmem>>, vector<8x72xf32>
    %c0_94 = arith.constant 0 : index
    %c0_95 = arith.constant 0 : index
    %224 = vector.load %arg7[%c0_94, %c0_95] : memref<72x1024xf32, #tpu.memory_space<vmem>>, vector<72x1024xf32>
    %cst_96 = arith.constant dense<0.000000e+00> : vector<8x1024xf32>
    %225 = tpu.matmul %223, %224, %cst_96 {dimension_numbers = #tpu.dot_dimension_numbers<[1], [0], [0], [1], [0, 0, 1, 1], [], []>} : vector<8x72xf32>, vector<72x1024xf32>, vector<8x1024xf32> -> vector<8x1024xf32>
    %cst_97 = arith.constant dense<0.000000e+00> : vector<8xf32>
    %226 = vector.multi_reduction <add>, %225, %cst_97 [1] : vector<8x1024xf32> to vector<8xf32>
    %227 = vector.shape_cast %226 : vector<8xf32> to vector<8x1xf32>
    %228 = arith.mulf %225, %225 : vector<8x1024xf32>
    %cst_98 = arith.constant dense<0.000000e+00> : vector<8xf32>
    %229 = vector.multi_reduction <add>, %228, %cst_98 [1] : vector<8x1024xf32> to vector<8xf32>
    %230 = vector.shape_cast %229 : vector<8xf32> to vector<8x1xf32>
    %cst_99 = arith.constant 9.765625E-4 : f32
    %231 = vector.broadcast %cst_99 : f32 to vector<8x1xf32>
    %232 = arith.mulf %227, %231 : vector<8x1xf32>
    %cst_100 = arith.constant 9.765625E-4 : f32
    %233 = vector.broadcast %cst_100 : f32 to vector<8x1xf32>
    %234 = arith.mulf %230, %233 : vector<8x1xf32>
    %235 = arith.mulf %232, %232 : vector<8x1xf32>
    %236 = arith.subf %234, %235 : vector<8x1xf32>
    %cst_101 = arith.constant 0.000000e+00 : f32
    %237 = vector.broadcast %cst_101 : f32 to vector<8x1xf32>
    %238 = arith.maximumf %236, %237 : vector<8x1xf32>
    %239 = vector.broadcast %232 : vector<8x1xf32> to vector<8x1024xf32>
    %240 = arith.subf %225, %239 : vector<8x1024xf32>
    %cst_102 = arith.constant 9.99999974E-6 : f32
    %241 = vector.broadcast %cst_102 : f32 to vector<8x1xf32>
    %242 = arith.addf %238, %241 : vector<8x1xf32>
    %243 = math.rsqrt %242 : vector<8x1xf32>
    %244 = vector.broadcast %243 : vector<8x1xf32> to vector<8x1024xf32>
    %245 = arith.mulf %240, %244 : vector<8x1024xf32>
    %cst_103 = arith.constant 0.000000e+00 : f32
    %246 = vector.broadcast %cst_103 : f32 to vector<8x1024xf32>
    %247 = arith.maximumf %245, %246 : vector<8x1024xf32>
    %c0_104 = arith.constant 0 : index
    %c0_105 = arith.constant 0 : index
    %c0_106 = arith.constant 0 : index
    %248 = vector.load %arg5[%c0_104, %c0_105, %c0_106] : memref<2x8x1024xf32, #tpu.memory_space<vmem>>, vector<1x8x1024xf32>
    %249 = vector.shape_cast %248 : vector<1x8x1024xf32> to vector<8x1024xf32>
    %250 = vector.shape_cast %247 : vector<8x1024xf32> to vector<1x8x1024xf32>
    tpu.vector_store %arg5[%c0_104, %c0_105, %c0_106], %250 {strides = array<i32>} : memref<2x8x1024xf32, #tpu.memory_space<vmem>>, vector<1x8x1024xf32>,
    %c1_107 = arith.constant 1 : index
    %c0_108 = arith.constant 0 : index
    %c0_109 = arith.constant 0 : index
    %251 = vector.load %arg1[%c1_107, %c0_108, %c0_109] : memref<2x4x1024xf32, #tpu.memory_space<vmem>>, vector<1x4x1024xf32>
    %252 = vector.shape_cast %251 : vector<1x4x1024xf32> to vector<4x1024xf32>
    %c68_i32_110 = arith.constant 68 : i32
    %253 = tpu.dynamic_rotate %252 by %c68_i32_110 dim 1 : vector<4x1024xf32>, i32 -> vector<4x1024xf32>
    %254 = vector.broadcast %22 : vector<1x1024xf32> to vector<4x1024xf32>
    %255 = arith.mulf %253, %254 : vector<4x1024xf32>
    %c0_111 = arith.constant 0 : index
    %c0_112 = arith.constant 0 : index
    %256 = vector.load %arg6[%c0_111, %c0_112] : memref<36x1024xf32, #tpu.memory_space<vmem>>, vector<4x1024xf32>
    tpu.vector_store %arg6[%c0_111, %c0_112], %255 {strides = array<i32>} : memref<36x1024xf32, #tpu.memory_space<vmem>>, vector<4x1024xf32>,
    %c64_i32_113 = arith.constant 64 : i32
    %257 = tpu.dynamic_rotate %252 by %c64_i32_113 dim 1 : vector<4x1024xf32>, i32 -> vector<4x1024xf32>
    %258 = vector.broadcast %33 : vector<1x1024xf32> to vector<4x1024xf32>
    %259 = arith.mulf %257, %258 : vector<4x1024xf32>
    %c4_114 = arith.constant 4 : index
    %c0_115 = arith.constant 0 : index
    %260 = vector.load %arg6[%c4_114, %c0_115] : memref<36x1024xf32, #tpu.memory_space<vmem>>, vector<4x1024xf32>
    tpu.vector_store %arg6[%c4_114, %c0_115], %259 {strides = array<i32>} : memref<36x1024xf32, #tpu.memory_space<vmem>>, vector<4x1024xf32>,
    %c60_i32_116 = arith.constant 60 : i32
    %261 = tpu.dynamic_rotate %252 by %c60_i32_116 dim 1 : vector<4x1024xf32>, i32 -> vector<4x1024xf32>
    %262 = vector.broadcast %54 : vector<1x1024xf32> to vector<4x1024xf32>
    %263 = arith.mulf %261, %262 : vector<4x1024xf32>
    %c8_117 = arith.constant 8 : index
    %c0_118 = arith.constant 0 : index
    %264 = vector.load %arg6[%c8_117, %c0_118] : memref<36x1024xf32, #tpu.memory_space<vmem>>, vector<4x1024xf32>
    tpu.vector_store %arg6[%c8_117, %c0_118], %263 {strides = array<i32>} : memref<36x1024xf32, #tpu.memory_space<vmem>>, vector<4x1024xf32>,
    %c4_i32_119 = arith.constant 4 : i32
    %265 = tpu.dynamic_rotate %252 by %c4_i32_119 dim 1 : vector<4x1024xf32>, i32 -> vector<4x1024xf32>
    %266 = vector.broadcast %65 : vector<1x1024xf32> to vector<4x1024xf32>
    %267 = arith.mulf %265, %266 : vector<4x1024xf32>
    %c12_120 = arith.constant 12 : index
    %c0_121 = arith.constant 0 : index
    %268 = vector.load %arg6[%c12_120, %c0_121] : memref<36x1024xf32, #tpu.memory_space<vmem>>, vector<4x1024xf32>
    tpu.vector_store %arg6[%c12_120, %c0_121], %267 {strides = array<i32>} : memref<36x1024xf32, #tpu.memory_space<vmem>>, vector<4x1024xf32>,
    %c16_122 = arith.constant 16 : index
    %c0_123 = arith.constant 0 : index
    %269 = vector.load %arg6[%c16_122, %c0_123] : memref<36x1024xf32, #tpu.memory_space<vmem>>, vector<4x1024xf32>
    tpu.vector_store %arg6[%c16_122, %c0_123], %252 {strides = array<i32>} : memref<36x1024xf32, #tpu.memory_space<vmem>>, vector<4x1024xf32>,
    %c1020_i32_124 = arith.constant 1020 : i32
    %270 = tpu.dynamic_rotate %252 by %c1020_i32_124 dim 1 : vector<4x1024xf32>, i32 -> vector<4x1024xf32>
    %271 = vector.broadcast %76 : vector<1x1024xf32> to vector<4x1024xf32>
    %272 = arith.mulf %270, %271 : vector<4x1024xf32>
    %c20_125 = arith.constant 20 : index
    %c0_126 = arith.constant 0 : index
    %273 = vector.load %arg6[%c20_125, %c0_126] : memref<36x1024xf32, #tpu.memory_space<vmem>>, vector<4x1024xf32>
    tpu.vector_store %arg6[%c20_125, %c0_126], %272 {strides = array<i32>} : memref<36x1024xf32, #tpu.memory_space<vmem>>, vector<4x1024xf32>,
    %c964_i32_127 = arith.constant 964 : i32
    %274 = tpu.dynamic_rotate %252 by %c964_i32_127 dim 1 : vector<4x1024xf32>, i32 -> vector<4x1024xf32>
    %275 = vector.broadcast %97 : vector<1x1024xf32> to vector<4x1024xf32>
    %276 = arith.mulf %274, %275 : vector<4x1024xf32>
    %c24_128 = arith.constant 24 : index
    %c0_129 = arith.constant 0 : index
    %277 = vector.load %arg6[%c24_128, %c0_129] : memref<36x1024xf32, #tpu.memory_space<vmem>>, vector<4x1024xf32>
    tpu.vector_store %arg6[%c24_128, %c0_129], %276 {strides = array<i32>} : memref<36x1024xf32, #tpu.memory_space<vmem>>, vector<4x1024xf32>,
    %c960_i32_130 = arith.constant 960 : i32
    %278 = tpu.dynamic_rotate %252 by %c960_i32_130 dim 1 : vector<4x1024xf32>, i32 -> vector<4x1024xf32>
    %279 = vector.broadcast %108 : vector<1x1024xf32> to vector<4x1024xf32>
    %280 = arith.mulf %278, %279 : vector<4x1024xf32>
    %c28_131 = arith.constant 28 : index
    %c0_132 = arith.constant 0 : index
    %281 = vector.load %arg6[%c28_131, %c0_132] : memref<36x1024xf32, #tpu.memory_space<vmem>>, vector<4x1024xf32>
    tpu.vector_store %arg6[%c28_131, %c0_132], %280 {strides = array<i32>} : memref<36x1024xf32, #tpu.memory_space<vmem>>, vector<4x1024xf32>,
    %c956_i32_133 = arith.constant 956 : i32
    %282 = tpu.dynamic_rotate %252 by %c956_i32_133 dim 1 : vector<4x1024xf32>, i32 -> vector<4x1024xf32>
    %283 = vector.broadcast %129 : vector<1x1024xf32> to vector<4x1024xf32>
    %284 = arith.mulf %282, %283 : vector<4x1024xf32>
    %c32_134 = arith.constant 32 : index
    %c0_135 = arith.constant 0 : index
    %285 = vector.load %arg6[%c32_134, %c0_135] : memref<36x1024xf32, #tpu.memory_space<vmem>>, vector<4x1024xf32>
    tpu.vector_store %arg6[%c32_134, %c0_135], %284 {strides = array<i32>} : memref<36x1024xf32, #tpu.memory_space<vmem>>, vector<4x1024xf32>,
    %c0_136 = arith.constant 0 : index
    %c0_137 = arith.constant 0 : index
    %286 = vector.load %arg2[%c0_136, %c0_137] : memref<8x36xf32, #tpu.memory_space<vmem>>, vector<8x36xf32>
    %c0_138 = arith.constant 0 : index
    %c0_139 = arith.constant 0 : index
    %287 = vector.load %arg6[%c0_138, %c0_139] : memref<36x1024xf32, #tpu.memory_space<vmem>>, vector<36x1024xf32>
    %cst_140 = arith.constant dense<0.000000e+00> : vector<8x1024xf32>
    %288 = tpu.matmul %286, %287, %cst_140 {dimension_numbers = #tpu.dot_dimension_numbers<[1], [0], [0], [1], [0, 0, 1, 1], [], []>} : vector<8x36xf32>, vector<36x1024xf32>, vector<8x1024xf32> -> vector<8x1024xf32>
    %cst_141 = arith.constant dense<0.000000e+00> : vector<8xf32>
    %289 = vector.multi_reduction <add>, %288, %cst_141 [1] : vector<8x1024xf32> to vector<8xf32>
    %290 = vector.shape_cast %289 : vector<8xf32> to vector<8x1xf32>
    %291 = arith.mulf %288, %288 : vector<8x1024xf32>
    %cst_142 = arith.constant dense<0.000000e+00> : vector<8xf32>
    %292 = vector.multi_reduction <add>, %291, %cst_142 [1] : vector<8x1024xf32> to vector<8xf32>
    %293 = vector.shape_cast %292 : vector<8xf32> to vector<8x1xf32>
    %cst_143 = arith.constant 9.765625E-4 : f32
    %294 = vector.broadcast %cst_143 : f32 to vector<8x1xf32>
    %295 = arith.mulf %290, %294 : vector<8x1xf32>
    %cst_144 = arith.constant 9.765625E-4 : f32
    %296 = vector.broadcast %cst_144 : f32 to vector<8x1xf32>
    %297 = arith.mulf %293, %296 : vector<8x1xf32>
    %298 = arith.mulf %295, %295 : vector<8x1xf32>
    %299 = arith.subf %297, %298 : vector<8x1xf32>
    %cst_145 = arith.constant 0.000000e+00 : f32
    %300 = vector.broadcast %cst_145 : f32 to vector<8x1xf32>
    %301 = arith.maximumf %299, %300 : vector<8x1xf32>
    %302 = vector.broadcast %295 : vector<8x1xf32> to vector<8x1024xf32>
    %303 = arith.subf %288, %302 : vector<8x1024xf32>
    %cst_146 = arith.constant 9.99999974E-6 : f32
    %304 = vector.broadcast %cst_146 : f32 to vector<8x1xf32>
    %305 = arith.addf %301, %304 : vector<8x1xf32>
    %306 = math.rsqrt %305 : vector<8x1xf32>
    %307 = vector.broadcast %306 : vector<8x1xf32> to vector<8x1024xf32>
    %308 = arith.mulf %303, %307 : vector<8x1024xf32>
    %cst_147 = arith.constant 0.000000e+00 : f32
    %309 = vector.broadcast %cst_147 : f32 to vector<8x1024xf32>
    %310 = arith.maximumf %308, %309 : vector<8x1024xf32>
    %c68_i32_148 = arith.constant 68 : i32
    %311 = tpu.dynamic_rotate %310 by %c68_i32_148 dim 1 : vector<8x1024xf32>, i32 -> vector<8x1024xf32>
    %312 = vector.broadcast %22 : vector<1x1024xf32> to vector<8x1024xf32>
    %313 = arith.mulf %311, %312 : vector<8x1024xf32>
    %c0_149 = arith.constant 0 : index
    %c0_150 = arith.constant 0 : index
    %314 = vector.load %arg7[%c0_149, %c0_150] : memref<72x1024xf32, #tpu.memory_space<vmem>>, vector<8x1024xf32>
    tpu.vector_store %arg7[%c0_149, %c0_150], %313 {strides = array<i32>} : memref<72x1024xf32, #tpu.memory_space<vmem>>, vector<8x1024xf32>,
    %c64_i32_151 = arith.constant 64 : i32
    %315 = tpu.dynamic_rotate %310 by %c64_i32_151 dim 1 : vector<8x1024xf32>, i32 -> vector<8x1024xf32>
    %316 = vector.broadcast %33 : vector<1x1024xf32> to vector<8x1024xf32>
    %317 = arith.mulf %315, %316 : vector<8x1024xf32>
    %c8_152 = arith.constant 8 : index
    %c0_153 = arith.constant 0 : index
    %318 = vector.load %arg7[%c8_152, %c0_153] : memref<72x1024xf32, #tpu.memory_space<vmem>>, vector<8x1024xf32>
    tpu.vector_store %arg7[%c8_152, %c0_153], %317 {strides = array<i32>} : memref<72x1024xf32, #tpu.memory_space<vmem>>, vector<8x1024xf32>,
    %c60_i32_154 = arith.constant 60 : i32
    %319 = tpu.dynamic_rotate %310 by %c60_i32_154 dim 1 : vector<8x1024xf32>, i32 -> vector<8x1024xf32>
    %320 = vector.broadcast %54 : vector<1x1024xf32> to vector<8x1024xf32>
    %321 = arith.mulf %319, %320 : vector<8x1024xf32>
    %c16_155 = arith.constant 16 : index
    %c0_156 = arith.constant 0 : index
    %322 = vector.load %arg7[%c16_155, %c0_156] : memref<72x1024xf32, #tpu.memory_space<vmem>>, vector<8x1024xf32>
    tpu.vector_store %arg7[%c16_155, %c0_156], %321 {strides = array<i32>} : memref<72x1024xf32, #tpu.memory_space<vmem>>, vector<8x1024xf32>,
    %c4_i32_157 = arith.constant 4 : i32
    %323 = tpu.dynamic_rotate %310 by %c4_i32_157 dim 1 : vector<8x1024xf32>, i32 -> vector<8x1024xf32>
    %324 = vector.broadcast %65 : vector<1x1024xf32> to vector<8x1024xf32>
    %325 = arith.mulf %323, %324 : vector<8x1024xf32>
    %c24_158 = arith.constant 24 : index
    %c0_159 = arith.constant 0 : index
    %326 = vector.load %arg7[%c24_158, %c0_159] : memref<72x1024xf32, #tpu.memory_space<vmem>>, vector<8x1024xf32>
    tpu.vector_store %arg7[%c24_158, %c0_159], %325 {strides = array<i32>} : memref<72x1024xf32, #tpu.memory_space<vmem>>, vector<8x1024xf32>,
    %c32_160 = arith.constant 32 : index
    %c0_161 = arith.constant 0 : index
    %327 = vector.load %arg7[%c32_160, %c0_161] : memref<72x1024xf32, #tpu.memory_space<vmem>>, vector<8x1024xf32>
    tpu.vector_store %arg7[%c32_160, %c0_161], %310 {strides = array<i32>} : memref<72x1024xf32, #tpu.memory_space<vmem>>, vector<8x1024xf32>,
    %c1020_i32_162 = arith.constant 1020 : i32
    %328 = tpu.dynamic_rotate %310 by %c1020_i32_162 dim 1 : vector<8x1024xf32>, i32 -> vector<8x1024xf32>
    %329 = vector.broadcast %76 : vector<1x1024xf32> to vector<8x1024xf32>
    %330 = arith.mulf %328, %329 : vector<8x1024xf32>
    %c40_163 = arith.constant 40 : index
    %c0_164 = arith.constant 0 : index
    %331 = vector.load %arg7[%c40_163, %c0_164] : memref<72x1024xf32, #tpu.memory_space<vmem>>, vector<8x1024xf32>
    tpu.vector_store %arg7[%c40_163, %c0_164], %330 {strides = array<i32>} : memref<72x1024xf32, #tpu.memory_space<vmem>>, vector<8x1024xf32>,
    %c964_i32_165 = arith.constant 964 : i32
    %332 = tpu.dynamic_rotate %310 by %c964_i32_165 dim 1 : vector<8x1024xf32>, i32 -> vector<8x1024xf32>
    %333 = vector.broadcast %97 : vector<1x1024xf32> to vector<8x1024xf32>
    %334 = arith.mulf %332, %333 : vector<8x1024xf32>
    %c48_166 = arith.constant 48 : index
    %c0_167 = arith.constant 0 : index
    %335 = vector.load %arg7[%c48_166, %c0_167] : memref<72x1024xf32, #tpu.memory_space<vmem>>, vector<8x1024xf32>
    tpu.vector_store %arg7[%c48_166, %c0_167], %334 {strides = array<i32>} : memref<72x1024xf32, #tpu.memory_space<vmem>>, vector<8x1024xf32>,
    %c960_i32_168 = arith.constant 960 : i32
    %336 = tpu.dynamic_rotate %310 by %c960_i32_168 dim 1 : vector<8x1024xf32>, i32 -> vector<8x1024xf32>
    %337 = vector.broadcast %108 : vector<1x1024xf32> to vector<8x1024xf32>
    %338 = arith.mulf %336, %337 : vector<8x1024xf32>
    %c56_169 = arith.constant 56 : index
    %c0_170 = arith.constant 0 : index
    %339 = vector.load %arg7[%c56_169, %c0_170] : memref<72x1024xf32, #tpu.memory_space<vmem>>, vector<8x1024xf32>
    tpu.vector_store %arg7[%c56_169, %c0_170], %338 {strides = array<i32>} : memref<72x1024xf32, #tpu.memory_space<vmem>>, vector<8x1024xf32>,
    %c956_i32_171 = arith.constant 956 : i32
    %340 = tpu.dynamic_rotate %310 by %c956_i32_171 dim 1 : vector<8x1024xf32>, i32 -> vector<8x1024xf32>
    %341 = vector.broadcast %129 : vector<1x1024xf32> to vector<8x1024xf32>
    %342 = arith.mulf %340, %341 : vector<8x1024xf32>
    %c64_172 = arith.constant 64 : index
    %c0_173 = arith.constant 0 : index
    %343 = vector.load %arg7[%c64_172, %c0_173] : memref<72x1024xf32, #tpu.memory_space<vmem>>, vector<8x1024xf32>
    tpu.vector_store %arg7[%c64_172, %c0_173], %342 {strides = array<i32>} : memref<72x1024xf32, #tpu.memory_space<vmem>>, vector<8x1024xf32>,
    %c0_174 = arith.constant 0 : index
    %c0_175 = arith.constant 0 : index
    %344 = vector.load %arg3[%c0_174, %c0_175] : memref<8x72xf32, #tpu.memory_space<vmem>>, vector<8x72xf32>
    %c0_176 = arith.constant 0 : index
    %c0_177 = arith.constant 0 : index
    %345 = vector.load %arg7[%c0_176, %c0_177] : memref<72x1024xf32, #tpu.memory_space<vmem>>, vector<72x1024xf32>
    %cst_178 = arith.constant dense<0.000000e+00> : vector<8x1024xf32>
    %346 = tpu.matmul %344, %345, %cst_178 {dimension_numbers = #tpu.dot_dimension_numbers<[1], [0], [0], [1], [0, 0, 1, 1], [], []>} : vector<8x72xf32>, vector<72x1024xf32>, vector<8x1024xf32> -> vector<8x1024xf32>
    %cst_179 = arith.constant dense<0.000000e+00> : vector<8xf32>
    %347 = vector.multi_reduction <add>, %346, %cst_179 [1] : vector<8x1024xf32> to vector<8xf32>
    %348 = vector.shape_cast %347 : vector<8xf32> to vector<8x1xf32>
    %349 = arith.mulf %346, %346 : vector<8x1024xf32>
    %cst_180 = arith.constant dense<0.000000e+00> : vector<8xf32>
    %350 = vector.multi_reduction <add>, %349, %cst_180 [1] : vector<8x1024xf32> to vector<8xf32>
    %351 = vector.shape_cast %350 : vector<8xf32> to vector<8x1xf32>
    %cst_181 = arith.constant 9.765625E-4 : f32
    %352 = vector.broadcast %cst_181 : f32 to vector<8x1xf32>
    %353 = arith.mulf %348, %352 : vector<8x1xf32>
    %cst_182 = arith.constant 9.765625E-4 : f32
    %354 = vector.broadcast %cst_182 : f32 to vector<8x1xf32>
    %355 = arith.mulf %351, %354 : vector<8x1xf32>
    %356 = arith.mulf %353, %353 : vector<8x1xf32>
    %357 = arith.subf %355, %356 : vector<8x1xf32>
    %cst_183 = arith.constant 0.000000e+00 : f32
    %358 = vector.broadcast %cst_183 : f32 to vector<8x1xf32>
    %359 = arith.maximumf %357, %358 : vector<8x1xf32>
    %360 = vector.broadcast %353 : vector<8x1xf32> to vector<8x1024xf32>
    %361 = arith.subf %346, %360 : vector<8x1024xf32>
    %cst_184 = arith.constant 9.99999974E-6 : f32
    %362 = vector.broadcast %cst_184 : f32 to vector<8x1xf32>
    %363 = arith.addf %359, %362 : vector<8x1xf32>
    %364 = math.rsqrt %363 : vector<8x1xf32>
    %365 = vector.broadcast %364 : vector<8x1xf32> to vector<8x1024xf32>
    %366 = arith.mulf %361, %365 : vector<8x1024xf32>
    %cst_185 = arith.constant 0.000000e+00 : f32
    %367 = vector.broadcast %cst_185 : f32 to vector<8x1024xf32>
    %368 = arith.maximumf %366, %367 : vector<8x1024xf32>
    %c1_186 = arith.constant 1 : index
    %c0_187 = arith.constant 0 : index
    %c0_188 = arith.constant 0 : index
    %369 = vector.load %arg5[%c1_186, %c0_187, %c0_188] : memref<2x8x1024xf32, #tpu.memory_space<vmem>>, vector<1x8x1024xf32>
    %370 = vector.shape_cast %369 : vector<1x8x1024xf32> to vector<8x1024xf32>
    %371 = vector.shape_cast %368 : vector<8x1024xf32> to vector<1x8x1024xf32>
    tpu.vector_store %arg5[%c1_186, %c0_187, %c0_188], %371 {strides = array<i32>} : memref<2x8x1024xf32, #tpu.memory_space<vmem>>, vector<1x8x1024xf32>,
    return
  }
  func.func @transform_0(%arg0: i32) -> (i32, i32, i32) {
    %c0_i32 = arith.constant 0 : i32
    %c0_i32_0 = arith.constant 0 : i32
    %c0_i32_1 = arith.constant 0 : i32
    return %arg0, %c0_i32, %c0_i32_0 : i32, i32, i32
  }
  func.func @transform_1(%arg0: i32) -> (i32, i32) {
    %c0_i32 = arith.constant 0 : i32
    %c0_i32_0 = arith.constant 0 : i32
    %c0_i32_1 = arith.constant 0 : i32
    return %c0_i32, %c0_i32_0 : i32, i32
  }
  func.func @transform_2(%arg0: i32) -> (i32, i32) {
    %c0_i32 = arith.constant 0 : i32
    %c0_i32_0 = arith.constant 0 : i32
    %c0_i32_1 = arith.constant 0 : i32
    return %c0_i32, %c0_i32_0 : i32, i32
  }
  func.func @transform_3(%arg0: i32) -> (i32, i32) {
    %c0_i32 = arith.constant 0 : i32
    %c0_i32_0 = arith.constant 0 : i32
    %c0_i32_1 = arith.constant 0 : i32
    return %c0_i32, %c0_i32_0 : i32, i32
  }
  func.func @transform_4(%arg0: i32) -> (i32, i32, i32) {
    %c0_i32 = arith.constant 0 : i32
    %c0_i32_0 = arith.constant 0 : i32
    %c0_i32_1 = arith.constant 0 : i32
    return %arg0, %c0_i32, %c0_i32_0 : i32, i32, i32
  }
}

</mosaic_0001>

<bundles_post_ra>
// kernel: unet_conv3_forward.1
= control target key start
LH: loop header
LB: loop body
LE: loop exit
PB: predicated region body
PF: predicated region fallthrough
CT: control target
= control target key end

     0   :  { %s3290_s23 = smov 68   ;;  %s3291_s24 = smov 64   ;;  %s5784_s0 = inlined_call_operand.vmem [shape: f32[2,4,1024], index: 0, kind: input, shape index: {}]   ;;  %s5785_s3 = inlined_call_operand.vmem [shape: s32[2,1024], index: 3, kind: input, shape index: {}]   ;;  %s5786_s1 = inlined_call_operand.vmem [shape: f32[8,36], index: 1, kind: input, shape index: {}]   ;;  %s5787_s2 = inlined_call_operand.vmem [shape: f32[8,72], index: 2, kind: input, shape index: {}]   ;;  %s5788_s4 = inlined_call_operand.vmem [shape: f32[2,8,1024], index: 4, kind: output, shape index: {}]  }
   0x1   :  { %v3324_v0 = vld [vmem:[%s5784_s0] sm:$0xff]  ;;  %v3330_v1 = vld [vmem:[%s5784_s0 + $0x8] sm:$0xff]  ;;  %v3336_v2 = vld [vmem:[%s5784_s0 + $0x18] sm:$0xff]  ;;  %s3292_s25 = smov 60   ;;  %s3293_s26 = smov 4  }
   0x2   :  { %64 = vst [vmem:[#allocation1] ss:$2 sm:$0xff] %v3324_v0  ;;  %v3341_v3 = vld [vmem:[%s5784_s0 + $0x10] sm:$0xff]  ;;  %s3294_s27 = smov 124  }
   0x3   :  { %66 = vst [vmem:[#allocation1 + $0x10] ss:$2 sm:$0xff] %v3330_v1 }
   0x4   :  { %70 = vst [vmem:[#allocation1 + $0x30] ss:$2 sm:$0xff] %v3336_v2 }
   0x5   :  { %68 = vst [vmem:[#allocation1 + $0x20] ss:$2 sm:$0xff] %v3341_v3 }
   0x9   :  { %v72_v4 = vld.sshfl [vmem:[#allocation1 + $0x8] sm:$0xff pattern:$0x75316420]  ;;  %v3345_v5 = vld.sshfl [vmem:[#allocation1] sm:$0xff pattern:$0x75316420] }
   0xa   :  { %89 = vrot.lane.b32.xlu2 %v72_v4, %s3290_s23  ;;  %147 = vst [vmem:[#allocation1] ss:$2 sm:$0xff] %v3324_v0  ;;  %v3349_v6 = vld.sshfl [vmem:[#allocation1 + $0x10] sm:$0xff pattern:$0x75316420]  ;;  %v3452_v4 = vld [vmem:[%s5784_s0 + $0x28] sm:$0xff] }
   0xb   :  { %v3351_v7 = vld.sshfl [vmem:[#allocation1 + $0x18] sm:$0xff pattern:$0x75316420]  ;;  %v3353_v8 = vld.sshfl [vmem:[#allocation1 + $0x30] sm:$0xff pattern:$0x75316420] }
   0xc   :  { %149 = vst [vmem:[#allocation1 + $0x10] ss:$2 sm:$0xff] %v3330_v1  ;;  %v3356_v9 = vld.sshfl [vmem:[#allocation1 + $0x38] sm:$0xff pattern:$0x75316420] }
   0xd   :  { %153 = vst [vmem:[#allocation1 + $0x30] ss:$2 sm:$0xff] %v3336_v2  ;;  %v3359_v10 = vld.sshfl [vmem:[#allocation1 + $0x20] sm:$0xff pattern:$0x75316420] }
   0xe   :  { %v3361_v11 = vld.sshfl [vmem:[#allocation1 + $0x28] sm:$0xff pattern:$0x75316420] }
   0xf   :  { %151 = vst [vmem:[#allocation1 + $0x20] ss:$2 sm:$0xff] %v3341_v3 }
  0x11   :  { %v155_v12 = vld.sshfl [vmem:[#allocation1 + $0x8] sm:$0xff pattern:$0x75316420]  ;;  %v3364_v13 = vld.sshfl [vmem:[#allocation1] sm:$0xff pattern:$0x75316420] }
  0x12   :  { %172 = vrot.lane.b32.xlu1 %v155_v12, %s3291_s24  ;;  %252 = vst [vmem:[#allocation1] ss:$2 sm:$0xff] %v3324_v0 }
  0x13   :  { %v156_v14 = vld.sshfl [vmem:[#allocation1 + $0x10] sm:$0xff pattern:$0x75316420]  ;;  %v3368_v15 = vld.sshfl [vmem:[#allocation1 + $0x18] sm:$0xff pattern:$0x75316420] }
  0x14   :  { %174 = vrot.lane.b32.xlu2 %v156_v14, %s3291_s24  ;;  %254 = vst [vmem:[#allocation1 + $0x10] ss:$2 sm:$0xff] %v3330_v1  ;;  %v3372_v16 = vld.sshfl [vmem:[#allocation1 + $0x30] sm:$0xff pattern:$0x75316420] }
  0x15   :  { %v3374_v17 = vld.sshfl [vmem:[#allocation1 + $0x38] sm:$0xff pattern:$0x75316420] }
  0x16   :  { %258 = vst [vmem:[#allocation1 + $0x30] ss:$2 sm:$0xff] %v3336_v2  ;;  %v3377_v18 = vld.sshfl [vmem:[#allocation1 + $0x20] sm:$0xff pattern:$0x75316420] }
  0x17   :  { %v3379_v19 = vld.sshfl [vmem:[#allocation1 + $0x28] sm:$0xff pattern:$0x75316420] }
  0x18   :  { %256 = vst [vmem:[#allocation1 + $0x20] ss:$2 sm:$0xff] %v3341_v3 }
  0x19   :  { %v260_v20 = vld.sshfl [vmem:[#allocation1 + $0x8] sm:$0xff pattern:$0x75316420]  ;;  %v3382_v21 = vld.sshfl [vmem:[#allocation1] sm:$0xff pattern:$0x75316420] }
  0x1a   :  { %277 = vrot.lane.b32.xlu0 %v260_v20, %s3292_s25  ;;  %333 = vst [vmem:[#allocation1] ss:$2 sm:$0xff] %v3324_v0 }
  0x1b   :  { %v261_v22 = vld.sshfl [vmem:[#allocation1 + $0x10] sm:$0xff pattern:$0x75316420]  ;;  %v3386_v23 = vld.sshfl [vmem:[#allocation1 + $0x18] sm:$0xff pattern:$0x75316420] }
  0x1c   :  { %279 = vrot.lane.b32.xlu1 %v261_v22, %s3292_s25  ;;  %335 = vst [vmem:[#allocation1 + $0x10] ss:$2 sm:$0xff] %v3330_v1 }
  0x1d   :  { %v3390_v24 = vld.sshfl [vmem:[#allocation1 + $0x30] sm:$0xff pattern:$0x75316420]  ;;  %v3392_v25 = vld.sshfl [vmem:[#allocation1 + $0x38] sm:$0xff pattern:$0x75316420] }
  0x1e   :  { %339 = vst [vmem:[#allocation1 + $0x30] ss:$2 sm:$0xff] %v3336_v2 }
  0x1f   :  { %v3395_v26 = vld.sshfl [vmem:[#allocation1 + $0x20] sm:$0xff pattern:$0x75316420]  ;;  %v3397_v27 = vld.sshfl [vmem:[#allocation1 + $0x28] sm:$0xff pattern:$0x75316420] }
  0x20   :  { %337 = vst [vmem:[#allocation1 + $0x20] ss:$2 sm:$0xff] %v3341_v3 }
  0x21   :  { %v341_v28 = vld.sshfl [vmem:[#allocation1 + $0x8] sm:$0xff pattern:$0x75316420]  ;;  %v340_v29 = vld.sshfl [vmem:[#allocation1] sm:$0xff pattern:$0x75316420] }
  0x22   :  { %358 = vrot.lane.b32.xlu2 %v341_v28, %s3293_s26  ;;  %438 = vst [vmem:[#allocation1] ss:$2 sm:$0xff] %v3324_v0 }
  0x23   :  { %v342_v30 = vld.sshfl [vmem:[#allocation1 + $0x10] sm:$0xff pattern:$0x75316420]  ;;  %v343_v31 = vld.sshfl [vmem:[#allocation1 + $0x18] sm:$0xff pattern:$0x75316420] }
  0x24   :  { %360 = vrot.lane.b32.xlu0 %v342_v30, %s3293_s26  ;;  %440 = vst [vmem:[#allocation1 + $0x10] ss:$2 sm:$0xff] %v3330_v1 }
  0x25   :  { %v3404_v32 = vld.sshfl [vmem:[#allocation1 + $0x30] sm:$0xff pattern:$0x75316420]  ;;  %v347_v33 = vld.sshfl [vmem:[#allocation1 + $0x38] sm:$0xff pattern:$0x75316420] }
  0x26   :  { %444 = vst [vmem:[#allocation1 + $0x30] ss:$2 sm:$0xff] %v3336_v2  ;;  %370 = vrot.lane.b32.xlu1 %v347_v33, %s3293_s26 }
  0x27   :  { %v3408_v34 = vld.sshfl [vmem:[#allocation1 + $0x20] sm:$0xff pattern:$0x75316420]  ;;  %v3410_v35 = vld.sshfl [vmem:[#allocation1 + $0x28] sm:$0xff pattern:$0x75316420] }
  0x28   :  { %442 = vst [vmem:[#allocation1 + $0x20] ss:$2 sm:$0xff] %v3341_v3 }
  0x29   :  { %v445_v36 = vld.sshfl [vmem:[#allocation1] sm:$0xff pattern:$0x75316420]  ;;  %v446_v37 = vld.sshfl [vmem:[#allocation1 + $0x8] sm:$0xff pattern:$0x75316420] }
  0x2a   :  { %356 = vrot.lane.b32.xlu2 %v340_v29, %s3293_s26  ;;  %469 = vst [vmem:[#allocation1] ss:$2 sm:$0xff] %v3324_v0 }
  0x2b   :  { %v447_v38 = vld.sshfl [vmem:[#allocation1 + $0x10] sm:$0xff pattern:$0x75316420]  ;;  %v448_v39 = vld.sshfl [vmem:[#allocation1 + $0x18] sm:$0xff pattern:$0x75316420] }
  0x2c   :  { %362 = vrot.lane.b32.xlu0 %v343_v31, %s3293_s26  ;;  %471 = vst [vmem:[#allocation1 + $0x10] ss:$2 sm:$0xff] %v3330_v1 }
  0x2d   :  { %v451_v40 = vld.sshfl [vmem:[#allocation1 + $0x30] sm:$0xff pattern:$0x75316420]  ;;  %v452_v41 = vld.sshfl [vmem:[#allocation1 + $0x38] sm:$0xff pattern:$0x75316420] }
  0x2e   :  { %475 = vst [vmem:[#allocation1 + $0x30] ss:$2 sm:$0xff] %v3336_v2 }
  0x2f   :  { %467 = vst [vmem:[#allocation2 + $0xe0] sm:$0xf] %v451_v40  ;;  %v449_v42 = vld.sshfl [vmem:[#allocation1 + $0x20] sm:$0xff pattern:$0x75316420] }
  0x30   :  { %468 = vst [vmem:[#allocation2 + $0x88] sm:$0xf] %v452_v41  ;;  %v450_v43 = vld.sshfl [vmem:[#allocation1 + $0x28] sm:$0xff pattern:$0x75316420] }
  0x31   :  { %473 = vst [vmem:[#allocation1 + $0x20] ss:$2 sm:$0xff] %v3341_v3  ;;  %v476_v44 = vld.sshfl [vmem:[#allocation1] sm:$0xff pattern:$0x75316420] }
  0x32   :  { %465 = vst [vmem:[#allocation2 + $0xa8] sm:$0xf] %v449_v42  ;;  %492 = vrot.lane.b32.xlu1 %v476_v44, %s3294_s27  ;;  %v477_v51 = vld.sshfl [vmem:[#allocation1 + $0x8] sm:$0xff pattern:$0x75316420] }
  0x33   :  { %466 = vst [vmem:[#allocation2 + $0x90] sm:$0xf] %v450_v43  ;;  %v478_v45 = vld.sshfl [vmem:[#allocation1 + $0x10] sm:$0xff pattern:$0x75316420] }
  0x34   :  { %496 = vrot.lane.b32.xlu2 %v478_v45, %s3294_s27  ;;  %463 = vst [vmem:[#allocation2 + $0x8] sm:$0xf] %v447_v38  ;;  %v479_v48 = vld.sshfl [vmem:[#allocation1 + $0x18] sm:$0xff pattern:$0x75316420] }
  0x35   :  { %v3421_v46 = vld.sshfl [vmem:[#allocation1 + $0x30] sm:$0xff pattern:$0x75316420]  ;;  %v3423_v47 = vld.sshfl [vmem:[#allocation1 + $0x38] sm:$0xff pattern:$0x75316420] }
  0x36   :  { %580 = vst [vmem:[#allocation1 + $0x30] ss:$2 sm:$0xff] %v3336_v2  ;;  %v3524_v45 = vld [vmem:[%s5785_s3] ss:$2 sm:$0xff] }
  0x37   :  { %464 = vst [vmem:[#allocation2 + $0x98] sm:$0xf] %v448_v39 }
  0x38   :  { %v480_v49 = vld.sshfl [vmem:[#allocation1 + $0x20] sm:$0xff pattern:$0x75316420]  ;;  %v3426_v50 = vld.sshfl [vmem:[#allocation1 + $0x28] sm:$0xff pattern:$0x75316420] }
  0x39   :  { %500 = vrot.lane.b32.xlu0 %v480_v49, %s3294_s27  ;;  %578 = vst [vmem:[#allocation1 + $0x20] ss:$2 sm:$0xff] %v3341_v3 }
  0x3a   :  { %576 = vst [vmem:[#allocation1 + $0x10] ss:$2 sm:$0xff] %v3330_v1 }
  0x3b   :  { %461 = vst [vmem:[#allocation2 + $0x128] sm:$0xf] %v445_v36 }
  0x3c   :  { %462 = vst [vmem:[#allocation2 + $0x110] sm:$0xf] %v446_v37  ;;  %498 = vrot.lane.b32.xlu2 %v479_v48, %s3294_s27  ;;  %v3492_v37 = vld [vmem:[%s5784_s0 + $0x38] sm:$0xff] }
  0x3d   :  { %574 = vst [vmem:[#allocation1] ss:$2 sm:$0xff] %v3324_v0  ;;  %v3454_v12 = vld.sshfl [vmem:[#allocation1 + $0x30] sm:$0xff pattern:$0x75316420] }
  0x3e   :  { %v3456_v14 = vld.sshfl [vmem:[#allocation1 + $0x38] sm:$0xff pattern:$0x75316420] }
  0x3f   :  { %660 = vst [vmem:[#allocation1 + $0x30] ss:$2 sm:$0xff] %v3336_v2 }
  0x40   :  { %v585_v52 = vld.sshfl [vmem:[#allocation1 + $0x20] sm:$0xff pattern:$0x75316420]  ;;  %v3433_v53 = vld.sshfl [vmem:[#allocation1 + $0x28] sm:$0xff pattern:$0x75316420] }
  0x41   :  { %v583_v54 = vld.sshfl [vmem:[#allocation1 + $0x10] sm:$0xff pattern:$0x75316420]  ;;  %v584_v55 = vld.sshfl [vmem:[#allocation1 + $0x18] sm:$0xff pattern:$0x75316420] }
  0x42   :  { %601 = vrot.lane.b32.xlu0 %v583_v54, %s3290_s23  ;;  %603 = vrot.lane.b32.xlu1 %v584_v55, %s3290_s23  ;;  %656 = vst [vmem:[#allocation1 + $0x10] ss:$2 sm:$0xff] %v3330_v1 }
  0x43   :  { %658 = vst [vmem:[#allocation1 + $0x20] ss:$2 sm:$0xff] %v3341_v3 }
  0x44   :  { %494 = vrot.lane.b32.xlu2 %v477_v51, %s3294_s27  ;;  %v581_v56 = vld.sshfl [vmem:[#allocation1] sm:$0xff pattern:$0x75316420]  ;;  %v582_v57 = vld.sshfl [vmem:[#allocation1 + $0x8] sm:$0xff pattern:$0x75316420] }
  0x45   :  { %654 = vst [vmem:[#allocation1] ss:$2 sm:$0xff] %v3324_v0  ;;  %v3206_v51 = vld [vmem:[%s5785_s3 + $0x1] ss:$2 sm:$0xff] }
  0x46   :  { %v668_v30 = vld.sshfl [vmem:[#allocation1 + $0x38] sm:$0xff pattern:$0x75316420]  ;;  %v3477_v31 = vld.sshfl [vmem:[#allocation1 + $0x30] sm:$0xff pattern:$0x75316420] }
  0x47   :  { %764 = vst [vmem:[#allocation1 + $0x30] ss:$2 sm:$0xff] %v3336_v2  ;;  %v33_v54 = vadd.s32 1, %v3206_v51 }
  0x49   :  { %v663_v58 = vld.sshfl [vmem:[#allocation1 + $0x10] sm:$0xff pattern:$0x75316420]  ;;  %v664_v59 = vld.sshfl [vmem:[#allocation1 + $0x18] sm:$0xff pattern:$0x75316420] }
  0x4a   :  { %605 = vrot.lane.b32.xlu0 %v585_v52, %s3290_s23  ;;  %597 = vrot.lane.b32.xlu1 %v581_v56, %s3290_s23  ;;  %v665_v60 = vld.sshfl [vmem:[#allocation1 + $0x20] sm:$0xff pattern:$0x75316420]  ;;  %v3443_v61 = vld.sshfl [vmem:[#allocation1 + $0x28] sm:$0xff pattern:$0x75316420] }
  0x4b   :  { %762 = vst [vmem:[#allocation1 + $0x20] ss:$2 sm:$0xff] %v3341_v3  ;;  %v3461_v3 = vld [vmem:[%s5784_s0 + $0x20] sm:$0xff]  ;;  %v24_v52 = vadd.s32 4294967295, %v3206_v51  ;;  %vm34_vm6 = vcmp.ge.s32.totalorder %v33_v54, 0  ;;  %vm35_vm7 = vcmp.lt.s32.totalorder %v33_v54, 16 }
  0x4c   :  { %599 = vrot.lane.b32.xlu2 %v582_v57, %s3290_s23  ;;  %760 = vst [vmem:[#allocation1 + $0x10] ss:$2 sm:$0xff] %v3330_v1  ;;  %v661_v62 = vld.sshfl [vmem:[#allocation1] sm:$0xff pattern:$0x75316420]  ;;  %v3552_v57 = vld [vmem:[%s5784_s0 + $0x30] sm:$0xff]  ;;  %vm3606_vm9 = vmand %vm34_vm6, %vm35_vm7 }
  0x4d   :  { %v662_v63 = vld.sshfl [vmem:[#allocation1 + $0x8] sm:$0xff pattern:$0x75316420]  ;;  %vm25_vm2 = vcmp.ge.s32.totalorder %v24_v52, 0  ;;  %vm26_vm3 = vcmp.lt.s32.totalorder %v24_v52, 16 }
  0x4e   :  { %758 = vst [vmem:[#allocation1] ss:$2 sm:$0xff] %v3324_v0  ;;  %v3496_v40 = vld.sshfl [vmem:[#allocation1 + $0x38] sm:$0xff pattern:$0x75316420]  ;;  %vm3579_vm5 = vmand %vm25_vm2, %vm26_vm3 }
  0x4f   :  { %v3498_v2 = vld.sshfl [vmem:[#allocation1 + $0x30] sm:$0xff pattern:$0x75316420] }
  0x50   :  { %1716 = vst [vmem:[#allocation1 + $0x30] ss:$2 sm:$0xff] %v3492_v37 }
  0x52   :  { %681 = vrot.lane.b32.xlu0 %v663_v58, %s3291_s24  ;;  %685 = vrot.lane.b32.xlu1 %v665_v60, %s3291_s24  ;;  %v769_v38 = vld.sshfl [vmem:[#allocation1 + $0x20] sm:$0xff pattern:$0x75316420] }
  0x53   :  { %v767_v0 = vld.sshfl [vmem:[#allocation1 + $0x10] sm:$0xff pattern:$0x75316420]  ;;  %v768_v1 = vld.sshfl [vmem:[#allocation1 + $0x18] sm:$0xff pattern:$0x75316420] }
  0x54   :  { %677 = vrot.lane.b32.xlu2 %v661_v62, %s3291_s24  ;;  %1712 = vst [vmem:[#allocation1 + $0x10] ss:$2 sm:$0xff] %v3452_v4 }
  0x55   :  { %v765_v20 = vld.sshfl [vmem:[#allocation1] sm:$0xff pattern:$0x75316420]  ;;  %v766_v22 = vld.sshfl [vmem:[#allocation1 + $0x8] sm:$0xff pattern:$0x75316420] }
  0x56   :  { %1710 = vst [vmem:[#allocation1] ss:$2 sm:$0xff] %v3461_v3 }
  0x57   :  { %v3564_v60 = vld.sshfl [vmem:[#allocation1 + $0x30] sm:$0xff pattern:$0x75316420] }
  0x58   :  { %5959 = vst [vmem:[#allocation17_spill] sm:$0xff] %v3564_v60 }
  0x5a   :  { %683 = vrot.lane.b32.xlu0 %v664_v59, %s3291_s24  ;;  %785 = vrot.lane.b32.xlu1 %v767_v0, %s3292_s25 }
  0x5b   :  { %v3471_v28 = vld.sshfl [vmem:[#allocation1 + $0x10] sm:$0xff pattern:$0x75316420]  ;;  %v3473_v29 = vld.sshfl [vmem:[#allocation1 + $0x18] sm:$0xff pattern:$0x75316420] }
  0x5c   :  { %5946 = vst [vmem:[#allocation4_spill] sm:$0xff] %v3471_v28  ;;  %781 = vrot.lane.b32.xlu2 %v765_v20, %s3292_s25 }
  0x5d   :  { %5947 = vst [vmem:[#allocation5_spill] sm:$0xff] %v3473_v29  ;;  %v3508_v42 = vld.sshfl [vmem:[#allocation1] sm:$0xff pattern:$0x75316420] }
  0x5e   :  { %1775 = vst [vmem:[#allocation1 + $0x10] ss:$2 sm:$0xff] %v3452_v4  ;;  %v3512_v43 = vld.sshfl [vmem:[#allocation1 + $0x8] sm:$0xff pattern:$0x75316420] }
  0x5f   :  { %5952 = vst [vmem:[#allocation10_spill] sm:$0xff] %v3508_v42 }
  0x60   :  { %5953 = vst [vmem:[#allocation11_spill] sm:$0xff] %v3512_v43 }
  0x61   :  { %1773 = vst [vmem:[#allocation1] ss:$2 sm:$0xff] %v3461_v3 }
  0x62   :  { %787 = vrot.lane.b32.xlu1 %v768_v1, %s3292_s25  ;;  %679 = vrot.lane.b32.xlu0 %v662_v63, %s3291_s24  ;;  %v5789_v63 = vmov 0.0  }
  0x64   :  { %176 = vrot.lane.b32.xlu2 %v3368_v15, %s3291_s24  ;;  %v3494_v39 = vpop.permute.xlu2 %89 }
  0x65   :  { %v3482_v33 = vld.sshfl [vmem:[#allocation1 + $0x10] sm:$0xff pattern:$0x75316420]  ;;  %v3484_v36 = vld.sshfl [vmem:[#allocation1 + $0x18] sm:$0xff pattern:$0x75316420] }
  0x66   :  { %5948 = vst [vmem:[#allocation6_spill] sm:$0xff] %v3482_v33 }
  0x67   :  { %5949 = vst [vmem:[#allocation7_spill] sm:$0xff] %v3484_v36 }
  0x68   :  { %1862 = vst [vmem:[#allocation1 + $0x10] ss:$2 sm:$0xff] %v3452_v4  ;;  %v3532_v49 = vld.sshfl [vmem:[#allocation1] sm:$0xff pattern:$0x75316420] }
  0x69   :  { %5955 = vst [vmem:[#allocation13_spill] sm:$0xff] %v3532_v49 }
  0x6a   :  { %789 = vrot.lane.b32.xlu1 %v769_v38, %s3292_s25  ;;  %783 = vrot.lane.b32.xlu0 %v766_v22, %s3292_s25  ;;  %v3586_v22 = vld.sshfl [vmem:[#allocation1 + $0x28] sm:$0xff pattern:$0x75316420]  ;;  %v3600_v38 = vsel %vm3579_vm5, 1.0, %v5789_v63 }
  0x6b   :  { %1714 = vst [vmem:[#allocation1 + $0x20] ss:$2 sm:$0xff] %v3552_v57 }
  0x6c   :  { %281 = vrot.lane.b32.xlu2 %v3386_v23, %s3292_s25 }
  0x6e   :  { %v3519_v44 = vpop.permute.xlu2 %174 }
  0x6f   :  { %v3503_v41 = vld.sshfl [vmem:[#allocation1 + $0x10] sm:$0xff pattern:$0x75316420]  ;;  %v3505_v15 = vld.sshfl [vmem:[#allocation1 + $0x18] sm:$0xff pattern:$0x75316420] }
  0x70   :  { %5950 = vst [vmem:[#allocation8_spill] sm:$0xff] %v3503_v41 }
  0x71   :  { %5951 = vst [vmem:[#allocation9_spill] sm:$0xff] %v3505_v15 }
  0x72   :  { %1925 = vst [vmem:[#allocation1 + $0x10] ss:$2 sm:$0xff] %v3452_v4  ;;  %170 = vrot.lane.b32.xlu1 %v3364_v13, %s3291_s24  ;;  %91 = vrot.lane.b32.xlu0 %v3349_v6, %s3290_s23  ;;  %v3534_v13 = vld.sshfl [vmem:[#allocation1 + $0x8] sm:$0xff pattern:$0x75316420]  ;;  %v20_v6 = vadd.s32 4294967295, %v3524_v45 }
  0x73   :  { %5956 = vst [vmem:[#allocation14_spill] sm:$0xff] %v3534_v13 }
  0x74   :  { %691 = vrot.lane.b32.xlu2 %v668_v30, %s3291_s24  ;;  %1860 = vst [vmem:[#allocation1] ss:$2 sm:$0xff] %v3461_v3  ;;  %vm21_vm0 = vcmp.ge.s32.totalorder %v20_v6, 0  ;;  %vm22_vm1 = vcmp.lt.s32.totalorder %v20_v6, 16 }
  0x75   :  { %vm3568_vm4 = vmand %vm21_vm0, %vm22_vm1 }
  0x76   :  { %v3577_v0 = vsel %vm3568_vm4, 1.0, %v5789_v63  ;;  %vm37_vm11 = vmand %vm3568_vm4, %vm3606_vm9 }
  0x77   :  { %v3595_v30 = vperm.slane %v3577_v0, 2  ;;  %vm28_vm6 = vmand %vm3568_vm4, %vm3579_vm5  ;;  %vm883_vm4 = vcmask 1043456  }
  0x79   :  { %v3526_v48 = vld.sshfl [vmem:[#allocation1 + $0x10] sm:$0xff pattern:$0x75316420]  ;;  %v3528_v23 = vld.sshfl [vmem:[#allocation1 + $0x18] sm:$0xff pattern:$0x75316420] }
  0x7a   :  { %5954 = vst [vmem:[#allocation12_spill] sm:$0xff] %v3528_v23  ;;  %275 = vrot.lane.b32.xlu1 %v3382_v21, %s3292_s25  ;;  %184 = vrot.lane.b32.xlu0 %v3374_v17, %s3291_s24  ;;  %v103_v17 = vlaneseq }
  0x7b   :  { %2012 = vst [vmem:[#allocation1 + $0x10] ss:$2 sm:$0xff] %v3452_v4  ;;  %v3559_v58 = vld.sshfl [vmem:[#allocation1] sm:$0xff pattern:$0x75316420] }
  0x7c   :  { %87 = vrot.lane.b32.xlu2 %v3345_v5, %s3290_s23  ;;  %v3557_v21 = vpop.permute.xlu2 %358  ;;  %5957 = vst [vmem:[#allocation15_spill] sm:$0xff] %v3559_v58  ;;  %v3561_v59 = vld.sshfl [vmem:[#allocation1 + $0x8] sm:$0xff pattern:$0x75316420]  ;;  %v3584_v20 = vand.u32 127, %v103_v17  ;;  %v5972_v58 = vmov 0.0  }
  0x7d   :  { %5958 = vst [vmem:[#allocation16_spill] sm:$0xff] %v3561_v59  ;;  %v3572_v5 = vld.sshfl [vmem:[#allocation1 + $0x38] sm:$0xff pattern:$0x75316420]  ;;  %v3643_v43 = vsel %vm37_vm11, 1.0, %v5972_v58 }
  0x7e   :  { %1923 = vst [vmem:[#allocation1] ss:$2 sm:$0xff] %v3461_v3  ;;  %vm186_vm8 = vcmp.lt.s32.totalorder %v3584_v20, 64  ;;  %vm372_vm10 = vcmp.lt.s32.totalorder %v3584_v20, 4  ;;  %vm291_vm12 = vcmp.lt.s32.totalorder %v3584_v20, 60  ;;  %vm508_vm13 = vcmp.lt.s32.totalorder %v3584_v20, 124 }
  0x7f   :  { %5962 = vst [vmem:[#allocation18_spill] sm:$0xff] %v3572_v5  ;;  %vm105_vm2 = vcmp.lt.s32.totalorder %v3584_v20, 68 }
  0x80   :  { %1779 = vst [vmem:[#allocation1 + $0x30] ss:$2 sm:$0xff] %v3492_v37 }
  0x81   :  { %5965 = vst [vmem:[#allocation19_spill] sm:$0xff] %v3595_v30 }
  0x82   :  { %v3545_v55 = vld.sshfl [vmem:[#allocation1 + $0x10] sm:$0xff pattern:$0x75316420]  ;;  %v3547_v56 = vld.sshfl [vmem:[#allocation1 + $0x18] sm:$0xff pattern:$0x75316420]  ;;  %689 = vrot.lane.b32.xlu1 %v3477_v31, %s3291_s24  ;;  %289 = vrot.lane.b32.xlu0 %v3392_v25, %s3292_s25 }
  0x83   :  { %2043 = vst [vmem:[#allocation1 + $0x10] ss:$2 sm:$0xff] %v3452_v4  ;;  %v3617_v31 = vperm.slane %v3600_v38, 1 }
  0x84   :  { %504 = vrot.lane.b32.xlu2 %v3421_v46, %s3294_s27  ;;  %v3613_v25 = vpop.permute.xlu1 %172  ;;  %v357_v54 = vpop.permute.xlu2 %356 }
  0x85   :  { %5968 = vst [vmem:[#allocation20_spill] sm:$0xff] %v3617_v31  ;;  %v3619_v17 = vld.sshfl [vmem:[#allocation1] sm:$0xff pattern:$0x75316420]  ;;  %v192_v60 = vsel %vm186_vm8, %v3613_v25, %v3519_v44  ;;  %v379_v46 = vsel %vm372_vm10, %v357_v54, %v3557_v21 }
  0x86   :  { %5969 = vst [vmem:[#allocation21_spill] sm:$0xff] %v3619_v17  ;;  %v3621_v63 = vld.sshfl [vmem:[#allocation1 + $0x8] sm:$0xff pattern:$0x75316420]  ;;  %v214_v42 = vmul.f32 %v3595_v30, %v192_v60  ;;  %v399_v36 = vmul.f32 %v3617_v31, %v379_v46 }
  0x87   :  { %2010 = vst [vmem:[#allocation1] ss:$2 sm:$0xff] %v3461_v3  ;;  %v3636_v29 = vld.sshfl [vmem:[#allocation1 + $0x30] sm:$0xff pattern:$0x75316420] }
  0x88   :  { %5970 = vst [vmem:[#allocation22_spill] sm:$0xff] %v3636_v29  ;;  %v3638_v5 = vld.sshfl [vmem:[#allocation1 + $0x38] sm:$0xff pattern:$0x75316420]  ;;  %v230_v15 = vrot.slane %v214_v42, 4  ;;  %v415_v30 = vrot.slane %v399_v36, 4 }
  0x89   :  { %5971 = vst [vmem:[#allocation23_spill] sm:$0xff] %v3638_v5  ;;  %v3658_v42 = vperm.slane %v3643_v43, 2  ;;  %v3669_v36 = vld.sshfl [vmem:[#allocation1 + $0x20] sm:$0xff pattern:$0x75316420] }
  0x8a   :  { %v3602_v6 = vld.sshfl [vmem:[#allocation1 + $0x10] sm:$0xff pattern:$0x75316420]  ;;  %v3604_v51 = vld.sshfl [vmem:[#allocation1 + $0x18] sm:$0xff pattern:$0x75316420]  ;;  %795 = vrot.lane.b32.xlu1 %v3496_v40, %s3292_s25  ;;  %793 = vrot.lane.b32.xlu0 %v3498_v2, %s3292_s25 }
  0x8b   :  { %2130 = vst [vmem:[#allocation1 + $0x10] ss:$2 sm:$0xff] %v3452_v4  ;;  %v3681_v17 = vld.sshfl [vmem:[#allocation1 + $0x28] sm:$0xff pattern:$0x75316420] }
  0x8c   :  { %1866 = vst [vmem:[#allocation1 + $0x30] ss:$2 sm:$0xff] %v3492_v37  ;;  %611 = vrot.lane.b32.xlu2 %v3456_v14, %s3290_s23  ;;  %v3660_v40 = vpop.permute.xlu0 %277 }
  0x8d   :  { %246 = vst [vmem:[#allocation2 + $0x10] sm:$0xf0] %v230_v15 }
  0x8e   :  { %5973 = vst [vmem:[#allocation24_spill] sm:$0xff] %v3658_v42  ;;  %v3662_v46 = vld.sshfl [vmem:[#allocation1] sm:$0xff pattern:$0x75316420]  ;;  %v3667_v15 = vpop.permute.xlu1 %279  ;;  %v497_v31 = vpop.permute.xlu2 %496 }
  0x8f   :  { %v3664_v2 = vld.sshfl [vmem:[#allocation1 + $0x8] sm:$0xff pattern:$0x75316420]  ;;  %5974 = vst [vmem:[#allocation25_spill] sm:$0xff] %v3669_v36  ;;  %v297_v28 = vsel %vm291_vm12, %v3660_v40, %v3667_v15  ;;  %v3690_v36 = vsel %vm3606_vm9, 1.0, %v5972_v58 }
  0x90   :  { %2041 = vst [vmem:[#allocation1] ss:$2 sm:$0xff] %v3461_v3  ;;  %v319_v49 = vmul.f32 %v3658_v42, %v297_v28  ;;  %v3696_v28 = vperm.slane %v3600_v38, 2 }
  0x91   :  { %5977 = vst [vmem:[#allocation28_spill] sm:$0xff] %v3681_v17 }
  0x92   :  { %v3649_v60 = vld.sshfl [vmem:[#allocation1 + $0x10] sm:$0xff pattern:$0x75316420]  ;;  %v3651_v29 = vld.sshfl [vmem:[#allocation1 + $0x18] sm:$0xff pattern:$0x75316420]  ;;  %101 = vrot.lane.b32.xlu1 %v3356_v9, %s3290_s23  ;;  %93 = vrot.lane.b32.xlu0 %v3351_v7, %s3290_s23 }
  0x93   :  { %2193 = vst [vmem:[#allocation1 + $0x10] ss:$2 sm:$0xff] %v3452_v4  ;;  %v3671_v5 = vld.sshfl [vmem:[#allocation1 + $0x30] sm:$0xff pattern:$0x75316420] }
  0x94   :  { %5975 = vst [vmem:[#allocation26_spill] sm:$0xff] %v3671_v5  ;;  %v3673_v14 = vld.sshfl [vmem:[#allocation1 + $0x38] sm:$0xff pattern:$0x75316420]  ;;  %366 = vrot.lane.b32.xlu2 %v3410_v35, %s3293_s26  ;;  %v3710_v5 = vperm.slane %v3600_v38, 0 }
  0x95   :  { %5976 = vst [vmem:[#allocation27_spill] sm:$0xff] %v3673_v14 }
  0x96   :  { %1929 = vst [vmem:[#allocation1 + $0x30] ss:$2 sm:$0xff] %v3492_v37  ;;  %v3707_v17 = vpop.permute.xlu2 %498 }
  0x97   :  { %431 = vst [vmem:[#allocation2 + $0x108] sm:$0xf0] %v415_v30  ;;  %v3699_v30 = vperm.slane %v3690_v36, 2  ;;  %v3701_v9 = vld.sshfl [vmem:[#allocation1] sm:$0xff pattern:$0x75316420]  ;;  %v513_v42 = vsel %vm508_vm13, %v497_v31, %v3707_v17 }
  0x98   :  { %327 = vst [vmem:[#allocation2 + $0x138] sm:$0xf] %v319_v49  ;;  %v3703_v7 = vld.sshfl [vmem:[#allocation1 + $0x8] sm:$0xff pattern:$0x75316420]  ;;  %v361_v49 = vpop.permute.xlu0 %360  ;;  %v3720_v33 = vpop.permute.xlu1 %370 }
  0x99   :  { %1777 = vst [vmem:[#allocation1 + $0x20] ss:$2 sm:$0xff] %v3552_v57  ;;  %v378_v35 = vsel %vm372_vm10, %v3557_v21, %v361_v49  ;;  %v536_v23 = vmul.f32 %v3699_v30, %v513_v42  ;;  %v380_v59 = vsel %vm372_vm10, %v3720_v33, %v357_v54  ;;  %v3733_v42 = vperm.slane %v3600_v38, 3 }
  0x9a   :  { %5978 = vst [vmem:[#allocation29_spill] sm:$0xff] %v3696_v28  ;;  %v400_v14 = vmul.f32 %v3696_v28, %v378_v35  ;;  %609 = vrot.lane.b32.xlu1 %v3454_v12, %s3290_s23  ;;  %506 = vrot.lane.b32.xlu0 %v3423_v47, %s3294_s27  ;;  %v398_v41 = vmul.f32 %v3710_v5, %v380_v59  ;;  %v3736_v35 = vperm.slane %v3690_v36, 1  ;;  %v3767_v28 = vld.sshfl [vmem:[#allocation1 + $0x18] sm:$0xff pattern:$0x75316420] }
  0x9b   :  { %5979 = vst [vmem:[#allocation30_spill] sm:$0xff] %v3699_v30  ;;  %v552_v13 = vrot.slane %v536_v23, 4 }
  0x9c   :  { %5980 = vst [vmem:[#allocation31_spill] sm:$0xff] %v3703_v7  ;;  %v416_v21 = vrot.slane %v400_v14, 4  ;;  %607 = vrot.lane.b32.xlu2 %v3433_v53, %s3290_s23  ;;  %v414_v12 = vrot.slane %v398_v41, 4 }
  0x9d   :  { %2128 = vst [vmem:[#allocation1] ss:$2 sm:$0xff] %v3461_v3 }
  0x9e   :  { %5981 = vst [vmem:[#allocation32_spill] sm:$0xff] %v3710_v5  ;;  %v495_v59 = vpop.permute.xlu2 %494  ;;  %v3763_v5 = vperm.slane %v3690_v36, 0 }
  0x9f   :  { %5983 = vst [vmem:[#allocation34_spill] sm:$0xff] %v3733_v42 }
  0xa0   :  { %v3730_v7 = vld.sshfl [vmem:[#allocation1 + $0x20] sm:$0xff pattern:$0x75316420]  ;;  %5984 = vst [vmem:[#allocation35_spill] sm:$0xff] %v3736_v35  ;;  %v3747_v23 = vpop.permute.xlu0 %362 }
  0xa1   :  { %5982 = vst [vmem:[#allocation33_spill] sm:$0xff] %v3730_v7  ;;  %v3738_v54 = vld.sshfl [vmem:[#allocation1 + $0x28] sm:$0xff pattern:$0x75316420]  ;;  %v514_v7 = vsel %vm508_vm13, %v495_v59, %v497_v31 }
  0xa2   :  { %432 = vst [vmem:[#allocation2 + $0x138] sm:$0xf0] %v416_v21  ;;  %v377_v21 = vsel %vm372_vm10, %v361_v49, %v3747_v23  ;;  %v535_v41 = vmul.f32 %v3736_v35, %v514_v7  ;;  %791 = vrot.lane.b32.xlu1 %v3586_v22, %s3292_s25  ;;  %687 = vrot.lane.b32.xlu0 %v3443_v61, %s3291_s24  ;;  %v3765_v31 = vld.sshfl [vmem:[#allocation1 + $0x10] sm:$0xff pattern:$0x75316420] }
  0xa3   :  { %5985 = vst [vmem:[#allocation36_spill] sm:$0xff] %v3738_v54  ;;  %v401_v53 = vmul.f32 %v3733_v42, %v377_v21  ;;  %v44_v54 = vadd.s32 1, %v3524_v45 }
  0xa4   :  { %v3742_v47 = vld.sshfl [vmem:[#allocation1] sm:$0xff pattern:$0x75316420]  ;;  %v3744_v14 = vld.sshfl [vmem:[#allocation1 + $0x8] sm:$0xff pattern:$0x75316420]  ;;  %285 = vrot.lane.b32.xlu2 %v3397_v27, %s3292_s25  ;;  %v3771_v45 = vpop.permute.xlu1 %492 }
  0xa5   :  { %2191 = vst [vmem:[#allocation1] ss:$2 sm:$0xff] %v3461_v3  ;;  %v551_v49 = vrot.slane %v535_v41, 4  ;;  %v515_v61 = vsel %vm508_vm13, %v3771_v45, %v495_v59  ;;  %vm45_vm14 = vcmp.ge.s32.totalorder %v44_v54, 0  ;;  %vm46_vm15 = vcmp.lt.s32.totalorder %v44_v54, 16 }
  0xa6   :  { %568 = vst [vmem:[#allocation2 + $0x8] sm:$0xf0] %v552_v13  ;;  %v417_v13 = vrot.slane %v401_v53, 4  ;;  %v534_v22 = vmul.f32 %v3763_v5, %v515_v61  ;;  %v600_v7 = vpop.permute.xlu2 %599  ;;  %vm3783_vm0 = vmand %vm45_vm14, %vm46_vm15  ;;  %v3788_v59 = vperm.slane %v3690_v36, 3  ;;  %vm1463_vm14 = vcmask 588800  }
  0xa7   :  { %1864 = vst [vmem:[#allocation1 + $0x20] ss:$2 sm:$0xff] %v3552_v57  ;;  %vm48_vm1 = vmand %vm3783_vm0, %vm3579_vm5  ;;  %vm879_vm5 = vcmask 293888  }
  0xa8   :  { %430 = vst [vmem:[#allocation2 + $0x80] sm:$0xf0] %v414_v12  ;;  %v550_v27 = vrot.slane %v534_v22, 4  ;;  %vm53_vm3 = vmand %vm3783_vm0, %vm3606_vm9 }
  0xa9   :  { %5986 = vst [vmem:[#allocation37_spill] sm:$0xff] %v3763_v5 }
  0xaa   :  { %433 = vst [vmem:[#allocation2 + $0xf0] sm:$0xf0] %v417_v13  ;;  %502 = vrot.lane.b32.xlu1 %v3426_v50, %s3294_s27  ;;  %368 = vrot.lane.b32.xlu0 %v3404_v32, %s3293_s26  ;;  %v3814_v13 = vsel %vm48_vm1, 1.0, %v5972_v58 }
  0xab   :  { %567 = vst [vmem:[#allocation2 + $0x110] sm:$0xf0] %v551_v49  ;;  %v3796_v54 = vpop.permute.xlu0 %500 }
  0xac   :  { %2280 = vst [vmem:[#allocation1 + $0x10] ss:$2 sm:$0xff] %v3452_v4  ;;  %v512_v50 = vsel %vm508_vm13, %v3707_v17, %v3796_v54  ;;  %97 = vrot.lane.b32.xlu2 %v3361_v11, %s3290_s23  ;;  %v3829_v11 = vperm.slane %v3814_v13, 1 }
  0xad   :  { %5991 = vst [vmem:[#allocation40_spill] sm:$0xff] %v3788_v59  ;;  %v3794_v4 = vld [vmem:[#allocation2 + $0x8] sm:$0xff]  ;;  %v537_v41 = vmul.f32 %v3788_v59, %v512_v50  ;;  %v3970_v59 = vsel %vm28_vm6, 1.0, %v5972_v58 }
  0xae   :  { %v3778_v12 = vld.sshfl [vmem:[#allocation1 + $0x20] sm:$0xff pattern:$0x75316420]  ;;  %v3780_v21 = vld.sshfl [vmem:[#allocation1 + $0x28] sm:$0xff pattern:$0x75316420]  ;;  %v3816_v49 = vpop.permute.xlu2 %677 }
  0xaf   :  { %5987 = vst [vmem:[#allocation38_spill] sm:$0xff] %v3778_v12  ;;  %v553_v17 = vrot.slane %v537_v41, 4 }
  0xb0   :  { %5988 = vst [vmem:[#allocation39_spill] sm:$0xff] %v3780_v21 }
  0xb1   :  { %1927 = vst [vmem:[#allocation1 + $0x20] ss:$2 sm:$0xff] %v3552_v57 }
  0xb2   :  { %566 = vst [vmem:[#allocation2 + $0x128] sm:$0xf0] %v550_v27  ;;  %v3809_v32 = vld [vmem:[#allocation2 + $0x110] sm:$0xff]  ;;  %182 = vrot.lane.b32.xlu1 %v3372_v16, %s3291_s24  ;;  %180 = vrot.lane.b32.xlu0 %v3379_v19, %s3291_s24 }
  0xb3   :  { %2035 = vst [vmem:[#allocation2 + $0x8] sm:$0xf] %v3545_v55 }
  0xb4   :  { %2034 = vst [vmem:[#allocation2 + $0x110] sm:$0xf] %v3664_v2  ;;  %v3832_v2 = vperm.slane %v3814_v13, 2  ;;  %v602_v27 = vpop.permute.xlu0 %601  ;;  %v604_v50 = vpop.permute.xlu1 %603  ;;  %283 = vrot.lane.b32.xlu2 %v3395_v26, %s3292_s25  ;;  %v3857_v26 = vperm.slane %v3814_v13, 3 }
  0xb5   :  { %569 = vst [vmem:[#allocation2 + $0x98] sm:$0xf0] %v553_v17  ;;  %v618_v16 = vsel %vm105_vm2, %v600_v7, %v602_v27  ;;  %v617_v19 = vsel %vm105_vm2, %v602_v27, %v604_v50  ;;  %v3860_v27 = vperm.slane %v3814_v13, 0 }
  0xb6   :  { %5994 = vst [vmem:[#allocation43_spill] sm:$0xff] %v3829_v11  ;;  %v639_v41 = vmul.f32 %v3829_v11, %v618_v16  ;;  %v640_v17 = vmul.f32 %v3832_v2, %v617_v19  ;;  %v3845_v12 = vpop.permute.xlu2 %781  ;;  %v3862_v16 = vld.sshfl [vmem:[#allocation1] sm:$0xff pattern:$0x75316420] }
  0xb7   :  { %5995 = vst [vmem:[#allocation44_spill] sm:$0xff] %v3832_v2 }
  0xb8   :  { %v3818_v55 = vld.sshfl [vmem:[#allocation1 + $0x20] sm:$0xff pattern:$0x75316420]  ;;  %v3820_v61 = vld.sshfl [vmem:[#allocation1 + $0x28] sm:$0xff pattern:$0x75316420] }
  0xb9   :  { %5992 = vst [vmem:[#allocation41_spill] sm:$0xff] %v3818_v55  ;;  %v3834_v22 = vld [vmem:[#allocation2 + $0x128] sm:$0xff] }
  0xba   :  { %5993 = vst [vmem:[#allocation42_spill] sm:$0xff] %v3820_v61  ;;  %364 = vrot.lane.b32.xlu1 %v3408_v34, %s3293_s26  ;;  %287 = vrot.lane.b32.xlu0 %v3390_v24, %s3292_s25  ;;  %v3873_v34 = vperm.slane %v3577_v0, 3  ;;  %v3875_v24 = vld.sshfl [vmem:[#allocation1 + $0x8] sm:$0xff pattern:$0x75316420] }
  0xbb   :  { %2014 = vst [vmem:[#allocation1 + $0x20] ss:$2 sm:$0xff] %v3552_v57 }
  0xbc   :  { %2033 = vst [vmem:[#allocation2 + $0x128] sm:$0xf] %v3662_v46  ;;  %v3864_v19 = vld [vmem:[#allocation2 + $0x98] sm:$0xff]  ;;  %v3866_v11 = vpop.permute.xlu0 %605  ;;  %2218 = vrot.lane.b32.xlu2 %v3765_v31, %s3291_s24 }
  0xbd   :  { %647 = vst [vmem:[#allocation2 + $0x118] sm:$0xf] %v639_v41  ;;  %v3868_v41 = vpop.permute.xlu1 %597 }
  0xbe   :  { %648 = vst [vmem:[#allocation2 + $0xd8] sm:$0xf] %v640_v17  ;;  %v616_v17 = vsel %vm105_vm2, %v604_v50, %v3866_v11  ;;  %v619_v35 = vsel %vm105_vm2, %v3868_v41, %v600_v7  ;;  %v3887_v42 = vpop.permute.xlu2 %176 }
  0xbf   :  { %5996 = vst [vmem:[#allocation45_spill] sm:$0xff] %v3857_v26  ;;  %v641_v5 = vmul.f32 %v3857_v26, %v616_v17  ;;  %v638_v31 = vmul.f32 %v3860_v27, %v619_v35 }
  0xc0   :  { %5997 = vst [vmem:[#allocation46_spill] sm:$0xff] %v3860_v27 }
  0xc1   :  { %5998 = vst [vmem:[#allocation47_spill] sm:$0xff] %v3873_v34 }
  0xc2   :  { %v3847_v55 = vld.sshfl [vmem:[#allocation1 + $0x20] sm:$0xff pattern:$0x75316420]  ;;  %v3849_v46 = vld.sshfl [vmem:[#allocation1 + $0x28] sm:$0xff pattern:$0x75316420]  ;;  %178 = vrot.lane.b32.xlu1 %v3377_v18, %s3291_s24  ;;  %99 = vrot.lane.b32.xlu0 %v3353_v8, %s3290_s23 }
  0xc3   :  { %2045 = vst [vmem:[#allocation1 + $0x20] ss:$2 sm:$0xff] %v3552_v57 }
  0xc4   :  { %2036 = vst [vmem:[#allocation2 + $0x98] sm:$0xf] %v3547_v56  ;;  %v191_v56 = vsel %vm186_vm8, %v3519_v44, %v3887_v42  ;;  %v682_v50 = vpop.permute.xlu0 %681  ;;  %v3907_v44 = vperm.slane %v3643_v43, 3 }
  0xc5   :  { %2278 = vst [vmem:[#allocation1] ss:$2 sm:$0xff] %v3461_v3  ;;  %v215_v7 = vmul.f32 %v3873_v34, %v191_v56  ;;  %v2288_v3 = vld.sshfl [vmem:[#allocation1 + $0x18] sm:$0xff pattern:$0x75316420]  ;;  %v3903_v17 = vpop.permute.xlu1 %685  ;;  %v3953_v34 = vsel %vm53_vm3, 1.0, %v5972_v58 }
  0xc6   :  { %649 = vst [vmem:[#allocation2 + $0xa0] sm:$0xf] %v641_v5  ;;  %2307 = vrot.lane.b32.xlu2 %v2288_v3, %s3292_s25  ;;  %v3912_v5 = vsel %vm3783_vm0, 1.0, %v5972_v58  ;;  %v3976_v62 = vperm.slane %v3953_v34, 2 }
  0xc7   :  { %646 = vst [vmem:[#allocation2 + $0xc0] sm:$0xf] %v638_v31  ;;  %v231_v35 = vrot.slane %v215_v7, 4  ;;  %v3914_v31 = vpop.permute.xlu2 %281  ;;  %v3931_v3 = vperm.slane %v3912_v5, 2  ;;  %v3979_v1 = vperm.slane %v3912_v5, 0 }
  0xc8   :  { %6000 = vst [vmem:[#allocation49_spill] sm:$0xff] %v3907_v44  ;;  %v296_v56 = vsel %vm291_vm12, %v3667_v15, %v3914_v31 }
  0xc9   :  { %247 = vst [vmem:[#allocation2 + $0x48] sm:$0xf0] %v231_v35  ;;  %v320_v7 = vmul.f32 %v3907_v44, %v296_v56  ;;  %v3934_v35 = vperm.slane %v3912_v5, 3  ;;  %v2287_v44 = vld.sshfl [vmem:[#allocation1 + $0x10] sm:$0xff pattern:$0x75316420] }
  0xca   :  { %v3889_v21 = vld.sshfl [vmem:[#allocation1 + $0x20] sm:$0xff pattern:$0x75316420]  ;;  %v3891_v61 = vld.sshfl [vmem:[#allocation1 + $0x28] sm:$0xff pattern:$0x75316420]  ;;  %2220 = vrot.lane.b32.xlu1 %v3767_v28, %s3291_s24  ;;  %95 = vrot.lane.b32.xlu0 %v3359_v10, %s3290_s23 }
  0xcb   :  { %5999 = vst [vmem:[#allocation48_spill] sm:$0xff] %v3891_v61  ;;  %v3943_v28 = vperm.slane %v3912_v5, 7 }
  0xcc   :  { %2132 = vst [vmem:[#allocation1 + $0x20] ss:$2 sm:$0xff] %v3552_v57  ;;  %v684_v15 = vpop.permute.xlu0 %683 }
  0xcd   :  { %6002 = vst [vmem:[#allocation51_spill] sm:$0xff] %v3931_v3  ;;  %v786_v56 = vpop.permute.xlu1 %785  ;;  %v696_v10 = vsel %vm186_vm8, %v684_v15, %v3903_v17 }
  0xce   :  { %6003 = vst [vmem:[#allocation52_spill] sm:$0xff] %v3934_v35  ;;  %2068 = vrot.lane.b32.xlu2 %v3602_v6, %s3294_s27  ;;  %v721_v53 = vmul.f32 %v3934_v35, %v696_v10 }
  0xcf   :  { %328 = vst [vmem:[#allocation2 + $0xf0] sm:$0xf] %v320_v7  ;;  %v697_v7 = vsel %vm186_vm8, %v682_v50, %v684_v15  ;;  %v3955_v27 = vpop.permute.xlu2 %691 }
  0xd0   :  { %6004 = vst [vmem:[#allocation53_spill] sm:$0xff] %v3943_v28  ;;  %v720_v52 = vmul.f32 %v3931_v3, %v697_v7  ;;  %v700_v6 = vsel %vm186_vm8, %v3955_v27, %v3816_v49 }
  0xd1   :  { %v725_v26 = vmul.f32 %v3943_v28, %v700_v6  ;;  %6005 = vst [vmem:[#allocation54_spill] sm:$0xff] %v3976_v62 }
  0xd2   :  { %v736_v10 = vrot.slane %v720_v52, 4  ;;  %2070 = vrot.lane.b32.xlu1 %v3604_v51, %s3294_s27  ;;  %2305 = vrot.lane.b32.xlu0 %v2287_v44, %s3292_s25  ;;  %6006 = vst [vmem:[#allocation55_spill] sm:$0xff] %v3979_v1  ;;  %v3982_v52 = vperm.slane %v3912_v5, 1  ;;  %v3987_v51 = vperm.slane %v3970_v59, 1 }
  0xd3   :  { %v3916_v18 = vld.sshfl [vmem:[#allocation1 + $0x20] sm:$0xff pattern:$0x75316420]  ;;  %v3918_v8 = vld.sshfl [vmem:[#allocation1 + $0x28] sm:$0xff pattern:$0x75316420] }
  0xd4   :  { %6001 = vst [vmem:[#allocation50_spill] sm:$0xff] %v3918_v8  ;;  %v737_v8 = vrot.slane %v721_v53, 4  ;;  %v741_v53 = vrot.slane %v725_v26, 4  ;;  %v680_v58 = vpop.permute.xlu0 %679 }
  0xd5   :  { %2195 = vst [vmem:[#allocation1 + $0x20] ss:$2 sm:$0xff] %v3552_v57  ;;  %v698_v6 = vsel %vm186_vm8, %v680_v58, %v682_v50  ;;  %v699_v26 = vsel %vm186_vm8, %v3816_v49, %v680_v58  ;;  %v4011_v49 = vperm.slane %v3953_v34, 3  ;;  %v4014_v58 = vperm.slane %v3953_v34, 0 }
  0xd6   :  { %752 = vst [vmem:[#allocation2 + $0xd8] sm:$0xf0] %v736_v10  ;;  %2157 = vrot.lane.b32.xlu2 %v3651_v29, %s3290_s23  ;;  %v718_v10 = vmul.f32 %v3979_v1, %v699_v26 }
  0xd7   :  { %6007 = vst [vmem:[#allocation56_spill] sm:$0xff] %v3982_v52  ;;  %v3999_v29 = vpop.permute.xlu2 %87 }
  0xd8   :  { %753 = vst [vmem:[#allocation2 + $0xa0] sm:$0xf0] %v737_v8  ;;  %v112_v28 = vsel %vm105_vm2, %v3999_v29, %v3494_v39  ;;  %v734_v2 = vrot.slane %v718_v10, 4 }
  0xd9   :  { %757 = vst [vmem:[#allocation2 + $0xe8] sm:$0xf0] %v741_v53  ;;  %v719_v53 = vmul.f32 %v3982_v52, %v698_v6  ;;  %v132_v61 = vmul.f32 %v3987_v51, %v112_v28 }
  0xda   :  { %6008 = vst [vmem:[#allocation57_spill] sm:$0xff] %v3987_v51  ;;  %2155 = vrot.lane.b32.xlu0 %v3649_v60, %s3290_s23  ;;  %2214 = vrot.lane.b32.xlu1 %v3862_v16, %s3291_s24  ;;  %v2286_v51 = vld.sshfl [vmem:[#allocation1 + $0x8] sm:$0xff pattern:$0x75316420] }
  0xdb   :  { %v735_v50 = vrot.slane %v719_v53, 4  ;;  %750 = vst [vmem:[#allocation2 + $0xc0] sm:$0xf0] %v734_v2 }
  0xdc   :  { %v2202_v15 = vld.sshfl [vmem:[#allocation1 + $0x20] sm:$0xff pattern:$0x75316420]  ;;  %v3965_v7 = vld.sshfl [vmem:[#allocation1 + $0x28] sm:$0xff pattern:$0x75316420]  ;;  %v784_v28 = vpop.permute.xlu0 %783 }
  0xdd   :  { %2282 = vst [vmem:[#allocation1 + $0x20] ss:$2 sm:$0xff] %v3552_v57  ;;  %v788_v57 = vpop.permute.xlu1 %787  ;;  %v802_v2 = vsel %vm291_vm12, %v784_v28, %v786_v56  ;;  %v803_v16 = vsel %vm291_vm12, %v3845_v12, %v784_v28  ;;  %v4042_v28 = vperm.slane %v3970_v59, 2 }
  0xde   :  { %v801_v44 = vsel %vm291_vm12, %v786_v56, %v788_v57  ;;  %6009 = vst [vmem:[#allocation58_spill] sm:$0xff] %v4011_v49  ;;  %2222 = vrot.lane.b32.xlu2 %v2202_v15, %s3291_s24  ;;  %v865_v56 = vld [vmem:[#allocation2 + $0xd8] sm:$0xff] }
  0xdf   :  { %v824_v8 = vmul.f32 %v3976_v62, %v801_v44  ;;  %6010 = vst [vmem:[#allocation59_spill] sm:$0xff] %v4014_v58  ;;  %v4017_v44 = vperm.slane %v3953_v34, 1  ;;  %v4033_v10 = vpop.permute.xlu2 %504 }
  0xe0   :  { %751 = vst [vmem:[#allocation2 + $0x118] sm:$0xf0] %v735_v50  ;;  %v4039_v50 = vperm.slane %v3577_v0, 1 }
  0xe1   :  { %832 = vst [vmem:[#allocation2 + $0x30] sm:$0xf] %v824_v8  ;;  %v822_v8 = vmul.f32 %v4014_v58, %v803_v16 }
  0xe2   :  { %6011 = vst [vmem:[#allocation60_spill] sm:$0xff] %v4017_v44  ;;  %2216 = vrot.lane.b32.xlu0 %v3875_v24, %s3291_s24  ;;  %v4054_v24 = vperm.slane %v3814_v13, 7 }
  0xe3   :  { %140 = vst [vmem:[#allocation2 + $0xd0] sm:$0xf] %v132_v61  ;;  %v823_v61 = vmul.f32 %v4017_v44, %v802_v2  ;;  %v4047_v2 = vld.sshfl [vmem:[#allocation1 + $0x38] sm:$0xff pattern:$0x75316420] }
  0xe4   :  { %830 = vst [vmem:[#allocation2 + $0x58] sm:$0xf] %v822_v8  ;;  %v2289_v53 = vld.sshfl [vmem:[#allocation1 + $0x20] sm:$0xff pattern:$0x75316420] }
  0xe5   :  { %v4019_v6 = vpop.permute.xlu1 %789  ;;  %831 = vst [vmem:[#allocation2 + $0x78] sm:$0xf] %v823_v61 }
  0xe6   :  { %v800_v60 = vsel %vm291_vm12, %v788_v57, %v4019_v6  ;;  %v2285_v57 = vld.sshfl [vmem:[#allocation1] sm:$0xff pattern:$0x75316420]  ;;  %6012 = vst [vmem:[#allocation61_spill] sm:$0xff] %v4039_v50  ;;  %2309 = vrot.lane.b32.xlu2 %v2289_v53, %s3292_s25 }
  0xe7   :  { %v825_v26 = vmul.f32 %v4011_v49, %v800_v60  ;;  %6013 = vst [vmem:[#allocation62_spill] sm:$0xff] %v4042_v28  ;;  %2301 = vrot.lane.b32.xlu1 %v2285_v57, %s3292_s25  ;;  %v4045_v60 = vld.sshfl [vmem:[#allocation1 + $0x30] sm:$0xff pattern:$0x75316420] }
  0xe8   :  { %v873_v15 = vld [vmem:[#allocation2 + $0x30] sm:$0xf]  ;;  %6014 = vst [vmem:[#allocation63_spill] sm:$0xff] %v4054_v24 }
  0xe9   :  { %833 = vst [vmem:[#allocation2 + $0x40] sm:$0xf] %v825_v26  ;;  %3219 = vmatpush.msk.msra.mxu2 %vm883_vm4, %v873_v15  ;;  %v4050_v26 = vpop.permute.xlu0 %91 }
  0xea   :  { %2016 = vst [vmem:[#allocation1 + $0x30] ss:$2 sm:$0xff] %v3492_v37  ;;  %v111_v61 = vsel %vm105_vm2, %v3494_v39, %v4050_v26  ;;  %2303 = vrot.lane.b32.xlu0 %v2286_v51, %s3292_s25 }
  0xeb   :  { %960 = vmatpush.msra.mxu2 %v865_v56  ;;  %v133_v57 = vmul.f32 %v4042_v28, %v111_v61  ;;  %v4066_v56 = vpop.permute.xlu2 %611  ;;  %v871_v58 = vld [vmem:[#allocation2 + $0x58] sm:$0xf]  ;;  %v866_v61 = vld [vmem:[#allocation2 + $0xa0] sm:$0xff]  ;;  %v4077_v28 = vperm.slane %v3643_v43, 1 }
  0xec   :  { %3215 = vmatpush.msk.msra.mxu0 %vm883_vm4, %v871_v58 }
  0xed   :  { %961 = vmatpush.msra.mxu2 %v3794_v4  ;;  %v171_v16 = vpop.permute.xlu1 %170  ;;  %v849_v4 = vld [vmem:[#allocation2 + $0x138] sm:$0xff]  ;;  %141 = vst [vmem:[#allocation2 + $0x10] sm:$0xf] %v133_v57 }
  0xee   :  { %v193_v8 = vsel %vm186_vm8, %v171_v16, %v3613_v25  ;;  %v620_v25 = vsel %vm105_vm2, %v4066_v56, %v3868_v41  ;;  %6015 = vst [vmem:[#allocation64_spill] sm:$0xff] %v4077_v28  ;;  %v4080_v41 = vperm.slane %v3577_v0, 0  ;;  %1950 = vrot.lane.b32.xlu2 %v3526_v48, %s3293_s26 }
  0xef   :  { %v213_v15 = vmul.f32 %v4039_v50, %v193_v8  ;;  %962 = vmatpush.msra.mxu2 %v849_v4  ;;  %v645_v39 = vmul.f32 %v4054_v24, %v620_v25  ;;  %v872_v8 = vld [vmem:[#allocation2 + $0x78] sm:$0xf]  ;;  %v863_v4 = vld [vmem:[#allocation2 + $0xc0] sm:$0xff]  ;;  %2064 = vrot.lane.b32.xlu1 %v3701_v9, %s3294_s27 }
  0xf0   :  { %v874_v53 = vld [vmem:[#allocation2 + $0x40] sm:$0xf]  ;;  %3217 = vmatpush.msk.msra.mxu1 %vm883_vm4, %v872_v8  ;;  %6016 = vst [vmem:[#allocation65_spill] sm:$0xff] %v4080_v41  ;;  %920 = vmatpush.msra.mxu0 %v863_v4  ;;  %v850_v8 = vld [vmem:[#allocation2 + $0xf0] sm:$0xff]  ;;  %v4122_v4 = vperm.slane %v3814_v13, 4 }
  0xf1   :  { %v229_v44 = vrot.slane %v213_v15, 4  ;;  %3221 = vmatpush.msk.msra.mxu3 %vm883_vm4, %v874_v53  ;;  %v864_v15 = vld [vmem:[#allocation2 + $0x118] sm:$0xff]  ;;  %653 = vst [vmem:[#allocation2 + $0xe8] sm:$0xf] %v645_v39 }
  0xf2   :  { %v4083_v57 = vld.sshfl [vmem:[#allocation1 + $0x30] sm:$0xff pattern:$0x75316420]  ;;  %940 = vmatpush.msra.mxu1 %v864_v15  ;;  %v4089_v53 = vld.sshfl [vmem:[#allocation1 + $0x38] sm:$0xff pattern:$0x75316420]  ;;  %921 = vmatpush.msra.mxu0 %v3834_v22 }
  0xf3   :  { %245 = vst [vmem:[#allocation2 + $0xd0] sm:$0xf0] %v229_v44  ;;  %980 = vmatpush.msra.mxu3 %v866_v61  ;;  %v4087_v44 = vpop.permute.xlu0 %184  ;;  %v4108_v22 = vperm.slane %v3912_v5, 6  ;;  %v4111_v61 = vperm.slane %v3643_v43, 0  ;;  %1948 = vrot.lane.b32.xlu0 %v3621_v63, %s3293_s26 }
  0xf4   :  { %v194_v51 = vsel %vm186_vm8, %v4087_v44, %v171_v16  ;;  %2047 = vst [vmem:[#allocation1 + $0x30] ss:$2 sm:$0xff] %v3492_v37  ;;  %941 = vmatpush.msra.mxu1 %v3809_v32 }
  0xf5   :  { %v276_v58 = vpop.permute.xlu1 %275  ;;  %981 = vmatpush.msra.mxu3 %v3864_v19  ;;  %v212_v39 = vmul.f32 %v4080_v41, %v194_v51  ;;  %v4105_v19 = vpop.permute.xlu2 %366  ;;  %6017 = vst [vmem:[#allocation66_spill] sm:$0xff] %v4108_v22 }
  0xf6   :  { %v298_v25 = vsel %vm291_vm12, %v276_v58, %v3660_v40  ;;  %v841_v40 = vld [vmem:[#allocation2 + $0x10] sm:$0xff]  ;;  %6018 = vst [vmem:[#allocation67_spill] sm:$0xff] %v4111_v61  ;;  %2072 = vrot.lane.b32.xlu2 %v3889_v21, %s3294_s27  ;;  %v4148_v21 = vperm.slane %v3953_v34, 6 }
  0xf7   :  { %v318_v9 = vmul.f32 %v4077_v28, %v298_v25  ;;  %982 = vmatpush.msra.mxu3 %v850_v8  ;;  %v228_v16 = vrot.slane %v212_v39, 4  ;;  %963 = vmatpush.msra.mxu2 %v841_v40  ;;  %6019 = vst [vmem:[#allocation68_spill] sm:$0xff] %v4122_v4 }
  0xf8   :  { %2151 = vrot.lane.b32.xlu1 %v3742_v47, %s3290_s23  ;;  %6021 = vst [vmem:[#allocation70_spill] sm:$0xff] %v4148_v21 }
  0xf9   :  { %326 = vst [vmem:[#allocation2 + $0x108] sm:$0xf] %v318_v9 }
  0xfa   :  { %244 = vst [vmem:[#allocation2 + $0xb0] sm:$0xf0] %v228_v16  ;;  %v840_v16 = vld [vmem:[#allocation2 + $0xd0] sm:$0xff] }
  0xfb   :  { %v4119_v32 = vpop.permute.xlu0 %289  ;;  %v4124_v15 = vld.sshfl [vmem:[#allocation1 + $0x30] sm:$0xff pattern:$0x75316420]  ;;  %v4133_v51 = vld.sshfl [vmem:[#allocation1 + $0x38] sm:$0xff pattern:$0x75316420] }
  0xfc   :  { %v299_v63 = vsel %vm291_vm12, %v4119_v32, %v276_v58  ;;  %2134 = vst [vmem:[#allocation1 + $0x30] ss:$2 sm:$0xff] %v3492_v37 }
  0xfd   :  { %v4117_v48 = vpop.permute.xlu1 %689  ;;  %v317_v9 = vmul.f32 %v4111_v61, %v299_v63  ;;  %v608_v39 = vpop.permute.xlu2 %607  ;;  %v6022_v63 = vld [vmem:[#allocation31_spill] sm:$0xff] }
  0xfe   :  { %v693_v25 = vsel %vm186_vm8, %v4117_v48, %v3955_v27  ;;  %v615_v27 = vsel %vm105_vm2, %v3866_v11, %v608_v39  ;;  %2066 = vrot.lane.b32.xlu0 %v6022_v63, %s3294_s27  ;;  %v6023_v11 = vld [vmem:[#allocation14_spill] sm:$0xff]  ;;  %2159 = vrot.lane.b32.xlu2 %v3916_v18, %s3290_s23 }
  0xff   :  { %v724_v47 = vmul.f32 %v4108_v22, %v693_v25  ;;  %325 = vst [vmem:[#allocation2 + $0x80] sm:$0xf] %v317_v9  ;;  %v642_v58 = vmul.f32 %v4122_v4, %v615_v27  ;;  %v4145_v25 = vperm.slane %v3953_v34, 7  ;;  %v4177_v4 = vperm.slane %v3970_v59, 3  ;;  %v6027_v22 = vld [vmem:[#allocation16_spill] sm:$0xff] }
 0x100   :  { %v848_v8 = vld [vmem:[#allocation2 + $0x108] sm:$0xff]  ;;  %1798 = vrot.lane.b32.xlu1 %v6023_v11, %s3291_s24 }
 0x101   :  { %v740_v40 = vrot.slane %v724_v47, 4  ;;  %942 = vmatpush.msra.mxu1 %v848_v8  ;;  %6020 = vst [vmem:[#allocation69_spill] sm:$0xff] %v4145_v25 }
 0x102   :  { %650 = vst [vmem:[#allocation2 + $0x68] sm:$0xf] %v642_v58 }
 0x103   :  { %756 = vst [vmem:[#allocation2 + $0x50] sm:$0xf0] %v740_v40  ;;  %943 = vmatpush.msra.mxu1 %v840_v16  ;;  %v4154_v9 = vpop.permute.xlu0 %793  ;;  %v4162_v40 = vld.sshfl [vmem:[#allocation1 + $0x30] sm:$0xff pattern:$0x75316420] }
 0x104   :  { %v4164_v16 = vld.sshfl [vmem:[#allocation1 + $0x38] sm:$0xff pattern:$0x75316420]  ;;  %6025 = vst [vmem:[#allocation14_spill] sm:$0xff] %v4177_v4 }
 0x105   :  { %v796_v47 = vpop.permute.xlu1 %795  ;;  %v4170_v11 = vpop.permute.xlu2 %285  ;;  %2197 = vst [vmem:[#allocation1 + $0x30] ss:$2 sm:$0xff] %v3492_v37 }
 0x106   :  { %v804_v8 = vsel %vm291_vm12, %v796_v47, %v3845_v12  ;;  %v797_v27 = vsel %vm291_vm12, %v4154_v9, %v796_v47  ;;  %v847_v12 = vld [vmem:[#allocation2 + $0x80] sm:$0xff]  ;;  %v4174_v47 = vperm.slane %v3970_v59, 0  ;;  %2153 = vrot.lane.b32.xlu0 %v3744_v14, %s3290_s23  ;;  %1885 = vrot.lane.b32.xlu2 %v6027_v22, %s3292_s25  ;;  %v4217_v22 = vperm.slane %v3690_v36, 7 }
 0x107   :  { %v829_v58 = vmul.f32 %v4145_v25, %v804_v8  ;;  %v828_v63 = vmul.f32 %v4148_v21, %v797_v27  ;;  %922 = vmatpush.msra.mxu0 %v847_v12  ;;  %v6026_v8 = vld [vmem:[#allocation8_spill] sm:$0xff]  ;;  %v4211_v21 = vperm.slane %v3814_v13, 6 }
 0x108   :  { %6024 = vst [vmem:[#allocation31_spill] sm:$0xff] %v4174_v47  ;;  %1887 = vrot.lane.b32.xlu1 %v6026_v8, %s3292_s25 }
 0x109   :  { %837 = vst [vmem:[#allocation2 + $0x60] sm:$0xf] %v829_v58 }
 0x10a   :  { %836 = vst [vmem:[#allocation2 + $0xb8] sm:$0xf] %v828_v63 }
 0x10b   :  { %v4185_v27 = vpop.permute.xlu0 %93 }
 0x10c   :  { %v110_v63 = vsel %vm105_vm2, %v4050_v26, %v4185_v27  ;;  %v4195_v12 = vld.sshfl [vmem:[#allocation1 + $0x38] sm:$0xff pattern:$0x75316420]  ;;  %v4197_v14 = vld.sshfl [vmem:[#allocation1 + $0x30] sm:$0xff pattern:$0x75316420] }
 0x10d   :  { %v4183_v18 = vpop.permute.xlu1 %101  ;;  %v134_v24 = vmul.f32 %v4177_v4, %v110_v63  ;;  %v4203_v25 = vpop.permute.xlu2 %97  ;;  %2284 = vst [vmem:[#allocation1 + $0x30] ss:$2 sm:$0xff] %v3492_v37  ;;  %v4208_v26 = vperm.slane %v3814_v13, 5  ;;  %v6029_v63 = vld [vmem:[#allocation6_spill] sm:$0xff]  ;;  %v4227_v13 = vperm.slane %v3643_v43, 5 }
 0x10e   :  { %v113_v58 = vsel %vm105_vm2, %v4183_v18, %v3999_v29  ;;  %1800 = vrot.lane.b32.xlu0 %v6029_v63, %s3291_s24 }
 0x10f   :  { %v131_v8 = vmul.f32 %v4174_v47, %v113_v58  ;;  %142 = vst [vmem:[#allocation2 + $0x48] sm:$0xf] %v134_v24  ;;  %v4214_v58 = vperm.slane %v3690_v36, 6 }
 0x110   :  { %6028 = vst [vmem:[#allocation8_spill] sm:$0xff] %v4208_v26  ;;  %1960 = vrot.lane.b32.xlu1 %v4047_v2, %s3293_s26 }
 0x111   :  { %139 = vst [vmem:[#allocation2 + $0xb0] sm:$0xf] %v131_v8  ;;  %v877_v29 = vld [vmem:[#allocation2 + $0xb8] sm:$0xf]  ;;  %v4224_v8 = vperm.slane %v3643_v43, 4 }
 0x112   :  { %3227 = vmatpush.msk.msrb.mxu2 %vm883_vm4, %v877_v29  ;;  %6031 = vst [vmem:[#allocation6_spill] sm:$0xff] %v4227_v13 }
 0x113   :  { %v507_v24 = vpop.permute.xlu0 %506  ;;  %6030 = vst [vmem:[#allocation16_spill] sm:$0xff] %v4224_v8 }
 0x114   :  { %v509_v63 = vsel %vm508_vm13, %v4033_v10, %v507_v24  ;;  %v516_v2 = vsel %vm508_vm13, %v507_v24, %v3771_v45 }
 0x115   :  { %v610_v37 = vpop.permute.xlu1 %609  ;;  %v540_v61 = vmul.f32 %v4214_v58, %v509_v63  ;;  %v541_v50 = vmul.f32 %v4217_v22, %v516_v2  ;;  %v878_v2 = vld [vmem:[#allocation2 + $0x60] sm:$0xf] }
 0x116   :  { %v613_v29 = vsel %vm105_vm2, %v610_v37, %v4066_v56  ;;  %v614_v47 = vsel %vm105_vm2, %v608_v39, %v610_v37  ;;  %v6032_v56 = vld [vmem:[#allocation12_spill] sm:$0xff]  ;;  %v284_v39 = vpop.permute.xlu2 %283 }
 0x117   :  { %v643_v4 = vmul.f32 %v4208_v26, %v614_v47  ;;  %v644_v28 = vmul.f32 %v4211_v21, %v613_v29  ;;  %1952 = vrot.lane.b32.xlu2 %v6032_v56, %s3293_s26  ;;  %v294_v41 = vsel %vm291_vm12, %v284_v39, %v4170_v11  ;;  %v295_v45 = vsel %vm291_vm12, %v3914_v31, %v284_v39  ;;  %v842_v29 = vld [vmem:[#allocation2 + $0x48] sm:$0xff] }
 0x118   :  { %v839_v37 = vld [vmem:[#allocation2 + $0xb0] sm:$0xff]  ;;  %v556_v47 = vrot.slane %v540_v61, 4  ;;  %v557_v24 = vrot.slane %v541_v50, 4  ;;  %v321_v63 = vmul.f32 %v4224_v8, %v295_v45  ;;  %983 = vmatpush.msra.mxu3 %v842_v29  ;;  %v322_v56 = vmul.f32 %v4227_v13, %v294_v41  ;;  %v870_v41 = vld [vmem:[#allocation2 + $0xe8] sm:$0xff] }
 0x119   :  { %651 = vst [vmem:[#allocation2 + $0x130] sm:$0xf] %v643_v4  ;;  %923 = vmatpush.msra.mxu0 %v839_v37  ;;  %v4256_v26 = vperm.slane %v3953_v34, 4  ;;  %v4259_v31 = vperm.slane %v3953_v34, 5  ;;  %v4262_v50 = vperm.slane %v3912_v5, 4  ;;  %v4265_v61 = vperm.slane %v3912_v5, 5 }
 0x11a   :  { %652 = vst [vmem:[#allocation2 + $0x50] sm:$0xf] %v644_v28  ;;  %3229 = vmatpush.msk.msrb.mxu3 %vm883_vm4, %v878_v2  ;;  %v6037_v28 = vld [vmem:[#allocation21_spill] sm:$0xff]  ;;  %v6039_v2 = vld [vmem:[#allocation4_spill] sm:$0xff] }
 0x11b   :  { %572 = vst [vmem:[#allocation2 + $0xe0] sm:$0xf0] %v556_v47  ;;  %1946 = vrot.lane.b32.xlu0 %v6037_v28, %s3293_s26  ;;  %v6038_v4 = vld [vmem:[#allocation13_spill] sm:$0xff]  ;;  %v688_v37 = vpop.permute.xlu0 %687 }
 0x11c   :  { %6033 = vst [vmem:[#allocation12_spill] sm:$0xff] %v4256_v26  ;;  %1796 = vrot.lane.b32.xlu1 %v6038_v4, %s3291_s24  ;;  %1060 = vmatpush.msrb.mxu3 %v870_v41  ;;  %v694_v45 = vsel %vm186_vm8, %v688_v37, %v4117_v48  ;;  %v695_v47 = vsel %vm186_vm8, %v3903_v17, %v688_v37  ;;  %v4298_v37 = vperm.slane %v3600_v38, 6 }
 0x11d   :  { %6034 = vst [vmem:[#allocation71_spill] sm:$0xff] %v4259_v31  ;;  %v792_v39 = vpop.permute.xlu1 %791 }
 0x11e   :  { %6035 = vst [vmem:[#allocation72_spill] sm:$0xff] %v4262_v50  ;;  %v798_v34 = vsel %vm291_vm12, %v792_v39, %v4154_v9  ;;  %v799_v5 = vsel %vm291_vm12, %v4019_v6, %v792_v39  ;;  %v723_v9 = vmul.f32 %v4265_v61, %v694_v45  ;;  %v4289_v6 = vpop.permute.xlu2 %2218  ;;  %v4295_v39 = vperm.slane %v3690_v36, 5  ;;  %v6045_v45 = vld [vmem:[#allocation15_spill] sm:$0xff] }
 0x11f   :  { %6036 = vst [vmem:[#allocation73_spill] sm:$0xff] %v4265_v61  ;;  %v827_v29 = vmul.f32 %v4259_v31, %v798_v34  ;;  %1737 = vrot.lane.b32.xlu2 %v6039_v2, %s3290_s23  ;;  %v4301_v34 = vperm.slane %v3600_v38, 7 }
 0x120   :  { %573 = vst [vmem:[#allocation2 + $0x88] sm:$0xf0] %v557_v24  ;;  %v826_v24 = vmul.f32 %v4256_v26, %v799_v5  ;;  %v739_v28 = vrot.slane %v723_v9, 4  ;;  %v6044_v5 = vld [vmem:[#allocation11_spill] sm:$0xff] }
 0x121   :  { %329 = vst [vmem:[#allocation2 + $0x18] sm:$0xf] %v321_v63  ;;  %v722_v63 = vmul.f32 %v4262_v50, %v695_v47  ;;  %v869_v41 = vld [vmem:[#allocation2 + $0x50] sm:$0xff] }
 0x122   :  { %330 = vst [vmem:[#allocation2 + $0xc8] sm:$0xf] %v322_v56  ;;  %1040 = vmatpush.msrb.mxu2 %v869_v41  ;;  %v861_v17 = vld [vmem:[#allocation2 + $0xe0] sm:$0xff]  ;;  %v4292_v56 = vperm.slane %v3690_v36, 4 }
 0x123   :  { %834 = vst [vmem:[#allocation2 + $0x28] sm:$0xf] %v826_v24  ;;  %v738_v48 = vrot.slane %v722_v63, 4  ;;  %1735 = vrot.lane.b32.xlu0 %v6044_v5, %s3290_s23  ;;  %v369_v36 = vpop.permute.xlu0 %368 }
 0x124   :  { %835 = vst [vmem:[#allocation2] sm:$0xf] %v827_v29  ;;  %1041 = vmatpush.msrb.mxu2 %v861_v17  ;;  %1883 = vrot.lane.b32.xlu1 %v6045_v45, %s3292_s25  ;;  %v374_v63 = vsel %vm372_vm10, %v4105_v19, %v369_v36 }
 0x125   :  { %6040 = vst [vmem:[#allocation21_spill] sm:$0xff] %v4292_v56  ;;  %v503_v47 = vpop.permute.xlu1 %502  ;;  %v404_v2 = vmul.f32 %v4298_v37, %v374_v63 }
 0x126   :  { %754 = vst [vmem:[#allocation2 + $0x68] sm:$0xf0] %v738_v48  ;;  %v510_v24 = vsel %vm508_vm13, %v503_v47, %v4033_v10  ;;  %v511_v29 = vsel %vm508_vm13, %v3796_v54, %v503_v47  ;;  %v6046_v48 = vld [vmem:[#allocation23_spill] sm:$0xff]  ;;  %v4327_v54 = vpop.permute.xlu2 %2307 }
 0x127   :  { %v862_v4 = vld [vmem:[#allocation2 + $0x88] sm:$0xff]  ;;  %6041 = vst [vmem:[#allocation13_spill] sm:$0xff] %v4295_v39  ;;  %v538_v9 = vmul.f32 %v4292_v56, %v511_v29  ;;  %1810 = vrot.lane.b32.xlu2 %v6046_v48, %s3291_s24  ;;  %v4344_v29 = vperm.slane %v3577_v0, 6 }
 0x128   :  { %6042 = vst [vmem:[#allocation4_spill] sm:$0xff] %v4298_v37  ;;  %1061 = vmatpush.msrb.mxu3 %v862_v4  ;;  %v420_v4 = vrot.slane %v404_v2, 4 }
 0x129   :  { %6043 = vst [vmem:[#allocation74_spill] sm:$0xff] %v4301_v34  ;;  %v554_v41 = vrot.slane %v538_v9, 4 }
 0x12a   :  { %755 = vst [vmem:[#allocation2 + $0x130] sm:$0xf0] %v739_v28  ;;  %v875_v28 = vld [vmem:[#allocation2 + $0x28] sm:$0xf] }
 0x12b   :  { %2039 = vst [vmem:[#allocation2 + $0xe0] sm:$0xf] %v4083_v57  ;;  %v373_v57 = vsel %vm372_vm10, %v369_v36, %v3720_v33  ;;  %v4332_v33 = vld [vmem:[%s5786_s1] sm:$0xff]  ;;  %3223 = vmatpush.msk.msrb.mxu0 %vm883_vm4, %v875_v28  ;;  %v876_v5 = vld [vmem:[#allocation2] sm:$0xf]  ;;  %v181_v9 = vpop.permute.xlu0 %180 }
 0x12c   :  { %2040 = vst [vmem:[#allocation2 + $0x88] sm:$0xf] %v4089_v53  ;;  %v539_v53 = vmul.f32 %v4295_v39, %v510_v24  ;;  %v405_v10 = vmul.f32 %v4301_v34, %v373_v57  ;;  %3220 = vmatmul.msk.f32.vlgmr.msra.gmra.mxu2 %vm879_vm5, %v4332_v33  ;;  %3225 = vmatpush.msk.msrb.mxu1 %vm883_vm4, %v876_v5  ;;  %v4341_v24 = vperm.slane %v3577_v0, 7  ;;  %v6049_v57 = vld [vmem:[#allocation7_spill] sm:$0xff] }
 0x12d   :  { %v867_v47 = vld [vmem:[#allocation2 + $0x68] sm:$0xff]  ;;  %3222 = vmatmul.msk.f32.vlgmr.msra.gmra.mxu3 %vm879_vm5, %v4332_v33  ;;  %570 = vst [vmem:[#allocation2 + $0xa8] sm:$0xf0] %v554_v41  ;;  %3218 = vmatmul.msk.f32.vlgmr.msra.gmra.mxu1 %vm879_vm5, %v4332_v33  ;;  %v183_v63 = vpop.permute.xlu1 %182  ;;  %v6050_v28 = vld [vmem:[#allocation27_spill] sm:$0xff] }
 0x12e   :  { %v555_v17 = vrot.slane %v539_v53, 4  ;;  %v421_v45 = vrot.slane %v405_v10, 4  ;;  %1000 = vmatpush.msrb.mxu0 %v867_v47  ;;  %6047 = vst [vmem:[#allocation11_spill] sm:$0xff] %v4341_v24  ;;  %1802 = vrot.lane.b32.xlu0 %v6049_v57, %s3291_s24  ;;  %v187_v53 = vsel %vm186_vm8, %v183_v63, %v4087_v44  ;;  %v188_v2 = vsel %vm186_vm8, %v181_v9, %v183_v63  ;;  %v4363_v41 = vpop.permute.xlu2 %2068  ;;  %v2291_v63 = vld.sshfl [vmem:[#allocation1 + $0x30] sm:$0xff pattern:$0x75316420] }
 0x12f   :  { %6048 = vst [vmem:[#allocation15_spill] sm:$0xff] %v4344_v29  ;;  %3216 = vmatmul.msk.f32.vlgmr.msra.gmra.mxu0 %vm879_vm5, %v4332_v33  ;;  %2226 = vrot.lane.b32.xlu1 %v4197_v14, %s3291_s24  ;;  %v219_v10 = vmul.f32 %v4341_v24, %v187_v53  ;;  %v218_v48 = vmul.f32 %v4344_v29, %v188_v2  ;;  %v4369_v47 = vperm.slane %v3600_v38, 5  ;;  %v4375_v57 = vperm.slane %v3643_v43, 7  ;;  %v6054_v53 = vld [vmem:[#allocation9_spill] sm:$0xff] }
 0x130   :  { %571 = vst [vmem:[#allocation2 + $0x90] sm:$0xf0] %v555_v17  ;;  %1897 = vrot.lane.b32.xlu2 %v6050_v28, %s3292_s25 }
 0x131   :  { %v868_v36 = vld [vmem:[#allocation2 + $0x130] sm:$0xff]  ;;  %436 = vst [vmem:[#allocation2 + $0x70] sm:$0xf0] %v420_v4  ;;  %v235_v14 = vrot.slane %v219_v10, 4  ;;  %v234_v17 = vrot.slane %v218_v48, 4 }
 0x132   :  { %1020 = vmatpush.msrb.mxu1 %v868_v36  ;;  %437 = vst [vmem:[#allocation2 + $0x20] sm:$0xf0] %v421_v45  ;;  %v2292_v4 = vld.sshfl [vmem:[#allocation1 + $0x38] sm:$0xff pattern:$0x75316420]  ;;  %v4366_v45 = vperm.slane %v3600_v38, 4 }
 0x133   :  { %251 = vst [vmem:[#allocation2 + $0x100] sm:$0xf0] %v235_v14  ;;  %v4372_v36 = vperm.slane %v3643_v43, 6  ;;  %v288_v10 = vpop.permute.xlu0 %287 }
 0x134   :  { %v859_v5 = vld [vmem:[#allocation2 + $0xa8] sm:$0xff]  ;;  %6051 = vst [vmem:[#allocation23_spill] sm:$0xff] %v4366_v45  ;;  %v293_v48 = vsel %vm291_vm12, %v4170_v11, %v288_v10  ;;  %v4405_v11 = vperm.slane %v3577_v0, 5 }
 0x135   :  { %1001 = vmatpush.msrb.mxu0 %v859_v5  ;;  %6052 = vst [vmem:[#allocation7_spill] sm:$0xff] %v4369_v47  ;;  %v365_v2 = vpop.permute.xlu1 %364  ;;  %v323_v14 = vmul.f32 %v4372_v36, %v293_v48  ;;  %v4408_v5 = vperm.slane %v3970_v59, 6 }
 0x136   :  { %6053 = vst [vmem:[#allocation27_spill] sm:$0xff] %v4372_v36  ;;  %1889 = vrot.lane.b32.xlu0 %v6054_v53, %s3292_s25  ;;  %v375_v38 = vsel %vm372_vm10, %v365_v2, %v4105_v19  ;;  %v376_v43 = vsel %vm372_vm10, %v3747_v23, %v365_v2 }
 0x137   :  { %v860_v44 = vld [vmem:[#allocation2 + $0x90] sm:$0xff]  ;;  %250 = vst [vmem:[#allocation2 + $0xf8] sm:$0xf0] %v234_v17  ;;  %2315 = vrot.lane.b32.xlu1 %v2292_v4, %s3292_s25  ;;  %v402_v28 = vmul.f32 %v4366_v45, %v376_v43  ;;  %v4399_v17 = vpop.permute.xlu2 %2157 }
 0x138   :  { %1021 = vmatpush.msrb.mxu1 %v860_v44  ;;  %2038 = vst [vmem:[#allocation2 + $0x90] sm:$0xf] %v3849_v46  ;;  %v292_v46 = vsel %vm291_vm12, %v288_v10, %v4119_v32  ;;  %2313 = vrot.lane.b32.xlu2 %v2291_v63, %s3292_s25  ;;  %v4402_v32 = vperm.slane %v3577_v0, 4  ;;  %v4411_v44 = vperm.slane %v3970_v59, 7  ;;  %v6059_v63 = vld [vmem:[#allocation18_spill] sm:$0xff] }
 0x139   :  { %2037 = vst [vmem:[#allocation2 + $0xa8] sm:$0xf] %v3847_v55  ;;  %v403_v55 = vmul.f32 %v4369_v47, %v375_v38  ;;  %v324_v19 = vmul.f32 %v4375_v57, %v292_v46  ;;  %v418_v23 = vrot.slane %v402_v28, 4  ;;  %v6060_v28 = vld [vmem:[#allocation5_spill] sm:$0xff] }
 0x13a   :  { %331 = vst [vmem:[#allocation2 + $0x70] sm:$0xf] %v323_v14 }
 0x13b   :  { %v419_v4 = vrot.slane %v403_v55, 4  ;;  %332 = vst [vmem:[#allocation2 + $0x20] sm:$0xf] %v324_v19  ;;  %v100_v2 = vpop.permute.xlu0 %99 }
 0x13c   :  { %434 = vst [vmem:[#allocation2 + $0x18] sm:$0xf0] %v418_v23  ;;  %v106_v38 = vsel %vm105_vm2, %v100_v2, %v4183_v18 }
 0x13d   :  { %6055 = vst [vmem:[#allocation9_spill] sm:$0xff] %v4402_v32  ;;  %v179_v53 = vpop.permute.xlu1 %178 }
 0x13e   :  { %6056 = vst [vmem:[#allocation75_spill] sm:$0xff] %v4405_v11  ;;  %2228 = vrot.lane.b32.xlu0 %v4195_v12, %s3291_s24  ;;  %v189_v10 = vsel %vm186_vm8, %v179_v53, %v181_v9  ;;  %v190_v0 = vsel %vm186_vm8, %v3887_v42, %v179_v53  ;;  %v107_v12 = vsel %vm105_vm2, %v4203_v25, %v100_v2  ;;  %v4440_v53 = vperm.slane %v3970_v59, 5  ;;  %v6063_v2 = vld [vmem:[#allocation10_spill] sm:$0xff] }
 0x13f   :  { %6057 = vst [vmem:[#allocation76_spill] sm:$0xff] %v4408_v5  ;;  %1747 = vrot.lane.b32.xlu1 %v6059_v63, %s3290_s23  ;;  %v216_v43 = vmul.f32 %v4402_v32, %v190_v0  ;;  %v217_v46 = vmul.f32 %v4405_v11, %v189_v10  ;;  %v137_v48 = vmul.f32 %v4408_v5, %v107_v12  ;;  %v4434_v42 = vpop.permute.xlu2 %2222  ;;  %v4437_v63 = vperm.slane %v3970_v59, 4  ;;  %v6077_v5 = vld [vmem:[#allocation35_spill] sm:$0xff] }
 0x140   :  { %6058 = vst [vmem:[#allocation77_spill] sm:$0xff] %v4411_v44  ;;  %v138_v9 = vmul.f32 %v4411_v44, %v106_v38  ;;  %1739 = vrot.lane.b32.xlu2 %v6060_v28, %s3290_s23 }
 0x141   :  { %435 = vst [vmem:[#allocation2 + $0xc8] sm:$0xf0] %v419_v4  ;;  %v853_v55 = vld [vmem:[#allocation2 + $0x70] sm:$0xff]  ;;  %v232_v14 = vrot.slane %v216_v43, 4  ;;  %v233_v18 = vrot.slane %v217_v46, 4 }
 0x142   :  { %145 = vst [vmem:[#allocation2 + $0xf8] sm:$0xf] %v137_v48  ;;  %1042 = vmatpush.msrb.mxu2 %v853_v55  ;;  %v854_v19 = vld [vmem:[#allocation2 + $0x20] sm:$0xff] }
 0x143   :  { %146 = vst [vmem:[#allocation2 + $0x100] sm:$0xf] %v138_v9  ;;  %1062 = vmatpush.msrb.mxu3 %v854_v19  ;;  %v851_v23 = vld [vmem:[#allocation2 + $0x18] sm:$0xff]  ;;  %v96_v0 = vpop.permute.xlu0 %95 }
 0x144   :  { %248 = vst [vmem:[#allocation2 + $0x120] sm:$0xf0] %v232_v14  ;;  %1002 = vmatpush.msrb.mxu0 %v851_v23  ;;  %v108_v12 = vsel %vm105_vm2, %v96_v0, %v4203_v25  ;;  %v109_v59 = vsel %vm105_vm2, %v4185_v27, %v96_v0  ;;  %v2290_v23 = vld.sshfl [vmem:[#allocation1 + $0x28] sm:$0xff pattern:$0x75316420] }
 0x145   :  { %6061 = vst [vmem:[#allocation18_spill] sm:$0xff] %v4437_v63  ;;  %v2221_v10 = vpop.permute.xlu1 %2220  ;;  %v135_v46 = vmul.f32 %v4437_v63, %v109_v59  ;;  %v136_v48 = vmul.f32 %v4440_v53, %v108_v12 }
 0x146   :  { %6062 = vst [vmem:[#allocation5_spill] sm:$0xff] %v4440_v53  ;;  %1733 = vrot.lane.b32.xlu0 %v6063_v2, %s3290_s23  ;;  %v2234_v38 = vsel %vm186_vm8, %v4289_v6, %v2221_v10  ;;  %v2233_v43 = vsel %vm186_vm8, %v2221_v10, %v4434_v42 }
 0x147   :  { %249 = vst [vmem:[#allocation2 + $0x38] sm:$0xf0] %v233_v18  ;;  %2163 = vrot.lane.b32.xlu1 %v4162_v40, %s3290_s23  ;;  %v2240_v40 = vmul.f32 %v2234_v38, %v3931_v3  ;;  %v2241_v9 = vmul.f32 %v2233_v43, %v3934_v35  ;;  %v4464_v25 = vpop.permute.xlu2 %2309 }
 0x148   :  { %v852_v4 = vld [vmem:[#allocation2 + $0xc8] sm:$0xff]  ;;  %2078 = vrot.lane.b32.xlu2 %v4133_v51, %s3294_s27  ;;  %v2320_v27 = vsel %vm291_vm12, %v4327_v54, %v4464_v25  ;;  %143 = vst [vmem:[#allocation2 + $0x120] sm:$0xf] %v135_v46 }
 0x149   :  { %1022 = vmatpush.msrb.mxu1 %v852_v4  ;;  %v845_v28 = vld [vmem:[#allocation2 + $0xf8] sm:$0xff]  ;;  %v2256_v55 = vrot.slane %v2240_v40, 4  ;;  %v2257_v14 = vrot.slane %v2241_v9, 4  ;;  %v2328_v19 = vmul.f32 %v2320_v27, %v4011_v49  ;;  %144 = vst [vmem:[#allocation2 + $0x38] sm:$0xf] %v136_v48  ;;  %v6065_v48 = vld [vmem:[#allocation44_spill] sm:$0xff] }
 0x14a   :  { %1043 = vmatpush.msrb.mxu2 %v845_v28  ;;  %v846_v18 = vld [vmem:[#allocation2 + $0x100] sm:$0xff] }
 0x14b   :  { %1063 = vmatpush.msrb.mxu3 %v846_v18  ;;  %3228 = vmatmul.msk.f32.vlgmr.msrb.gmra.mxu2 %vm879_vm5, %v4332_v33  ;;  %2272 = vst [vmem:[#allocation2 + $0xd8] sm:$0xf0] %v2256_v55  ;;  %v2306_v4 = vpop.permute.xlu0 %2305  ;;  %v6066_v28 = vld [vmem:[#allocation40_spill] sm:$0xff]  ;;  %v6067_v55 = vld [vmem:[#allocation42_spill] sm:$0xff] }
 0x14c   :  { %3230 = vmatmul.msk.f32.vlgmr.msrb.gmra.mxu3 %vm879_vm5, %v4332_v33  ;;  %2273 = vst [vmem:[#allocation2 + $0xa0] sm:$0xf0] %v2257_v14  ;;  %v2321_v10 = vsel %vm291_vm12, %v2306_v4, %v4327_v54  ;;  %v6064_v54 = vld [vmem:[#allocation48_spill] sm:$0xff]  ;;  %v6232_v20 = vld [vmem:[#allocation18_spill] sm:$0xff] }
 0x14d   :  { %v2071_v51 = vpop.permute.xlu1 %2070  ;;  %2336 = vst [vmem:[#allocation2 + $0x40] sm:$0xf] %v2328_v19  ;;  %v2327_v38 = vmul.f32 %v2321_v10, %v3976_v62 }
 0x14e   :  { %2076 = vrot.lane.b32.xlu0 %v4124_v15, %s3294_s27  ;;  %v2084_v2 = vsel %vm508_vm13, %v4363_v41, %v2071_v51 }
 0x14f   :  { %2311 = vrot.lane.b32.xlu1 %v2290_v23, %s3292_s25  ;;  %v2090_v0 = vmul.f32 %v2084_v2, %v3699_v30  ;;  %v843_v15 = vld [vmem:[#allocation2 + $0x120] sm:$0xff]  ;;  %2335 = vst [vmem:[#allocation2 + $0x30] sm:$0xf] %v2327_v38  ;;  %v1951_v43 = vpop.permute.xlu2 %1950 }
 0x150   :  { %2224 = vrot.lane.b32.xlu2 %v3965_v7, %s3291_s24  ;;  %1003 = vmatpush.msrb.mxu0 %v843_v15  ;;  %v844_v59 = vld [vmem:[#allocation2 + $0x38] sm:$0xff]  ;;  %v6068_v15 = vld [vmem:[#allocation45_spill] sm:$0xff] }
 0x151   :  { %v2106_v12 = vrot.slane %v2090_v0, 4  ;;  %1023 = vmatpush.msrb.mxu1 %v844_v59  ;;  %3224 = vmatmul.msk.f32.vlgmr.msrb.gmra.mxu0 %vm879_vm5, %v4332_v33  ;;  %v6069_v59 = vld [vmem:[#allocation50_spill] sm:$0xff] }
 0x152   :  { %3226 = vmatmul.msk.f32.vlgmr.msrb.gmra.mxu1 %vm879_vm5, %v4332_v33 }
 0x153   :  { %2122 = vst [vmem:[#allocation2 + $0x8] sm:$0xf0] %v2106_v12  ;;  %v2156_v7 = vpop.permute.xlu0 %2155 }
 0x154   :  { %v2171_v46 = vsel %vm105_vm2, %v2156_v7, %v4399_v17 }
 0x155   :  { %v4496_v40 = vpop.permute.xlu1 %2214  ;;  %v2177_v9 = vmul.f32 %v2171_v46, %v6065_v48 }
 0x156   :  { %2165 = vrot.lane.b32.xlu0 %v4164_v16, %s3290_s23 }
 0x157   :  { %2074 = vrot.lane.b32.xlu1 %v6064_v54, %s3294_s27  ;;  %2185 = vst [vmem:[#allocation2 + $0xd8] sm:$0xf] %v2177_v9  ;;  %v4504_v33 = vpop.permute.xlu2 %2072 }
 0x158   :  { %1958 = vrot.lane.b32.xlu2 %v4045_v60, %s3293_s26  ;;  %v2083_v16 = vsel %vm508_vm13, %v2071_v51, %v4504_v33 }
 0x159   :  { %v2091_v27 = vmul.f32 %v2083_v16, %v6066_v28 }
 0x15b   :  { %v2107_v14 = vrot.slane %v2091_v27, 4  ;;  %v2217_v18 = vpop.permute.xlu0 %2216  ;;  %v6070_v27 = vld [vmem:[#allocation59_spill] sm:$0xff] }
 0x15c   :  { %v2235_v19 = vsel %vm186_vm8, %v2217_v18, %v4289_v6  ;;  %v2236_v60 = vsel %vm186_vm8, %v4496_v40, %v2217_v18 }
 0x15d   :  { %v4518_v23 = vpop.permute.xlu1 %2301  ;;  %2123 = vst [vmem:[#allocation2 + $0x98] sm:$0xf0] %v2107_v14  ;;  %v2238_v51 = vmul.f32 %v2236_v60, %v3979_v1  ;;  %v2239_v2 = vmul.f32 %v2235_v19, %v3982_v52  ;;  %v6072_v19 = vld [vmem:[#allocation39_spill] sm:$0xff] }
 0x15e   :  { %1956 = vrot.lane.b32.xlu0 %v6067_v55, %s3293_s26  ;;  %v6071_v55 = vld [vmem:[#allocation60_spill] sm:$0xff] }
 0x15f   :  { %v2254_v10 = vrot.slane %v2238_v51, 4  ;;  %v2255_v0 = vrot.slane %v2239_v2, 4  ;;  %v4522_v38 = vpop.permute.xlu2 %2159  ;;  %v6073_v2 = vld [vmem:[#allocation29_spill] sm:$0xff] }
 0x160   :  { %v2170_v6 = vsel %vm105_vm2, %v4399_v17, %v4522_v38 }
 0x161   :  { %2270 = vst [vmem:[#allocation2 + $0xc0] sm:$0xf0] %v2254_v10  ;;  %v2178_v12 = vmul.f32 %v2170_v6, %v6068_v15 }
 0x162   :  { %2271 = vst [vmem:[#allocation2 + $0x118] sm:$0xf0] %v2255_v0 }
 0x163   :  { %2186 = vst [vmem:[#allocation2 + $0xa0] sm:$0xf] %v2178_v12  ;;  %v2304_v54 = vpop.permute.xlu0 %2303 }
 0x164   :  { %v2322_v46 = vsel %vm291_vm12, %v2304_v54, %v2306_v4  ;;  %v2323_v9 = vsel %vm291_vm12, %v4518_v23, %v2304_v54 }
 0x165   :  { %v4536_v16 = vpop.permute.xlu1 %2064  ;;  %v2325_v17 = vmul.f32 %v2323_v9, %v6070_v27  ;;  %v2326_v14 = vmul.f32 %v2322_v46, %v6071_v55 }
 0x166   :  { %2161 = vrot.lane.b32.xlu0 %v6069_v59, %s3290_s23  ;;  %v6075_v59 = vld [vmem:[#allocation34_spill] sm:$0xff] }
 0x167   :  { %v4540_v18 = vpop.permute.xlu2 %1885  ;;  %2333 = vst [vmem:[#allocation2 + $0x58] sm:$0xf] %v2325_v17 }
 0x168   :  { %2334 = vst [vmem:[#allocation2 + $0x78] sm:$0xf] %v2326_v14 }
 0x16b   :  { %v1949_v60 = vpop.permute.xlu0 %1948 }
 0x16c   :  { %v1967_v4 = vsel %vm372_vm10, %v1949_v60, %v1951_v43 }
 0x16d   :  { %v4546_v51 = vpop.permute.xlu1 %2151  ;;  %v1972_v10 = vmul.f32 %v1967_v4, %v6073_v2  ;;  %v6076_v4 = vld [vmem:[#allocation37_spill] sm:$0xff] }
 0x16e   :  { %1893 = vrot.lane.b32.xlu0 %v6072_v19, %s3292_s25 }
 0x16f   :  { %v1988_v6 = vrot.slane %v1972_v10, 4 }
 0x171   :  { %v4549_v0 = vpop.permute.xlu2 %1952  ;;  %2004 = vst [vmem:[#allocation2 + $0x138] sm:$0xf0] %v1988_v6 }
 0x172   :  { %6074 = vst [vmem:[#allocation10_spill] sm:$0xff] %v4549_v0  ;;  %v1966_v12 = vsel %vm372_vm10, %v1951_v43, %v4549_v0 }
 0x173   :  { %v1973_v54 = vmul.f32 %v1966_v12, %v6075_v59  ;;  %v2067_v9 = vpop.permute.xlu0 %2066  ;;  %v6083_v59 = vld [vmem:[#allocation20_spill] sm:$0xff] }
 0x174   :  { %v2085_v17 = vsel %vm508_vm13, %v2067_v9, %v4363_v41  ;;  %v2086_v14 = vsel %vm508_vm13, %v4536_v16, %v2067_v9  ;;  %v6078_v9 = vld [vmem:[#allocation46_spill] sm:$0xff] }
 0x175   :  { %v1989_v46 = vrot.slane %v1973_v54, 4  ;;  %v1799_v19 = vpop.permute.xlu1 %1798  ;;  %v2088_v10 = vmul.f32 %v2086_v14, %v6076_v4  ;;  %v2089_v53 = vmul.f32 %v2085_v17, %v6077_v5  ;;  %v6079_v14 = vld [vmem:[#allocation43_spill] sm:$0xff] }
 0x177   :  { %2005 = vst [vmem:[#allocation2 + $0xf0] sm:$0xf0] %v1989_v46  ;;  %v2104_v13 = vrot.slane %v2088_v10, 4  ;;  %v2105_v12 = vrot.slane %v2089_v53, 4  ;;  %v6080_v53 = vld [vmem:[#allocation24_spill] sm:$0xff] }
 0x179   :  { %v1738_v43 = vpop.permute.xlu2 %1737  ;;  %2120 = vst [vmem:[#allocation2 + $0x128] sm:$0xf0] %v2104_v13 }
 0x17a   :  { %2121 = vst [vmem:[#allocation2 + $0x110] sm:$0xf0] %v2105_v12 }
 0x17b   :  { %v2154_v6 = vpop.permute.xlu0 %2153 }
 0x17c   :  { %v2172_v54 = vsel %vm105_vm2, %v2154_v6, %v2156_v7  ;;  %v2173_v41 = vsel %vm105_vm2, %v4546_v51, %v2154_v6 }
 0x17d   :  { %v4568_v46 = vpop.permute.xlu1 %1887  ;;  %v2175_v8 = vmul.f32 %v2173_v41, %v6078_v9  ;;  %v2176_v11 = vmul.f32 %v2172_v54, %v6079_v14  ;;  %v6081_v41 = vld [vmem:[#allocation19_spill] sm:$0xff] }
 0x17e   :  { %v1904_v13 = vsel %vm291_vm12, %v4540_v18, %v4568_v46 }
 0x17f   :  { %v1909_v17 = vmul.f32 %v1904_v13, %v6080_v53  ;;  %2183 = vst [vmem:[#allocation2 + $0xc0] sm:$0xf] %v2175_v8  ;;  %v6085_v53 = vld [vmem:[#allocation61_spill] sm:$0xff] }
 0x180   :  { %2184 = vst [vmem:[#allocation2 + $0x118] sm:$0xf] %v2176_v11 }
 0x181   :  { %v4577_v10 = vpop.permute.xlu2 %1810  ;;  %1917 = vst [vmem:[#allocation2 + $0x138] sm:$0xf] %v1909_v17  ;;  %v6082_v17 = vld [vmem:[#allocation32_spill] sm:$0xff] }
 0x183   :  { %v1801_v7 = vpop.permute.xlu0 %1800 }
 0x184   :  { %v1817_v12 = vsel %vm186_vm8, %v1799_v19, %v1801_v7 }
 0x185   :  { %v4581_v6 = vpop.permute.xlu1 %1960  ;;  %v1822_v54 = vmul.f32 %v1817_v12, %v6081_v41 }
 0x187   :  { %v1838_v47 = vrot.slane %v1822_v54, 4  ;;  %v6084_v54 = vld [vmem:[#allocation65_spill] sm:$0xff] }
 0x189   :  { %1854 = vst [vmem:[#allocation2 + $0x10] sm:$0xf0] %v1838_v47 }
 0x18a   :  { %v4584_v32 = vpop.permute.xlu2 %1897 }
 0x18d   :  { %v1947_v45 = vpop.permute.xlu0 %1946 }
 0x18e   :  { %v1968_v13 = vsel %vm372_vm10, %v1947_v45, %v1949_v60  ;;  %v1969_v8 = vsel %vm372_vm10, %v4581_v6, %v1947_v45  ;;  %v1797_v11 = vpop.permute.xlu1 %1796 }
 0x18f   :  { %v1970_v0 = vmul.f32 %v1969_v8, %v6082_v17  ;;  %v1971_v28 = vmul.f32 %v1968_v13, %v6083_v59  ;;  %v1818_v12 = vsel %vm186_vm8, %v1797_v11, %v1799_v19  ;;  %v1819_v47 = vsel %vm186_vm8, %v4577_v10, %v1797_v11 }
 0x190   :  { %v1820_v41 = vmul.f32 %v1819_v47, %v6084_v54  ;;  %v1821_v60 = vmul.f32 %v1818_v12, %v6085_v53  ;;  %v6087_v12 = vld [vmem:[#allocation67_spill] sm:$0xff]  ;;  %v6088_v47 = vld [vmem:[#allocation64_spill] sm:$0xff] }
 0x191   :  { %v1986_v63 = vrot.slane %v1970_v0, 4  ;;  %v1987_v45 = vrot.slane %v1971_v28, 4  ;;  %v6086_v28 = vld [vmem:[#allocation62_spill] sm:$0xff] }
 0x192   :  { %v4600_v2 = vpop.permute.xlu2 %2313  ;;  %v1836_v30 = vrot.slane %v1820_v41, 4  ;;  %v1837_v5 = vrot.slane %v1821_v60, 4 }
 0x193   :  { %2002 = vst [vmem:[#allocation2 + $0x80] sm:$0xf0] %v1986_v63 }
 0x194   :  { %2003 = vst [vmem:[#allocation2 + $0x108] sm:$0xf0] %v1987_v45  ;;  %v6089_v45 = vld [vmem:[#allocation14_spill] sm:$0xff] }
 0x195   :  { %1852 = vst [vmem:[#allocation2 + $0xb0] sm:$0xf0] %v1836_v30  ;;  %v1736_v13 = vpop.permute.xlu0 %1735 }
 0x196   :  { %1853 = vst [vmem:[#allocation2 + $0xd0] sm:$0xf0] %v1837_v5  ;;  %v1884_v19 = vpop.permute.xlu1 %1883  ;;  %v1754_v8 = vsel %vm105_vm2, %v1736_v13, %v1738_v43 }
 0x197   :  { %v1905_v11 = vsel %vm291_vm12, %v1884_v19, %v4540_v18  ;;  %v1906_v0 = vsel %vm291_vm12, %v4584_v32, %v1884_v19  ;;  %v1759_v41 = vmul.f32 %v1754_v8, %v6086_v28 }
 0x198   :  { %v1907_v63 = vmul.f32 %v1906_v0, %v6087_v12  ;;  %v1908_v30 = vmul.f32 %v1905_v11, %v6088_v47  ;;  %v6090_v11 = vld [vmem:[#allocation47_spill] sm:$0xff] }
 0x199   :  { %1767 = vst [vmem:[#allocation2 + $0x10] sm:$0xf] %v1759_v41 }
 0x19a   :  { %v4613_v5 = vpop.permute.xlu2 %1739  ;;  %1915 = vst [vmem:[#allocation2 + $0x80] sm:$0xf] %v1907_v63 }
 0x19b   :  { %v1753_v60 = vsel %vm105_vm2, %v1738_v43, %v4613_v5  ;;  %1916 = vst [vmem:[#allocation2 + $0x108] sm:$0xf] %v1908_v30 }
 0x19c   :  { %v1760_v53 = vmul.f32 %v1753_v60, %v6089_v45 }
 0x19e   :  { %1768 = vst [vmem:[#allocation2 + $0x48] sm:$0xf] %v1760_v53 }
 0x1a0   :  { %v4619_v18 = vpop.permute.xlu0 %1802 }
 0x1a1   :  { %v2227_v19 = vpop.permute.xlu1 %2226  ;;  %v1816_v8 = vsel %vm186_vm8, %v1801_v7, %v4619_v18 }
 0x1a2   :  { %v1823_v0 = vmul.f32 %v1816_v8, %v6090_v11  ;;  %v2079_v54 = vpop.permute.xlu2 %2078 }
 0x1a3   :  { %v2087_v43 = vsel %vm508_vm13, %v2079_v54, %v4536_v16 }
 0x1a4   :  { %v1839_v41 = vrot.slane %v1823_v0, 4  ;;  %v2095_v60 = vmul.f32 %v2087_v43, %v4217_v22  ;;  %v6092_v0 = vld [vmem:[#allocation49_spill] sm:$0xff] }
 0x1a6   :  { %1855 = vst [vmem:[#allocation2 + $0x48] sm:$0xf0] %v1839_v41  ;;  %v2111_v63 = vrot.slane %v2095_v60, 4  ;;  %v6093_v41 = vld [vmem:[#allocation70_spill] sm:$0xff] }
 0x1a8   :  { %2127 = vst [vmem:[#allocation2 + $0x88] sm:$0xf0] %v2111_v63  ;;  %v4629_v53 = vpop.permute.xlu0 %1889  ;;  %v6094_v63 = vld [vmem:[#allocation69_spill] sm:$0xff] }
 0x1a9   :  { %6091 = vst [vmem:[#allocation48_spill] sm:$0xff] %v4629_v53  ;;  %v2316_v30 = vpop.permute.xlu1 %2315  ;;  %v1903_v7 = vsel %vm291_vm12, %v4568_v46, %v4629_v53 }
 0x1aa   :  { %v2317_v8 = vsel %vm291_vm12, %v4600_v2, %v2316_v30  ;;  %v2324_v16 = vsel %vm291_vm12, %v2316_v30, %v4518_v23  ;;  %v1910_v43 = vmul.f32 %v1903_v7, %v6092_v0  ;;  %v2225_v47 = vpop.permute.xlu2 %2224 }
 0x1ab   :  { %v2331_v60 = vmul.f32 %v2317_v8, %v6093_v41  ;;  %v2332_v12 = vmul.f32 %v2324_v16, %v6094_v63  ;;  %v2231_v59 = vsel %vm186_vm8, %v2225_v47, %v2227_v19  ;;  %v2232_v46 = vsel %vm186_vm8, %v4434_v42, %v2225_v47  ;;  %v6095_v47 = vld [vmem:[#allocation66_spill] sm:$0xff] }
 0x1ac   :  { %1918 = vst [vmem:[#allocation2 + $0xf0] sm:$0xf] %v1910_v43  ;;  %v2242_v53 = vmul.f32 %v2232_v46, %v4262_v50  ;;  %v2243_v17 = vmul.f32 %v2231_v59, %v4265_v61  ;;  %v6096_v46 = vld [vmem:[#allocation53_spill] sm:$0xff] }
 0x1ad   :  { %2339 = vst [vmem:[#allocation2 + $0xb8] sm:$0xf] %v2331_v60 }
 0x1ae   :  { %2340 = vst [vmem:[#allocation2 + $0x60] sm:$0xf] %v2332_v12  ;;  %v2258_v23 = vrot.slane %v2242_v53, 4  ;;  %v2259_v30 = vrot.slane %v2243_v17, 4 }
 0x1b0   :  { %2274 = vst [vmem:[#allocation2 + $0x68] sm:$0xf0] %v2258_v23  ;;  %v2229_v7 = vpop.permute.xlu0 %2228 }
 0x1b1   :  { %v4651_v8 = vpop.permute.xlu1 %1747  ;;  %2275 = vst [vmem:[#allocation2 + $0x130] sm:$0xf0] %v2259_v30  ;;  %v2230_v16 = vsel %vm186_vm8, %v2227_v19, %v2229_v7  ;;  %v2237_v42 = vsel %vm186_vm8, %v2229_v7, %v4496_v40  ;;  %v6097_v30 = vld [vmem:[#allocation31_spill] sm:$0xff]  ;;  %v6098_v7 = vld [vmem:[#allocation57_spill] sm:$0xff] }
 0x1b2   :  { %v2244_v43 = vmul.f32 %v2230_v16, %v6095_v47  ;;  %v2245_v59 = vmul.f32 %v2237_v42, %v6096_v46  ;;  %v1959_v42 = vpop.permute.xlu2 %1958 }
 0x1b4   :  { %v2260_v60 = vrot.slane %v2244_v43, 4  ;;  %v2261_v12 = vrot.slane %v2245_v59, 4  ;;  %v1962_v43 = vsel %vm372_vm10, %v1959_v42, %v4581_v6 }
 0x1b5   :  { %v1977_v59 = vmul.f32 %v1962_v43, %v4301_v34 }
 0x1b6   :  { %2276 = vst [vmem:[#allocation2 + $0x50] sm:$0xf0] %v2260_v60 }
 0x1b7   :  { %2277 = vst [vmem:[#allocation2 + $0xe8] sm:$0xf0] %v2261_v12  ;;  %v1993_v6 = vrot.slane %v1977_v59, 4 }
 0x1b8   :  { %v1734_v17 = vpop.permute.xlu0 %1733 }
 0x1b9   :  { %v4660_v53 = vpop.permute.xlu1 %2163  ;;  %v1755_v23 = vsel %vm105_vm2, %v1734_v17, %v1736_v13  ;;  %v1756_v19 = vsel %vm105_vm2, %v4651_v8, %v1734_v17  ;;  %2009 = vst [vmem:[#allocation2 + $0x20] sm:$0xf0] %v1993_v6 }
 0x1ba   :  { %v1757_v40 = vmul.f32 %v1756_v19, %v6097_v30  ;;  %v1758_v16 = vmul.f32 %v1755_v23, %v6098_v7  ;;  %v4681_v19 = vpop.f32.mrf.mxu0 }
 0x1bc   :  { %1765 = vst [vmem:[#allocation2 + $0xb0] sm:$0xf] %v1757_v40  ;;  %v4683_v40 = vpop.f32.mrf.mxu1 }
 0x1bd   :  { %1766 = vst [vmem:[#allocation2 + $0xd0] sm:$0xf] %v1758_v16  ;;  %v1068_v59 = vadd.f32 %v4683_v40, %v4681_v19 }
 0x1c0   :  { %v2077_v60 = vpop.permute.xlu0 %2076 }
 0x1c1   :  { %v2312_v12 = vpop.permute.xlu1 %2311  ;;  %v2080_v13 = vsel %vm508_vm13, %v2077_v60, %v2079_v54 }
 0x1c2   :  { %v2318_v17 = vsel %vm291_vm12, %v2312_v12, %v4600_v2  ;;  %v2319_v23 = vsel %vm291_vm12, %v4464_v25, %v2312_v12  ;;  %v2094_v16 = vmul.f32 %v2080_v13, %v4214_v58  ;;  %v1077_v2 = vmul.f32 %v4681_v19, %v4681_v19  ;;  %v4692_v12 = vpop.f32.mrf.mxu2 }
 0x1c3   :  { %v2329_v43 = vmul.f32 %v2319_v23, %v4256_v26  ;;  %v2330_v34 = vmul.f32 %v2318_v17, %v4259_v31  ;;  %v1078_v25 = vmul.f32 %v4683_v40, %v4683_v40  ;;  %v1079_v17 = vmul.f32 %v4692_v12, %v4692_v12  ;;  %v4713_v26 = vpop.f32.mrf.mxu3 }
 0x1c4   :  { %v2110_v54 = vrot.slane %v2094_v16, 4  ;;  %v1069_v7 = vadd.f32 %v1068_v59, %v4692_v12 }
 0x1c5   :  { %2337 = vst [vmem:[#allocation2 + $0x28] sm:$0xf] %v2329_v43  ;;  %v1085_v61 = vadd.f32 %v1078_v25, %v1077_v2  ;;  %v6099_v2 = vld [vmem:[#allocation63_spill] sm:$0xff] }
 0x1c6   :  { %2338 = vst [vmem:[#allocation2] sm:$0xf] %v2330_v34 }
 0x1c7   :  { %2126 = vst [vmem:[#allocation2 + $0xe0] sm:$0xf0] %v2110_v54 }
 0x1c8   :  { %v2166_v13 = vpop.permute.xlu0 %2165 }
 0x1c9   :  { %v2075_v23 = vpop.permute.xlu1 %2074  ;;  %v2167_v6 = vsel %vm105_vm2, %v4660_v53, %v2166_v13  ;;  %v2174_v34 = vsel %vm105_vm2, %v2166_v13, %v4546_v51 }
 0x1ca   :  { %v2081_v16 = vsel %vm508_vm13, %v2075_v23, %v2077_v60  ;;  %v2082_v43 = vsel %vm508_vm13, %v4504_v33, %v2075_v23  ;;  %v2181_v54 = vmul.f32 %v2167_v6, %v4211_v21  ;;  %v2182_v25 = vmul.f32 %v2174_v34, %v6099_v2 }
 0x1cb   :  { %v2092_v50 = vmul.f32 %v2082_v43, %v4292_v56  ;;  %v2093_v31 = vmul.f32 %v2081_v16, %v4295_v39  ;;  %v1086_v60 = vadd.f32 %v1085_v61, %v1079_v17  ;;  %v1080_v33 = vmul.f32 %v4713_v26, %v4713_v26 }
 0x1cc   :  { %2189 = vst [vmem:[#allocation2 + $0x50] sm:$0xf] %v2181_v54  ;;  %v1070_v23 = vadd.f32 %v1069_v7, %v4713_v26 }
 0x1cd   :  { %v2108_v51 = vrot.slane %v2092_v50, 4  ;;  %v2109_v13 = vrot.slane %v2093_v31, 4  ;;  %2190 = vst [vmem:[#allocation2 + $0xe8] sm:$0xf] %v2182_v25  ;;  %v1087_v43 = vadd.f32 %v1086_v60, %v1080_v33 }
 0x1ce   :  { %v4719_v6 = vpop.f32.mrf.mxu2  ;;  %v1005_v16 = vpop.f32.mrf.mxu0 }
 0x1cf   :  { %2124 = vst [vmem:[#allocation2 + $0xa8] sm:$0xf0] %v2108_v51  ;;  %v1071_v39 = vadd.f32 %v1070_v23, %v1005_v16  ;;  %v1081_v59 = vmul.f32 %v1005_v16, %v1005_v16  ;;  %v4723_v54 = vpop.f32.mrf.mxu1  ;;  %v4730_v61 = vpop.f32.mrf.mxu3  ;;  %v1083_v51 = vmul.f32 %v4719_v6, %v4719_v6 }
 0x1d0   :  { %2125 = vst [vmem:[#allocation2 + $0x90] sm:$0xf0] %v2109_v13  ;;  %v4721_v34 = vpop.permute.xlu0 %1956  ;;  %v1082_v50 = vmul.f32 %v4723_v54, %v4723_v54  ;;  %v1084_v33 = vmul.f32 %v4730_v61, %v4730_v61 }
 0x1d1   :  { %v1963_v31 = vsel %vm372_vm10, %v4721_v34, %v1959_v42  ;;  %v1088_v17 = vadd.f32 %v1087_v43, %v1081_v59  ;;  %v1072_v25 = vadd.f32 %v1071_v39, %v4723_v54 }
 0x1d2   :  { %v1976_v7 = vmul.f32 %v1963_v31, %v4298_v37  ;;  %v6100_v31 = vld [vmem:[#allocation68_spill] sm:$0xff] }
 0x1d3   :  { %v1073_v60 = vadd.f32 %v1072_v25, %v4719_v6  ;;  %v1089_v42 = vadd.f32 %v1088_v17, %v1082_v50  ;;  %v6101_v25 = vld [vmem:[#allocation8_spill] sm:$0xff]  ;;  %v6102_v50 = vld [vmem:[#allocation22_spill] sm:$0xff] }
 0x1d4   :  { %v1992_v13 = vrot.slane %v1976_v7, 4  ;;  %v6103_v17 = vld [vmem:[#allocation36_spill] sm:$0xff] }
 0x1d5   :  { %v1074_v23 = vadd.f32 %v1073_v60, %v4730_v61  ;;  %v1090_v56 = vadd.f32 %v1089_v42, %v1083_v51 }
 0x1d6   :  { %2008 = vst [vmem:[#allocation2 + $0x70] sm:$0xf0] %v1992_v13 }
 0x1d7   :  { %1075 = vadd.xlane.f32.xlu1 %v1074_v23  ;;  %v1091_v59 = vadd.f32 %v1090_v56, %v1084_v33 }
 0x1d8   :  { %v2162_v30 = vpop.permute.xlu0 %2161 }
 0x1d9   :  { %v2168_v43 = vsel %vm105_vm2, %v2162_v30, %v4660_v53  ;;  %v2169_v39 = vsel %vm105_vm2, %v4522_v38, %v2162_v30  ;;  %1092 = vadd.xlane.f32.xlu2 %v1091_v59 }
 0x1da   :  { %v2179_v7 = vmul.f32 %v2169_v39, %v6100_v31  ;;  %v2180_v37 = vmul.f32 %v2168_v43, %v6101_v25 }
 0x1dc   :  { %2187 = vst [vmem:[#allocation2 + $0x68] sm:$0xf] %v2179_v7 }
 0x1dd   :  { %2188 = vst [vmem:[#allocation2 + $0x130] sm:$0xf] %v2180_v37 }
 0x1f0   :  { %1808 = vrot.lane.b32.xlu1 %v6102_v50, %s3291_s24 }
 0x1f1   :  { %1806 = vrot.lane.b32.xlu2 %v6103_v17, %s3291_s24 }
 0x24a   :  { %v1076_v53 = vpop.xlane.xlu1 %1075 }
 0x24b   :  { %v4752_v51 = vmul.f32 0.0009765625, %v1076_v53 }
 0x24c   :  { %v1093_v13 = vpop.xlane.xlu2 %1092 }
 0x24d   :  { %v1095_v38 = vmul.f32 0.0009765625, %v1093_v13  ;;  %v1096_v56 = vmul.f32 %v4752_v51, %v4752_v51  ;;  %v1103_v53 = vsub.f32 %v1005_v16, %v4752_v51  ;;  %v1101_v13 = vsub.f32 %v4692_v12, %v4752_v51 }
 0x24f   :  { %v1097_v30 = vsub.f32 %v1095_v38, %v1096_v56  ;;  %v1100_v38 = vsub.f32 %v4683_v40, %v4752_v51  ;;  %v1102_v40 = vsub.f32 %v4713_v26, %v4752_v51  ;;  %v1105_v26 = vsub.f32 %v4719_v6, %v4752_v51 }
 0x251   :  { %v1098_v60 = vmax.f32 %v1097_v30, 0.0 }
 0x253   :  { %v1107_v33 = vadd.f32 1e-05, %v1098_v60 }
 0x255   :  { %3281 = vrsqrt.f32 %v1107_v33  ;;  %vm1114_vm9 = vweird.f32 %v1107_v33 }
 0x25b   :  { %v3282_v42 = vpop.eup %3281 }
 0x25c   :  { %v1109_v37 = vmul.f32 %v3282_v42, %v1107_v33  ;;  %vm1115_vm7 = vweird.f32 %v3282_v42 }
 0x25d   :  { %vm1116_vm11 = vmor %vm1114_vm9, %vm1115_vm7 }
 0x25e   :  { %v1110_v23 = vmul.f32 %v3282_v42, %v1109_v37 }
 0x260   :  { %v1111_v43 = vmul.f32 0.5, %v1110_v23 }
 0x262   :  { %v1112_v39 = vsub.f32 1.5, %v1111_v43  ;;  %v1809_v59 = vpop.permute.xlu1 %1808 }
 0x263   :  { %v1812_v7 = vsel %vm186_vm8, %v1809_v59, %v4577_v10 }
 0x264   :  { %v1113_v50 = vmul.f32 %v3282_v42, %v1112_v39  ;;  %v1827_v17 = vmul.f32 %v1812_v7, %v4341_v24  ;;  %v1099_v7 = vsub.f32 %v4681_v19, %v4752_v51  ;;  %v6116_v24 = vld [vmem:[#allocation28_spill] sm:$0xff] }
 0x266   :  { %v1117_v56 = vsel %vm1116_vm11, %v3282_v42, %v1113_v50  ;;  %v1843_v30 = vrot.slane %v1827_v17, 4  ;;  %v1106_v17 = vsub.f32 %v4730_v61, %v4752_v51  ;;  %v1104_v61 = vsub.f32 %v4723_v54, %v4752_v51  ;;  %v6106_v54 = vld [vmem:[#allocation26_spill] sm:$0xff]  ;;  %v6107_v51 = vld [vmem:[#allocation17_spill] sm:$0xff] }
 0x267   :  { %v1122_v60 = vmul.f32 %v1117_v56, %v1103_v53  ;;  %v1120_v37 = vmul.f32 %v1117_v56, %v1101_v13  ;;  %v1119_v23 = vmul.f32 %v1117_v56, %v1100_v38  ;;  %v1121_v12 = vmul.f32 %v1117_v56, %v1102_v40  ;;  %v4831_v13 = vpop.permute.xlu2 %1806  ;;  %v6109_v40 = vld [vmem:[#allocation25_spill] sm:$0xff] }
 0x268   :  { %1859 = vst [vmem:[#allocation2 + $0x100] sm:$0xf0] %v1843_v30  ;;  %v1124_v42 = vmul.f32 %v1117_v56, %v1105_v26  ;;  %v1118_v50 = vmul.f32 %v1117_v56, %v1099_v7  ;;  %v1125_v53 = vmul.f32 %v1117_v56, %v1106_v17  ;;  %v1123_v38 = vmul.f32 %v1117_v56, %v1104_v61  ;;  %v6108_v56 = vld [vmem:[#allocation41_spill] sm:$0xff] }
 0x269   :  { %v4765_v10 = vmax.f32 %v1122_v60, 0.0  ;;  %v4767_v33 = vmax.f32 %v1120_v37, 0.0  ;;  %v4769_v43 = vmax.f32 %v1119_v23, 0.0  ;;  %v4779_v16 = vmax.f32 %v1121_v12, 0.0  ;;  %v6110_v26 = vld [vmem:[#allocation33_spill] sm:$0xff] }
 0x26a   :  { %v4795_v39 = vmax.f32 %v1124_v42, 0.0  ;;  %v4805_v6 = vmax.f32 %v1118_v50, 0.0  ;;  %v4815_v19 = vmax.f32 %v1125_v53, 0.0  ;;  %v1813_v30 = vsel %vm186_vm8, %v4831_v13, %v1809_v59  ;;  %v4881_v42 = vpop.permute.xlu0 %1893 }
 0x26b   :  { %6104 = vst [vmem:[#allocation42_spill] sm:$0xff] %v4765_v10  ;;  %1222 = vrot.lane.b32.xlu1 %v4765_v10, %s3292_s25  ;;  %1218 = vrot.lane.b32.xlu0 %v4767_v33, %s3292_s25  ;;  %v1826_v60 = vmul.f32 %v1813_v30, %v4344_v29  ;;  %v4837_v23 = vmax.f32 %v1123_v38, 0.0 }
 0x26c   :  { %1216 = vrot.lane.b32.xlu2 %v4769_v43, %s3292_s25  ;;  %6111 = vst [vmem:[#allocation39_spill] sm:$0xff] %v4881_v42 }
 0x26d   :  { %v1842_v37 = vrot.slane %v1826_v60, 4  ;;  %6105 = vst [vmem:[#allocation50_spill] sm:$0xff] %v4837_v23 }
 0x26f   :  { %1858 = vst [vmem:[#allocation2 + $0xf8] sm:$0xf0] %v1842_v37 }
 0x273   :  { %1182 = vrot.lane.b32.xlu1 %v4765_v10, %s3291_s24  ;;  %1220 = vrot.lane.b32.xlu0 %v4779_v16, %s3292_s25 }
 0x274   :  { %1176 = vrot.lane.b32.xlu2 %v4769_v43, %s3291_s24 }
 0x27b   :  { %1142 = vrot.lane.b32.xlu1 %v4765_v10, %s3290_s23  ;;  %1178 = vrot.lane.b32.xlu0 %v4767_v33, %s3291_s24 }
 0x27c   :  { %1136 = vrot.lane.b32.xlu2 %v4769_v43, %s3290_s23 }
 0x283   :  { %1226 = vrot.lane.b32.xlu1 %v4795_v39, %s3292_s25  ;;  %1180 = vrot.lane.b32.xlu0 %v4779_v16, %s3291_s24 }
 0x284   :  { %1308 = vrot.lane.b32.xlu2 %v4779_v16, %s3294_s27 }
 0x28b   :  { %1304 = vrot.lane.b32.xlu1 %v4769_v43, %s3294_s27  ;;  %1214 = vrot.lane.b32.xlu0 %v4805_v6, %s3292_s25 }
 0x28c   :  { %1302 = vrot.lane.b32.xlu2 %v4805_v6, %s3294_s27 }
 0x293   :  { %1188 = vrot.lane.b32.xlu1 %v4815_v19, %s3291_s24  ;;  %1138 = vrot.lane.b32.xlu0 %v4767_v33, %s3290_s23 }
 0x294   :  { %1186 = vrot.lane.b32.xlu2 %v4795_v39, %s3291_s24 }
 0x29b   :  { %1258 = vrot.lane.b32.xlu1 %v4767_v33, %s3293_s26  ;;  %1140 = vrot.lane.b32.xlu0 %v4779_v16, %s3290_s23 }
 0x29c   :  { %1256 = vrot.lane.b32.xlu2 %v4769_v43, %s3293_s26 }
 0x2a3   :  { %1184 = vrot.lane.b32.xlu1 %v4837_v23, %s3291_s24  ;;  %1174 = vrot.lane.b32.xlu0 %v4805_v6, %s3291_s24 }
 0x2a4   :  { %1148 = vrot.lane.b32.xlu2 %v4815_v19, %s3290_s23 }
 0x2ab   :  { %1268 = vrot.lane.b32.xlu1 %v4815_v19, %s3293_s26  ;;  %1134 = vrot.lane.b32.xlu0 %v4805_v6, %s3290_s23 }
 0x2ac   :  { %1260 = vrot.lane.b32.xlu2 %v4779_v16, %s3293_s26 }
 0x2b3   :  { %1316 = vrot.lane.b32.xlu1 %v4815_v19, %s3294_s27  ;;  %1306 = vrot.lane.b32.xlu0 %v4767_v33, %s3294_s27 }
 0x2b4   :  { %1314 = vrot.lane.b32.xlu2 %v4795_v39, %s3294_s27 }
 0x2bb   :  { %1264 = vrot.lane.b32.xlu1 %v4837_v23, %s3293_s26  ;;  %1228 = vrot.lane.b32.xlu0 %v4815_v19, %s3292_s25 }
 0x2bc   :  { %1895 = vrot.lane.b32.xlu2 %v6106_v54, %s3292_s25 }
 0x2c3   :  { %1262 = vrot.lane.b32.xlu1 %v4765_v10, %s3293_s26  ;;  %1310 = vrot.lane.b32.xlu0 %v4765_v10, %s3294_s27 }
 0x2c4   :  { %1745 = vrot.lane.b32.xlu2 %v6107_v51, %s3290_s23 }
 0x2c6   :  { %v1217_v59 = vpop.permute.xlu2 %1216 }
 0x2cb   :  { %1954 = vrot.lane.b32.xlu1 %v6108_v56, %s3293_s26  ;;  %1224 = vrot.lane.b32.xlu0 %v4837_v23, %s3292_s25 }
 0x2cc   :  { %1741 = vrot.lane.b32.xlu2 %v6109_v40, %s3290_s23 }
 0x2ce   :  { %v4875_v12 = vpop.permute.xlu2 %1176 }
 0x2d3   :  { %1804 = vrot.lane.b32.xlu1 %v6110_v26, %s3291_s24  ;;  %1146 = vrot.lane.b32.xlu0 %v4795_v39, %s3290_s23 }
 0x2d6   :  { %v4883_v7 = vpop.permute.xlu2 %1136 }
 0x2db   :  { %1254 = vrot.lane.b32.xlu0 %v4805_v6, %s3293_s26 }
 0x2dd   :  { %v1219_v50 = vpop.permute.xlu0 %1218  ;;  %v4887_v17 = vpop.permute.xlu1 %1222 }
 0x2de   :  { %6112 = vst [vmem:[#allocation62_spill] sm:$0xff] %v4887_v17  ;;  %v4891_v53 = vsel %vm291_vm12, %v1217_v59, %v1219_v50  ;;  %v4893_v61 = vpop.permute.xlu2 %1308 }
 0x2df   :  { %v1375_v38 = vmul.f32 %v4891_v53, %v6071_v55 }
 0x2e1   :  { %1494 = vmatpush.msra.mxu1 %v1375_v38 }
 0x2e3   :  { %1144 = vrot.lane.b32.xlu0 %v4837_v23, %s3290_s23 }
 0x2e5   :  { %v1221_v30 = vpop.permute.xlu0 %1220  ;;  %v1183_v60 = vpop.permute.xlu1 %1182 }
 0x2e6   :  { %v4902_v37 = vsel %vm291_vm12, %v1221_v30, %v4887_v17  ;;  %v4906_v54 = vsel %vm291_vm12, %v1219_v50, %v1221_v30  ;;  %v4908_v51 = vpop.permute.xlu2 %1302 }
 0x2e7   :  { %6113 = vst [vmem:[#allocation14_spill] sm:$0xff] %v4902_v37  ;;  %v1376_v56 = vmul.f32 %v4906_v54, %v3976_v62  ;;  %v1377_v40 = vmul.f32 %v4902_v37, %v4011_v49 }
 0x2e9   :  { %1514 = vmatpush.msra.mxu2 %v1376_v56  ;;  %1534 = vmatpush.msra.mxu3 %v1377_v40 }
 0x2eb   :  { %1312 = vrot.lane.b32.xlu0 %v4837_v23, %s3294_s27 }
 0x2ed   :  { %v1179_v26 = vpop.permute.xlu0 %1178  ;;  %v4916_v38 = vpop.permute.xlu1 %1142 }
 0x2ee   :  { %6114 = vst [vmem:[#allocation47_spill] sm:$0xff] %v4916_v38  ;;  %v4921_v50 = vsel %vm186_vm8, %v4875_v12, %v1179_v26  ;;  %v4923_v30 = vpop.permute.xlu2 %1186 }
 0x2ef   :  { %v1359_v55 = vmul.f32 %v4921_v50, %v3982_v52 }
 0x2f1   :  { %1495 = vmatpush.msra.mxu1 %v1359_v55 }
 0x2f3   :  { %1266 = vrot.lane.b32.xlu0 %v4795_v39, %s3293_s26 }
 0x2f5   :  { %v1181_v56 = vpop.permute.xlu0 %1180  ;;  %v4929_v40 = vpop.permute.xlu1 %1226 }
 0x2f6   :  { %v4933_v49 = vsel %vm186_vm8, %v1181_v56, %v1183_v60  ;;  %v4937_v62 = vsel %vm186_vm8, %v1179_v26, %v1181_v56  ;;  %v4939_v29 = vpop.permute.xlu2 %1256 }
 0x2f7   :  { %6115 = vst [vmem:[#allocation70_spill] sm:$0xff] %v4933_v49  ;;  %v1360_v52 = vmul.f32 %v4937_v62, %v3931_v3  ;;  %v1361_v55 = vmul.f32 %v4933_v49, %v3934_v35 }
 0x2f9   :  { %1515 = vmatpush.msra.mxu2 %v1360_v52  ;;  %1535 = vmatpush.msra.mxu3 %v1361_v55  ;;  %v6118_v52 = vld [vmem:[#allocation38_spill] sm:$0xff] }
 0x2fb   :  { %1743 = vrot.lane.b32.xlu0 %v6116_v24, %s3290_s23 }
 0x2fd   :  { %v4947_v37 = vpop.permute.xlu0 %1214  ;;  %v1305_v23 = vpop.permute.xlu1 %1304 }
 0x2fe   :  { %v4949_v10 = vpop.permute.xlu2 %1148  ;;  %v4954_v26 = vsel %vm291_vm12, %v4947_v37, %v1217_v59 }
 0x2ff   :  { %6117 = vst [vmem:[#allocation69_spill] sm:$0xff] %v4954_v26  ;;  %v1374_v56 = vmul.f32 %v4954_v26, %v6070_v27 }
 0x301   :  { %1474 = vmatpush.msra.mxu0 %v1374_v56 }
 0x303   :  { %1891 = vrot.lane.b32.xlu0 %v6118_v52, %s3292_s25 }
 0x305   :  { %v1139_v55 = vpop.permute.xlu0 %1138  ;;  %v4960_v35 = vpop.permute.xlu1 %1188 }
 0x306   :  { %v4962_v24 = vpop.permute.xlu2 %1260  ;;  %v1155_v3 = vsel %vm105_vm2, %v4883_v7, %v1139_v55 }
 0x307   :  { %v1343_v49 = vmul.f32 %v1155_v3, %v6079_v14 }
 0x309   :  { %1496 = vmatpush.msra.mxu1 %v1343_v49 }
 0x30d   :  { %v1141_v59 = vpop.permute.xlu0 %1140  ;;  %v4968_v25 = vpop.permute.xlu1 %1258 }
 0x30e   :  { %v4970_v27 = vpop.permute.xlu2 %1314  ;;  %v4975_v56 = vsel %vm105_vm2, %v1141_v59, %v4916_v38  ;;  %v4979_v52 = vsel %vm105_vm2, %v1139_v55, %v1141_v59 }
 0x30f   :  { %6119 = vst [vmem:[#allocation66_spill] sm:$0xff] %v4975_v56  ;;  %v1344_v31 = vmul.f32 %v4979_v52, %v6065_v48  ;;  %v1345_v49 = vmul.f32 %v4975_v56, %v6068_v15 }
 0x311   :  { %1516 = vmatpush.msra.mxu2 %v1344_v31  ;;  %1536 = vmatpush.msra.mxu3 %v1345_v49 }
 0x315   :  { %v4985_v14 = vpop.permute.xlu0 %1174  ;;  %v1185_v17 = vpop.permute.xlu1 %1184 }
 0x316   :  { %v1896_v26 = vpop.permute.xlu2 %1895  ;;  %v4991_v38 = vsel %vm186_vm8, %v4985_v14, %v4875_v12  ;;  %v4996_v55 = vsel %vm186_vm8, %v1185_v17, %v4923_v30  ;;  %v5000_v59 = vsel %vm186_vm8, %v1183_v60, %v1185_v17 }
 0x317   :  { %v1899_v31 = vsel %vm291_vm12, %v1896_v26, %v4584_v32  ;;  %v1900_v49 = vsel %vm291_vm12, %v4881_v42, %v1896_v26  ;;  %v1358_v48 = vmul.f32 %v4991_v38, %v3979_v1  ;;  %v1324_v32 = vsel %vm508_vm13, %v4908_v51, %v1305_v23 }
 0x318   :  { %v1913_v12 = vmul.f32 %v1900_v49, %v4372_v36  ;;  %v1914_v15 = vmul.f32 %v1899_v31, %v4375_v57  ;;  %v1326_v49 = vmul.f32 %v1324_v32, %v6076_v4  ;;  %v6123_v4 = vld [vmem:[#allocation18_spill] sm:$0xff] }
 0x319   :  { %1475 = vmatpush.msra.mxu0 %v1358_v48 }
 0x31a   :  { %1921 = vst [vmem:[#allocation2 + $0x70] sm:$0xf] %v1913_v12 }
 0x31b   :  { %1922 = vst [vmem:[#allocation2 + $0x20] sm:$0xf] %v1914_v15 }
 0x31d   :  { %v5012_v17 = vpop.permute.xlu0 %1134  ;;  %v5014_v60 = vpop.permute.xlu1 %1268 }
 0x31e   :  { %v5019_v56 = vpop.permute.xlu2 %1745  ;;  %v5025_v26 = vsel %vm105_vm2, %v5012_v17, %v4883_v7 }
 0x31f   :  { %v1749_v48 = vsel %vm105_vm2, %v5019_v56, %v4651_v8  ;;  %v1342_v15 = vmul.f32 %v5025_v26, %v6078_v9 }
 0x320   :  { %v1764_v31 = vmul.f32 %v1749_v48, %v4411_v44  ;;  %v6121_v48 = vld [vmem:[#allocation35_spill] sm:$0xff] }
 0x321   :  { %1476 = vmatpush.msra.mxu0 %v1342_v15 }
 0x322   :  { %1772 = vst [vmem:[#allocation2 + $0x100] sm:$0xf] %v1764_v31  ;;  %v6122_v31 = vld [vmem:[#allocation30_spill] sm:$0xff] }
 0x323   :  { %1477 = vmatpush.msra.mxu0 %v1326_v49  ;;  %v1275_v49 = vsel %vm372_vm10, %v4939_v29, %v4968_v25 }
 0x325   :  { %v1307_v12 = vpop.permute.xlu0 %1306  ;;  %1478 = vmatpush.msra.mxu0 %v4805_v6  ;;  %v5036_v7 = vpop.permute.xlu1 %1316 }
 0x326   :  { %v5038_v1 = vpop.permute.xlu2 %1741  ;;  %v1322_v8 = vsel %vm508_vm13, %v1307_v12, %v4893_v61  ;;  %v1323_v9 = vsel %vm508_vm13, %v1305_v23, %v1307_v12  ;;  %v6124_v23 = vld [vmem:[#allocation29_spill] sm:$0xff] }
 0x327   :  { %6120 = vst [vmem:[#allocation53_spill] sm:$0xff] %v5038_v1  ;;  %v1752_v32 = vsel %vm105_vm2, %v4613_v5, %v5038_v1  ;;  %v1327_v15 = vmul.f32 %v1323_v9, %v6121_v48  ;;  %v1328_v6 = vmul.f32 %v1322_v8, %v6122_v31  ;;  %v1280_v12 = vmul.f32 %v1275_v49, %v6124_v23  ;;  %v6125_v5 = vld [vmem:[#allocation24_spill] sm:$0xff]  ;;  %v6126_v48 = vld [vmem:[#allocation19_spill] sm:$0xff]  ;;  %v6128_v49 = vld [vmem:[#allocation34_spill] sm:$0xff] }
 0x328   :  { %v1761_v42 = vmul.f32 %v1752_v32, %v6123_v4  ;;  %v1240_v9 = vmul.f32 %v4891_v53, %v6125_v5  ;;  %v1200_v1 = vmul.f32 %v4921_v50, %v6126_v48 }
 0x329   :  { %1497 = vmatpush.msra.mxu1 %v1327_v15  ;;  %1517 = vmatpush.msra.mxu2 %v1328_v6  ;;  %v1274_v6 = vsel %vm372_vm10, %v4968_v25, %v4962_v24 }
 0x32a   :  { %1769 = vst [vmem:[#allocation2 + $0x120] sm:$0xf] %v1761_v42 }
 0x32b   :  { %1498 = vmatpush.msra.mxu1 %v4769_v43  ;;  %1518 = vmatpush.msra.mxu2 %v4767_v33  ;;  %v1160_v43 = vmul.f32 %v1155_v3, %v6086_v28  ;;  %v5075_v33 = vsel %vm186_vm8, %v4923_v30, %v4960_v35  ;;  %v6127_v30 = vld [vmem:[#allocation40_spill] sm:$0xff] }
 0x32c   :  { %v1364_v50 = vmul.f32 %v5075_v33, %v6095_v47 }
 0x32d   :  { %v1229_v8 = vpop.permute.xlu0 %1228  ;;  %1519 = vmatpush.msra.mxu2 %v1280_v12  ;;  %v5061_v31 = vpop.permute.xlu1 %1264  ;;  %v1281_v12 = vmul.f32 %v1274_v6, %v6128_v49  ;;  %v6131_v6 = vld [vmem:[#allocation7_spill] sm:$0xff] }
 0x32e   :  { %v5068_v42 = vsel %vm291_vm12, %v4929_v40, %v1229_v8 }
 0x32f   :  { %1520 = vmatpush.msra.mxu2 %v1240_v9  ;;  %v1380_v53 = vmul.f32 %v5068_v42, %v6093_v41  ;;  %v1241_v9 = vmul.f32 %v4906_v54, %v6092_v0  ;;  %v6130_v54 = vld [vmem:[#allocation23_spill] sm:$0xff]  ;;  %v1161_v0 = vmul.f32 %v4979_v52, %v6089_v45 }
 0x331   :  { %1521 = vmatpush.msra.mxu2 %v1200_v1 }
 0x333   :  { %1522 = vmatpush.msra.mxu2 %v1160_v43 }
 0x335   :  { %1594 = vmatpush.msrb.mxu2 %v1380_v53  ;;  %v5081_v32 = vpop.permute.xlu0 %1310  ;;  %v5083_v15 = vpop.permute.xlu1 %1262 }
 0x336   :  { %v1321_v3 = vsel %vm508_vm13, %v4893_v61, %v5081_v32 }
 0x337   :  { %1595 = vmatpush.msrb.mxu2 %v1364_v50  ;;  %v1329_v1 = vmul.f32 %v1321_v3, %v6127_v30  ;;  %v6129_v50 = vld [vmem:[#allocation10_spill] sm:$0xff]  ;;  %v1201_v3 = vmul.f32 %v4937_v62, %v6090_v11  ;;  %v1157_v62 = vsel %vm105_vm2, %v4949_v10, %v5012_v17  ;;  %v1318_v17 = vsel %vm508_vm13, %v4970_v27, %v5036_v7 }
 0x338   :  { %v1349_v52 = vmul.f32 %v1157_v62, %v6099_v2 }
 0x339   :  { %1537 = vmatpush.msra.mxu3 %v1329_v1 }
 0x33b   :  { %1538 = vmatpush.msra.mxu3 %v4779_v16  ;;  %v1237_v16 = vsel %vm291_vm12, %v1229_v8, %v4947_v37 }
 0x33c   :  { %v1381_v37 = vmul.f32 %v1237_v16, %v6094_v63 }
 0x33d   :  { %v5098_v43 = vpop.permute.xlu0 %1224  ;;  %1539 = vmatpush.msra.mxu3 %v1281_v12  ;;  %v1955_v61 = vpop.permute.xlu1 %1954 }
 0x33e   :  { %v1964_v53 = vsel %vm372_vm10, %v1955_v61, %v4721_v34  ;;  %v1965_v25 = vsel %vm372_vm10, %v6129_v50, %v1955_v61  ;;  %v1197_v34 = vsel %vm186_vm8, %v4960_v35, %v4985_v14  ;;  %v1325_v35 = vsel %vm508_vm13, %v5036_v7, %v4908_v51  ;;  %v6133_v7 = vld [vmem:[#allocation75_spill] sm:$0xff] }
 0x33f   :  { %1540 = vmatpush.msra.mxu3 %v1241_v9  ;;  %v1974_v1 = vmul.f32 %v1965_v25, %v6130_v54  ;;  %v1975_v12 = vmul.f32 %v1964_v53, %v6131_v6  ;;  %v1365_v61 = vmul.f32 %v1197_v34, %v6096_v46 }
 0x341   :  { %1541 = vmatpush.msra.mxu3 %v1201_v3  ;;  %v1990_v8 = vrot.slane %v1974_v1, 4  ;;  %v1991_v9 = vrot.slane %v1975_v12, 4  ;;  %v6132_v3 = vld [vmem:[#allocation9_spill] sm:$0xff] }
 0x343   :  { %1542 = vmatpush.msra.mxu3 %v1161_v0  ;;  %2006 = vst [vmem:[#allocation2 + $0x18] sm:$0xf0] %v1990_v8 }
 0x344   :  { %2007 = vst [vmem:[#allocation2 + $0xc8] sm:$0xf0] %v1991_v9 }
 0x345   :  { %1614 = vmatpush.msrb.mxu3 %v1381_v37  ;;  %v1147_v14 = vpop.permute.xlu0 %1146  ;;  %v1805_v53 = vpop.permute.xlu1 %1804  ;;  %v1333_v37 = vmul.f32 %v1325_v35, %v4217_v22  ;;  %v6134_v35 = vld [vmem:[#allocation32_spill] sm:$0xff] }
 0x346   :  { %v5137_v0 = vsel %vm105_vm2, %v1147_v14, %v4949_v10  ;;  %v1814_v50 = vsel %vm186_vm8, %v1805_v53, %v4831_v13  ;;  %v1815_v51 = vsel %vm186_vm8, %v4619_v18, %v1805_v53  ;;  %v5152_v10 = vld [vmem:[%s5787_s2] sm:$0xff]  ;;  %v1332_v13 = vmul.f32 %v1318_v17, %v4214_v58  ;;  %v6135_v17 = vld [vmem:[#allocation20_spill] sm:$0xff] }
 0x347   :  { %1615 = vmatpush.msrb.mxu3 %v1365_v61  ;;  %v1348_v25 = vmul.f32 %v5137_v0, %v4211_v21  ;;  %v1824_v1 = vmul.f32 %v1815_v51, %v6132_v3  ;;  %v1825_v12 = vmul.f32 %v1814_v50, %v6133_v7  ;;  %3233 = vmatmul.msk.f32.vlgmr.msra.gmra.mxu2 %vm1463_vm14, %v5152_v10  ;;  %v6136_v51 = vld [vmem:[#allocation64_spill] sm:$0xff] }
 0x348   :  { %3234 = vmatmul.msk.f32.vlgmr.msra.gmra.mxu3 %vm1463_vm14, %v5152_v10 }
 0x349   :  { %1616 = vmatpush.msrb.mxu3 %v1349_v52  ;;  %v1840_v18 = vrot.slane %v1824_v1, 4  ;;  %v1841_v8 = vrot.slane %v1825_v12, 4  ;;  %1596 = vmatpush.msrb.mxu2 %v1348_v25  ;;  %v6137_v25 = vld [vmem:[#allocation69_spill] sm:$0xff]  ;;  %v6138_v12 = vld [vmem:[#allocation67_spill] sm:$0xff] }
 0x34a   :  { %v1239_v1 = vmul.f32 %v6137_v25, %v6136_v51  ;;  %v6145_v25 = vld [vmem:[#allocation71_spill] sm:$0xff] }
 0x34b   :  { %1617 = vmatpush.msrb.mxu3 %v1333_v37  ;;  %1856 = vst [vmem:[#allocation2 + $0x120] sm:$0xf0] %v1840_v18  ;;  %1597 = vmatpush.msrb.mxu2 %v1332_v13  ;;  %v6140_v13 = vld [vmem:[#allocation61_spill] sm:$0xff]  ;;  %v6141_v18 = vld [vmem:[#allocation62_spill] sm:$0xff] }
 0x34c   :  { %1857 = vst [vmem:[#allocation2 + $0x38] sm:$0xf0] %v1841_v8  ;;  %v1232_v8 = vsel %vm291_vm12, %v6141_v18, %v5098_v43  ;;  %v6146_v18 = vld [vmem:[#allocation47_spill] sm:$0xff] }
 0x34d   :  { %1618 = vmatpush.msrb.mxu3 %v4815_v19  ;;  %v1255_v9 = vpop.permute.xlu0 %1254  ;;  %1598 = vmatpush.msrb.mxu2 %v4795_v39  ;;  %v1238_v19 = vmul.f32 %v1237_v16, %v6138_v12  ;;  %v6139_v39 = vld [vmem:[#allocation65_spill] sm:$0xff]  ;;  %v6142_v16 = vld [vmem:[#allocation31_spill] sm:$0xff] }
 0x34e   :  { %v1276_v61 = vsel %vm372_vm10, %v1255_v9, %v4939_v29  ;;  %v1277_v52 = vsel %vm372_vm10, %v5014_v60, %v1255_v9  ;;  %v1198_v37 = vmul.f32 %v1197_v34, %v6139_v39  ;;  %v1199_v29 = vmul.f32 %v4991_v38, %v6140_v13  ;;  %v6143_v34 = vld [vmem:[#allocation57_spill] sm:$0xff] }
 0x34f   :  { %v1278_v53 = vmul.f32 %v1277_v52, %v6134_v35  ;;  %v1279_v50 = vmul.f32 %v1276_v61, %v6135_v17  ;;  %v1231_v9 = vsel %vm291_vm12, %v5098_v43, %v4929_v40  ;;  %v1158_v61 = vmul.f32 %v1157_v62, %v6142_v16  ;;  %v6148_v62 = vld [vmem:[#allocation73_spill] sm:$0xff] }
 0x350   :  { %v1159_v38 = vmul.f32 %v5025_v26, %v6143_v34  ;;  %v1379_v39 = vmul.f32 %v1231_v9, %v6145_v25  ;;  %v1363_v26 = vmul.f32 %v4996_v55, %v6148_v62 }
 0x351   :  { %1479 = vmatpush.msra.mxu0 %v1278_v53  ;;  %1499 = vmatpush.msra.mxu1 %v1279_v50  ;;  %v6144_v53 = vld [vmem:[#allocation12_spill] sm:$0xff] }
 0x352   :  { %v1378_v50 = vmul.f32 %v1232_v8, %v6144_v53 }
 0x353   :  { %1480 = vmatpush.msra.mxu0 %v1238_v19  ;;  %1500 = vmatpush.msra.mxu1 %v1239_v1  ;;  %v6147_v19 = vld [vmem:[#allocation72_spill] sm:$0xff] }
 0x354   :  { %v1362_v40 = vmul.f32 %v5000_v59, %v6147_v19 }
 0x355   :  { %v1145_v52 = vpop.permute.xlu0 %1144  ;;  %1481 = vmatpush.msra.mxu0 %v1198_v37  ;;  %1501 = vmatpush.msra.mxu1 %v1199_v29  ;;  %v6149_v37 = vld [vmem:[#allocation68_spill] sm:$0xff] }
 0x356   :  { %v1152_v1 = vsel %vm105_vm2, %v6146_v18, %v1145_v52  ;;  %v1151_v43 = vsel %vm105_vm2, %v1145_v52, %v1147_v14 }
 0x357   :  { %1482 = vmatpush.msra.mxu0 %v1158_v61  ;;  %1502 = vmatpush.msra.mxu1 %v1159_v38  ;;  %v1346_v29 = vmul.f32 %v1152_v1, %v6149_v37  ;;  %v6150_v61 = vld [vmem:[#allocation8_spill] sm:$0xff]  ;;  %v6151_v38 = vld [vmem:[#allocation21_spill] sm:$0xff] }
 0x358   :  { %3231 = vmatmul.msk.f32.vlgmr.msra.gmra.mxu0 %vm1463_vm14, %v5152_v10  ;;  %3232 = vmatmul.msk.f32.vlgmr.msra.gmra.mxu1 %vm1463_vm14, %v5152_v10  ;;  %v1347_v18 = vmul.f32 %v1151_v43, %v6150_v61 }
 0x359   :  { %1554 = vmatpush.msrb.mxu0 %v1378_v50  ;;  %1574 = vmatpush.msrb.mxu1 %v1379_v39 }
 0x35b   :  { %1555 = vmatpush.msrb.mxu0 %v1362_v40  ;;  %1575 = vmatpush.msrb.mxu1 %v1363_v26  ;;  %v6152_v40 = vld [vmem:[#allocation13_spill] sm:$0xff]  ;;  %v1272_v26 = vsel %vm372_vm10, %v5083_v15, %v5061_v31 }
 0x35d   :  { %1556 = vmatpush.msrb.mxu0 %v1346_v29  ;;  %1576 = vmatpush.msrb.mxu1 %v1347_v18  ;;  %v1313_v14 = vpop.permute.xlu0 %1312  ;;  %v1273_v29 = vsel %vm372_vm10, %v4962_v24, %v5083_v15  ;;  %v6153_v18 = vld [vmem:[#allocation42_spill] sm:$0xff] }
 0x35e   :  { %v1319_v52 = vsel %vm508_vm13, %v1313_v14, %v4970_v27  ;;  %v1320_v39 = vsel %vm508_vm13, %v5081_v32, %v1313_v14  ;;  %v1282_v27 = vmul.f32 %v1273_v29, %v6130_v54  ;;  %v1283_v32 = vmul.f32 %v1272_v26, %v6131_v6  ;;  %v6154_v14 = vld [vmem:[#allocation50_spill] sm:$0xff]  ;;  %v6159_v29 = vld [vmem:[#allocation4_spill] sm:$0xff] }
 0x35f   :  { %v1330_v50 = vmul.f32 %v1320_v39, %v6151_v38  ;;  %v1331_v37 = vmul.f32 %v1319_v52, %v6152_v40  ;;  %v6155_v52 = vld [vmem:[#allocation16_spill] sm:$0xff]  ;;  %v6156_v39 = vld [vmem:[#allocation14_spill] sm:$0xff]  ;;  %v1203_v26 = vmul.f32 %v5000_v59, %v6133_v7  ;;  %v6163_v59 = vld [vmem:[#allocation11_spill] sm:$0xff] }
 0x360   :  { %v1242_v40 = vmul.f32 %v6156_v39, %v6155_v52  ;;  %v6157_v38 = vld [vmem:[#allocation6_spill] sm:$0xff]  ;;  %v6162_v39 = vld [vmem:[#allocation5_spill] sm:$0xff] }
 0x361   :  { %1557 = vmatpush.msrb.mxu0 %v1330_v50  ;;  %1577 = vmatpush.msrb.mxu1 %v1331_v37  ;;  %v1243_v61 = vmul.f32 %v1232_v8, %v6157_v38  ;;  %v6158_v24 = vld [vmem:[#allocation70_spill] sm:$0xff] }
 0x362   :  { %v1202_v15 = vmul.f32 %v6158_v24, %v6132_v3  ;;  %v6160_v8 = vld [vmem:[#allocation74_spill] sm:$0xff]  ;;  %v1163_v24 = vmul.f32 %v1152_v1, %v6162_v39  ;;  %v2374_v1 = vld [vmem:[#allocation2 + $0x58] sm:$0xf] }
 0x363   :  { %1558 = vmatpush.msrb.mxu0 %v6153_v18  ;;  %1578 = vmatpush.msrb.mxu1 %v6154_v14 }
 0x365   :  { %v1267_v62 = vpop.permute.xlu0 %1266  ;;  %1559 = vmatpush.msrb.mxu0 %v1282_v27  ;;  %1579 = vmatpush.msrb.mxu1 %v1283_v32  ;;  %v6161_v27 = vld [vmem:[#allocation66_spill] sm:$0xff] }
 0x366   :  { %v1270_v37 = vsel %vm372_vm10, %v1267_v62, %v5014_v60  ;;  %v1271_v50 = vsel %vm372_vm10, %v5061_v31, %v1267_v62  ;;  %v1162_v32 = vmul.f32 %v6161_v27, %v6123_v4  ;;  %v1245_v60 = vmul.f32 %v5068_v42, %v4375_v57 }
 0x367   :  { %v1284_v18 = vmul.f32 %v1271_v50, %v6159_v29  ;;  %v1285_v14 = vmul.f32 %v1270_v37, %v6160_v8  ;;  %1560 = vmatpush.msrb.mxu0 %v1242_v40  ;;  %1580 = vmatpush.msrb.mxu1 %v1243_v61  ;;  %v1244_v31 = vmul.f32 %v1231_v9, %v4372_v36  ;;  %v6164_v61 = vld [vmem:[#allocation15_spill] sm:$0xff]  ;;  %v6165_v9 = vld [vmem:[#allocation76_spill] sm:$0xff] }
 0x368   :  { %v1205_v62 = vmul.f32 %v5075_v33, %v6163_v59  ;;  %v1204_v40 = vmul.f32 %v4996_v55, %v6164_v61  ;;  %v1165_v37 = vmul.f32 %v5137_v0, %v4411_v44  ;;  %v1164_v50 = vmul.f32 %v1151_v43, %v6165_v9  ;;  %v2358_v43 = vld [vmem:[#allocation2 + $0x128] sm:$0xff]  ;;  %v6188_v61 = vld [vmem:[#allocation52_spill] sm:$0xff] }
 0x369   :  { %1561 = vmatpush.msrb.mxu0 %v1202_v15  ;;  %1581 = vmatpush.msrb.mxu1 %v1203_v26  ;;  %v2375_v15 = vld [vmem:[#allocation2 + $0x78] sm:$0xf]  ;;  %v6166_v26 = vld [vmem:[#allocation53_spill] sm:$0xff] }
 0x36a   :  { %1599 = vmatpush.msrb.mxu2 %v1284_v18  ;;  %1619 = vmatpush.msrb.mxu3 %v1285_v14  ;;  %v2366_v18 = vld [vmem:[#allocation2 + $0xc0] sm:$0xff]  ;;  %v2367_v14 = vld [vmem:[#allocation2 + $0x118] sm:$0xff] }
 0x36b   :  { %1562 = vmatpush.msrb.mxu0 %v1162_v32  ;;  %1582 = vmatpush.msrb.mxu1 %v1163_v24  ;;  %v2376_v32 = vld [vmem:[#allocation2 + $0x30] sm:$0xf]  ;;  %v2377_v24 = vld [vmem:[#allocation2 + $0x40] sm:$0xf] }
 0x36c   :  { %1600 = vmatpush.msrb.mxu2 %v1244_v31  ;;  %1620 = vmatpush.msrb.mxu3 %v1245_v60  ;;  %v2350_v60 = vld [vmem:[#allocation2 + $0x80] sm:$0xff]  ;;  %v2351_v31 = vld [vmem:[#allocation2 + $0x108] sm:$0xff] }
 0x36d   :  { %3243 = vmatpush.msk.msra.mxu0 %vm883_vm4, %v2374_v1  ;;  %3245 = vmatpush.msk.msra.mxu1 %vm883_vm4, %v2375_v15  ;;  %v1744_v42 = vpop.permute.xlu0 %1743  ;;  %v2342_v15 = vld [vmem:[#allocation2 + $0xb0] sm:$0xff] }
 0x36e   :  { %v1750_v33 = vsel %vm105_vm2, %v1744_v42, %v5019_v56  ;;  %v1751_v55 = vsel %vm105_vm2, %v6166_v26, %v1744_v42  ;;  %1601 = vmatpush.msrb.mxu2 %v1204_v40  ;;  %1621 = vmatpush.msrb.mxu3 %v1205_v62  ;;  %v2359_v56 = vld [vmem:[#allocation2 + $0x110] sm:$0xff]  ;;  %v2368_v62 = vld [vmem:[#allocation2 + $0xd8] sm:$0xff]  ;;  %v2369_v40 = vld [vmem:[#allocation2 + $0xa0] sm:$0xff] }
 0x36f   :  { %v1762_v0 = vmul.f32 %v1751_v55, %v6162_v39  ;;  %v1763_v27 = vmul.f32 %v1750_v33, %v6165_v9  ;;  %2421 = vmatpush.msra.mxu0 %v2366_v18  ;;  %2441 = vmatpush.msra.mxu1 %v2367_v14  ;;  %v6167_v42 = vld [vmem:[#allocation39_spill] sm:$0xff]  ;;  %v6168_v33 = vld [vmem:[#allocation48_spill] sm:$0xff]  ;;  %v2360_v55 = vld [vmem:[#allocation2 + $0x8] sm:$0xff] }
 0x370   :  { %1602 = vmatpush.msrb.mxu2 %v1164_v50  ;;  %1622 = vmatpush.msrb.mxu3 %v1165_v37  ;;  %v2343_v37 = vld [vmem:[#allocation2 + $0xd0] sm:$0xff]  ;;  %v2361_v18 = vld [vmem:[#allocation2 + $0x98] sm:$0xff] }
 0x371   :  { %1770 = vst [vmem:[#allocation2 + $0x38] sm:$0xf] %v1762_v0  ;;  %3237 = vmatmul.msk.f32.vlgmr.msrb.gmra.mxu2 %vm1463_vm14, %v5152_v10  ;;  %2422 = vmatpush.msra.mxu0 %v2358_v43  ;;  %v2379_v43 = vld [vmem:[#allocation2] sm:$0xf] }
 0x372   :  { %1771 = vst [vmem:[#allocation2 + $0xf8] sm:$0xf] %v1763_v27  ;;  %2442 = vmatpush.msra.mxu1 %v2359_v56  ;;  %3247 = vmatpush.msk.msra.mxu2 %vm883_vm4, %v2376_v32  ;;  %v2378_v27 = vld [vmem:[#allocation2 + $0x28] sm:$0xf]  ;;  %v2352_v56 = vld [vmem:[#allocation2 + $0x138] sm:$0xff]  ;;  %v2353_v32 = vld [vmem:[#allocation2 + $0xf0] sm:$0xff] }
 0x373   :  { %3249 = vmatpush.msk.msra.mxu3 %vm883_vm4, %v2377_v24  ;;  %3235 = vmatmul.msk.f32.vlgmr.msrb.gmra.mxu0 %vm1463_vm14, %v5152_v10  ;;  %v2370_v24 = vld [vmem:[#allocation2 + $0x68] sm:$0xff] }
 0x374   :  { %3238 = vmatmul.msk.f32.vlgmr.msrb.gmra.mxu3 %vm1463_vm14, %v5152_v10  ;;  %2423 = vmatpush.msra.mxu0 %v2350_v60  ;;  %v2371_v60 = vld [vmem:[#allocation2 + $0x130] sm:$0xff] }
 0x375   :  { %2443 = vmatpush.msra.mxu1 %v2351_v31  ;;  %2461 = vmatpush.msra.mxu2 %v2368_v62  ;;  %v1892_v1 = vpop.permute.xlu0 %1891  ;;  %v2341_v31 = vld [vmem:[%s5786_s1] sm:$0xff]  ;;  %v2344_v62 = vld [vmem:[#allocation2 + $0x10] sm:$0xff] }
 0x376   :  { %2481 = vmatpush.msra.mxu3 %v2369_v40  ;;  %3236 = vmatmul.msk.f32.vlgmr.msrb.gmra.mxu1 %vm1463_vm14, %v5152_v10  ;;  %v1901_v50 = vsel %vm291_vm12, %v1892_v1, %v6167_v42  ;;  %v1902_v26 = vsel %vm291_vm12, %v6168_v33, %v1892_v1  ;;  %v2345_v40 = vld [vmem:[#allocation2 + $0x48] sm:$0xff]  ;;  %v2381_v42 = vld [vmem:[#allocation2 + $0x60] sm:$0xf] }
 0x377   :  { %2424 = vmatpush.msra.mxu0 %v2342_v15  ;;  %2444 = vmatpush.msra.mxu1 %v2343_v37  ;;  %v1911_v14 = vmul.f32 %v1902_v26, %v6155_v52  ;;  %v1912_v0 = vmul.f32 %v1901_v50, %v6157_v38  ;;  %v2362_v1 = vld [vmem:[#allocation2 + $0xa8] sm:$0xff]  ;;  %v2363_v15 = vld [vmem:[#allocation2 + $0x90] sm:$0xff]  ;;  %v2380_v37 = vld [vmem:[#allocation2 + $0xb8] sm:$0xf] }
 0x378   :  { %2462 = vmatpush.msra.mxu2 %v2360_v55  ;;  %2482 = vmatpush.msra.mxu3 %v2361_v18  ;;  %v2372_v50 = vld [vmem:[#allocation2 + $0x50] sm:$0xff]  ;;  %v2373_v33 = vld [vmem:[#allocation2 + $0xe8] sm:$0xff]  ;;  %v2364_v55 = vld [vmem:[#allocation2 + $0xe0] sm:$0xff] }
 0x379   :  { %1919 = vst [vmem:[#allocation2 + $0x18] sm:$0xf] %v1911_v14  ;;  %3251 = vmatpush.msk.msrb.mxu0 %vm883_vm4, %v2378_v27  ;;  %3253 = vmatpush.msk.msrb.mxu1 %vm883_vm4, %v2379_v43  ;;  %v2365_v14 = vld [vmem:[#allocation2 + $0x88] sm:$0xff]  ;;  %v2346_v27 = vld [vmem:[#allocation2 + $0x120] sm:$0xff] }
 0x37a   :  { %1920 = vst [vmem:[#allocation2 + $0xc8] sm:$0xf] %v1912_v0  ;;  %2463 = vmatpush.msra.mxu2 %v2352_v56  ;;  %2483 = vmatpush.msra.mxu3 %v2353_v32  ;;  %v2356_v0 = vld [vmem:[#allocation2 + $0x70] sm:$0xff]  ;;  %v2357_v43 = vld [vmem:[#allocation2 + $0x20] sm:$0xff]  ;;  %v2347_v56 = vld [vmem:[#allocation2 + $0x38] sm:$0xff] }
 0x37b   :  { %2501 = vmatpush.msrb.mxu0 %v2370_v24  ;;  %2521 = vmatpush.msrb.mxu1 %v2371_v60  ;;  %v2348_v32 = vld [vmem:[#allocation2 + $0xf8] sm:$0xff]  ;;  %v2349_v24 = vld [vmem:[#allocation2 + $0x100] sm:$0xff] }
 0x37c   :  { %2464 = vmatpush.msra.mxu2 %v2344_v62  ;;  %2484 = vmatpush.msra.mxu3 %v2345_v40 }
 0x37d   :  { %3248 = vmatmul.msk.f32.vlgmr.msra.gmra.mxu2 %vm879_vm5, %v2341_v31  ;;  %2502 = vmatpush.msrb.mxu0 %v2362_v1 }
 0x37e   :  { %2522 = vmatpush.msrb.mxu1 %v2363_v15  ;;  %3255 = vmatpush.msk.msrb.mxu2 %vm883_vm4, %v2380_v37 }
 0x37f   :  { %3257 = vmatpush.msk.msrb.mxu3 %vm883_vm4, %v2381_v42  ;;  %3244 = vmatmul.msk.f32.vlgmr.msra.gmra.mxu0 %vm879_vm5, %v2341_v31 }
 0x380   :  { %3250 = vmatmul.msk.f32.vlgmr.msra.gmra.mxu3 %vm879_vm5, %v2341_v31  ;;  %2541 = vmatpush.msrb.mxu2 %v2372_v50  ;;  %v2354_v26 = vld [vmem:[#allocation2 + $0x18] sm:$0xff] }
 0x381   :  { %2561 = vmatpush.msrb.mxu3 %v2373_v33  ;;  %3246 = vmatmul.msk.f32.vlgmr.msra.gmra.mxu1 %vm879_vm5, %v2341_v31  ;;  %v2355_v18 = vld [vmem:[#allocation2 + $0xc8] sm:$0xff] }
 0x382   :  { %2542 = vmatpush.msrb.mxu2 %v2364_v55  ;;  %2503 = vmatpush.msrb.mxu0 %v2354_v26 }
 0x383   :  { %2562 = vmatpush.msrb.mxu3 %v2365_v14  ;;  %2523 = vmatpush.msrb.mxu1 %v2355_v18 }
 0x384   :  { %2543 = vmatpush.msrb.mxu2 %v2356_v0  ;;  %2504 = vmatpush.msrb.mxu0 %v2346_v27 }
 0x385   :  { %2563 = vmatpush.msrb.mxu3 %v2357_v43  ;;  %2524 = vmatpush.msrb.mxu1 %v2347_v56 }
 0x386   :  { %2544 = vmatpush.msrb.mxu2 %v2348_v32 }
 0x387   :  { %2564 = vmatpush.msrb.mxu3 %v2349_v24  ;;  %3256 = vmatmul.msk.f32.vlgmr.msrb.gmra.mxu2 %vm879_vm5, %v2341_v31 }
 0x388   :  { %3252 = vmatmul.msk.f32.vlgmr.msrb.gmra.mxu0 %vm879_vm5, %v2341_v31  ;;  %3258 = vmatmul.msk.f32.vlgmr.msrb.gmra.mxu3 %vm879_vm5, %v2341_v31 }
 0x389   :  { %3254 = vmatmul.msk.f32.vlgmr.msrb.gmra.mxu1 %vm879_vm5, %v2341_v31 }
 0x3ca   :  { %v5299_v40 = vpop.f32.mrf.mxu2 }
 0x3cb   :  { %6171 = vst [vmem:[#allocation36_spill] sm:$0xff] %v5299_v40  ;;  %v5301_v1 = vpop.f32.mrf.mxu3 }
 0x3cc   :  { %6172 = vst [vmem:[#allocation26_spill] sm:$0xff] %v5301_v1 }
 0x3d5   :  { %v5295_v60 = vpop.f32.mrf.mxu0  ;;  %v5297_v62 = vpop.f32.mrf.mxu1 }
 0x3d6   :  { %6169 = vst [vmem:[#allocation63_spill] sm:$0xff] %v5295_v60 }
 0x3d7   :  { %6170 = vst [vmem:[#allocation22_spill] sm:$0xff] %v5297_v62 }
 0x3f0   :  { %v5303_v15 = vpop.f32.mrf.mxu0 }
 0x3f3   :  { %v5305_v37 = vpop.f32.mrf.mxu1 }
 0x3f4   :  { %v5307_v42 = vpop.f32.mrf.mxu2 }
 0x3f7   :  { %v5309_v50 = vpop.f32.mrf.mxu3 }
 0x3fc   :  { %v5311_v33 = vpop.f32.mrf.mxu0 }
 0x3fd   :  { %v2578_v31 = vmul.f32 %v5311_v33, %v5311_v33 }
 0x3fe   :  { %v2446_v26 = vpop.f32.mrf.mxu1 }
 0x3ff   :  { %v2569_v55 = vadd.f32 %v2446_v26, %v5311_v33  ;;  %v2579_v18 = vmul.f32 %v2446_v26, %v2446_v26 }
 0x400   :  { %v2466_v14 = vpop.f32.mrf.mxu2 }
 0x401   :  { %v2586_v0 = vadd.f32 %v2579_v18, %v2578_v31  ;;  %v2570_v27 = vadd.f32 %v2569_v55, %v2466_v14  ;;  %v2580_v43 = vmul.f32 %v2466_v14, %v2466_v14 }
 0x403   :  { %v2587_v56 = vadd.f32 %v2586_v0, %v2580_v43  ;;  %v2486_v32 = vpop.f32.mrf.mxu3 }
 0x404   :  { %v2571_v24 = vadd.f32 %v2570_v27, %v2486_v32  ;;  %v2581_v39 = vmul.f32 %v2486_v32, %v2486_v32 }
 0x405   :  { %v2506_v4 = vpop.f32.mrf.mxu0 }
 0x406   :  { %v2588_v7 = vadd.f32 %v2587_v56, %v2581_v39  ;;  %v2572_v3 = vadd.f32 %v2571_v24, %v2506_v4  ;;  %v2582_v38 = vmul.f32 %v2506_v4, %v2506_v4  ;;  %v5316_v52 = vpop.f32.mrf.mxu1 }
 0x407   :  { %v2583_v6 = vmul.f32 %v5316_v52, %v5316_v52 }
 0x408   :  { %v2589_v54 = vadd.f32 %v2588_v7, %v2582_v38  ;;  %v2573_v19 = vadd.f32 %v2572_v3, %v5316_v52 }
 0x40a   :  { %v2590_v9 = vadd.f32 %v2589_v54, %v2583_v6  ;;  %v2546_v31 = vpop.f32.mrf.mxu2 }
 0x40b   :  { %v2574_v55 = vadd.f32 %v2573_v19, %v2546_v31  ;;  %v2584_v18 = vmul.f32 %v2546_v31, %v2546_v31  ;;  %v2566_v0 = vpop.f32.mrf.mxu3 }
 0x40c   :  { %v2585_v43 = vmul.f32 %v2566_v0, %v2566_v0 }
 0x40d   :  { %v2591_v27 = vadd.f32 %v2590_v9, %v2584_v18  ;;  %v2575_v25 = vadd.f32 %v2574_v55, %v2566_v0 }
 0x40f   :  { %2576 = vadd.xlane.f32.xlu1 %v2575_v25  ;;  %v2592_v39 = vadd.f32 %v2591_v27, %v2585_v43 }
 0x411   :  { %2593 = vadd.xlane.f32.xlu0 %v2592_v39 }
 0x482   :  { %v2577_v56 = vpop.xlane.xlu1 %2576 }
 0x483   :  { %v2595_v24 = vmul.f32 0.0009765625, %v2577_v56 }
 0x484   :  { %v2594_v53 = vpop.xlane.xlu0 %2593 }
 0x485   :  { %v2596_v34 = vmul.f32 0.0009765625, %v2594_v53  ;;  %v2597_v16 = vmul.f32 %v2595_v24, %v2595_v24  ;;  %v2602_v25 = vsub.f32 %v2466_v14, %v2595_v24  ;;  %v2601_v55 = vsub.f32 %v2446_v26, %v2595_v24 }
 0x487   :  { %v2598_v13 = vsub.f32 %v2596_v34, %v2597_v16 }
 0x489   :  { %v2599_v7 = vmax.f32 %v2598_v13, 0.0  ;;  %v2603_v13 = vsub.f32 %v2486_v32, %v2595_v24 }
 0x48b   :  { %v2608_v38 = vadd.f32 1e-05, %v2599_v7  ;;  %v2600_v7 = vsub.f32 %v5311_v33, %v2595_v24  ;;  %v2605_v33 = vsub.f32 %v5316_v52, %v2595_v24 }
 0x48d   :  { %3283 = vrsqrt.f32 %v2608_v38  ;;  %vm2615_vm0 = vweird.f32 %v2608_v38 }
 0x493   :  { %v3284_v54 = vpop.eup %3283 }
 0x494   :  { %v2610_v6 = vmul.f32 %v3284_v54, %v2608_v38  ;;  %vm2616_vm15 = vweird.f32 %v3284_v54 }
 0x495   :  { %vm2617_vm1 = vmor %vm2615_vm0, %vm2616_vm15 }
 0x496   :  { %v2611_v3 = vmul.f32 %v3284_v54, %v2610_v6 }
 0x498   :  { %v2612_v19 = vmul.f32 0.5, %v2611_v3 }
 0x49a   :  { %v2613_v44 = vsub.f32 1.5, %v2612_v19 }
 0x49c   :  { %v2614_v9 = vmul.f32 %v3284_v54, %v2613_v44  ;;  %v2604_v44 = vsub.f32 %v2506_v4, %v2595_v24  ;;  %v2606_v4 = vsub.f32 %v2546_v31, %v2595_v24  ;;  %v2607_v31 = vsub.f32 %v2566_v0, %v2595_v24 }
 0x49d   :  { %v1627_v24 = vadd.f32 %v5297_v62, %v5295_v60 }
 0x49e   :  { %v2618_v18 = vsel %vm2617_vm1, %v3284_v54, %v2614_v9 }
 0x49f   :  { %v2621_v43 = vmul.f32 %v2618_v18, %v2602_v25  ;;  %v2620_v27 = vmul.f32 %v2618_v18, %v2601_v55  ;;  %v2622_v34 = vmul.f32 %v2618_v18, %v2603_v13  ;;  %v2623_v26 = vmul.f32 %v2618_v18, %v2604_v44 }
 0x4a0   :  { %v2625_v32 = vmul.f32 %v2618_v18, %v2606_v4  ;;  %v2619_v38 = vmul.f32 %v2618_v18, %v2600_v7  ;;  %v2626_v6 = vmul.f32 %v2618_v18, %v2607_v31  ;;  %v2624_v0 = vmul.f32 %v2618_v18, %v2605_v33  ;;  %v6175_v18 = vld [vmem:[#allocation54_spill] sm:$0xff]  ;;  %v6176_v31 = vld [vmem:[#allocation51_spill] sm:$0xff] }
 0x4a1   :  { %v5321_v53 = vmax.f32 %v2621_v43, 0.0  ;;  %v5323_v16 = vmax.f32 %v2620_v27, 0.0  ;;  %v5331_v14 = vmax.f32 %v2622_v34, 0.0  ;;  %v5333_v39 = vmax.f32 %v2623_v26, 0.0 }
 0x4a2   :  { %v5347_v56 = vmax.f32 %v2625_v32, 0.0  ;;  %v5356_v54 = vmax.f32 %v2619_v38, 0.0  ;;  %v5364_v3 = vmax.f32 %v2626_v6, 0.0  ;;  %v5379_v19 = vmax.f32 %v2624_v0, 0.0  ;;  %v6177_v0 = vld [vmem:[#allocation60_spill] sm:$0xff] }
 0x4a3   :  { %2639 = vrot.lane.b32.xlu0 %v5321_v53, %s3290_s23  ;;  %2719 = vrot.lane.b32.xlu2 %v5321_v53, %s3292_s25  ;;  %6173 = vst [vmem:[#allocation17_spill] sm:$0xff] %v5333_v39  ;;  %v1628_v55 = vadd.f32 %v1627_v24, %v5299_v40 }
 0x4a4   :  { %2717 = vrot.lane.b32.xlu1 %v5323_v16, %s3292_s25  ;;  %6174 = vst [vmem:[#allocation41_spill] sm:$0xff] %v5379_v19 }
 0x4a5   :  { %v1629_v27 = vadd.f32 %v1628_v55, %v5301_v1 }
 0x4a7   :  { %v1630_v44 = vadd.f32 %v1629_v27, %v5303_v15 }
 0x4a9   :  { %v1631_v34 = vadd.f32 %v1630_v44, %v5305_v37 }
 0x4ab   :  { %2721 = vrot.lane.b32.xlu2 %v5331_v14, %s3292_s25  ;;  %2677 = vrot.lane.b32.xlu0 %v5323_v16, %s3291_s24  ;;  %v1632_v38 = vadd.f32 %v1631_v34, %v5307_v42  ;;  %v6180_v34 = vld [vmem:[#allocation56_spill] sm:$0xff] }
 0x4ac   :  { %2683 = vrot.lane.b32.xlu1 %v5333_v39, %s3291_s24 }
 0x4ad   :  { %v1633_v55 = vadd.f32 %v1632_v38, %v5309_v50 }
 0x4b3   :  { %2679 = vrot.lane.b32.xlu2 %v5321_v53, %s3291_s24  ;;  %2637 = vrot.lane.b32.xlu0 %v5323_v16, %s3290_s23 }
 0x4b4   :  { %2643 = vrot.lane.b32.xlu1 %v5333_v39, %s3290_s23 }
 0x4bb   :  { %2681 = vrot.lane.b32.xlu2 %v5331_v14, %s3291_s24  ;;  %2809 = vrot.lane.b32.xlu0 %v5331_v14, %s3294_s27 }
 0x4bc   :  { %2727 = vrot.lane.b32.xlu1 %v5347_v56, %s3292_s25 }
 0x4c3   :  { %2803 = vrot.lane.b32.xlu0 %v5356_v54, %s3294_s27  ;;  %2715 = vrot.lane.b32.xlu2 %v5356_v54, %s3292_s25 }
 0x4c4   :  { %2805 = vrot.lane.b32.xlu1 %v5323_v16, %s3294_s27 }
 0x4cb   :  { %2687 = vrot.lane.b32.xlu0 %v5347_v56, %s3291_s24  ;;  %2723 = vrot.lane.b32.xlu2 %v5333_v39, %s3292_s25 }
 0x4cc   :  { %2689 = vrot.lane.b32.xlu1 %v5364_v3, %s3291_s24 }
 0x4d3   :  { %2757 = vrot.lane.b32.xlu0 %v5323_v16, %s3293_s26  ;;  %2641 = vrot.lane.b32.xlu2 %v5331_v14, %s3290_s23 }
 0x4d4   :  { %2759 = vrot.lane.b32.xlu1 %v5321_v53, %s3293_s26 }
 0x4db   :  { %2649 = vrot.lane.b32.xlu0 %v5364_v3, %s3290_s23  ;;  %2675 = vrot.lane.b32.xlu2 %v5356_v54, %s3291_s24 }
 0x4dc   :  { %2685 = vrot.lane.b32.xlu1 %v5379_v19, %s3291_s24 }
 0x4e3   :  { %2761 = vrot.lane.b32.xlu0 %v5331_v14, %s3293_s26  ;;  %2635 = vrot.lane.b32.xlu2 %v5356_v54, %s3290_s23 }
 0x4e4   :  { %2769 = vrot.lane.b32.xlu1 %v5364_v3, %s3293_s26 }
 0x4eb   :  { %2815 = vrot.lane.b32.xlu0 %v5347_v56, %s3294_s27  ;;  %2807 = vrot.lane.b32.xlu2 %v5321_v53, %s3294_s27 }
 0x4ec   :  { %2817 = vrot.lane.b32.xlu1 %v5364_v3, %s3294_s27 }
 0x4f3   :  { %2765 = vrot.lane.b32.xlu0 %v5379_v19, %s3293_s26  ;;  %2729 = vrot.lane.b32.xlu2 %v5364_v3, %s3292_s25 }
 0x4f4   :  { %2767 = vrot.lane.b32.xlu1 %v5347_v56, %s3293_s26 }
 0x4fb   :  { %2811 = vrot.lane.b32.xlu2 %v5333_v39, %s3294_s27 }
 0x4fd   :  { %v2720_v52 = vpop.permute.xlu2 %2719 }
 0x503   :  { %2725 = vrot.lane.b32.xlu2 %v5379_v19, %s3292_s25 }
 0x505   :  { %v2722_v9 = vpop.permute.xlu2 %2721 }
 0x506   :  { %v5413_v25 = vsel %vm291_vm12, %v2720_v52, %v2722_v9 }
 0x507   :  { %v2877_v43 = vmul.f32 %v5413_v25, %v6175_v18 }
 0x509   :  { %3014 = vmatpush.msra.mxu2 %v2877_v43 }
 0x50b   :  { %2647 = vrot.lane.b32.xlu2 %v5347_v56, %s3290_s23 }
 0x50d   :  { %v2680_v13 = vpop.permute.xlu2 %2679 }
 0x513   :  { %2755 = vrot.lane.b32.xlu2 %v5356_v54, %s3293_s26 }
 0x515   :  { %v2640_v26 = vpop.permute.xlu0 %2639  ;;  %v2682_v4 = vpop.permute.xlu2 %2681 }
 0x516   :  { %v5427_v32 = vsel %vm186_vm8, %v2680_v13, %v2682_v4  ;;  %v2718_v7 = vpop.permute.xlu1 %2717 }
 0x517   :  { %v2861_v6 = vmul.f32 %v5427_v32, %v6176_v31  ;;  %v5434_v33 = vsel %vm291_vm12, %v2718_v7, %v2720_v52  ;;  %v6181_v31 = vld [vmem:[#allocation59_spill] sm:$0xff] }
 0x518   :  { %v2876_v24 = vmul.f32 %v5434_v33, %v6177_v0 }
 0x519   :  { %3015 = vmatpush.msra.mxu2 %v2861_v6 }
 0x51a   :  { %2994 = vmatpush.msra.mxu1 %v2876_v24 }
 0x51b   :  { %2645 = vrot.lane.b32.xlu2 %v5379_v19, %s3290_s23 }
 0x51d   :  { %v2678_v18 = vpop.permute.xlu0 %2677  ;;  %1634 = vadd.xlane.f32.xlu0 %v1633_v55  ;;  %v5441_v43 = vpop.permute.xlu2 %2715 }
 0x51e   :  { %v5445_v27 = vsel %vm186_vm8, %v2678_v18, %v2680_v13  ;;  %v5447_v52 = vpop.permute.xlu1 %2683  ;;  %v5452_v44 = vsel %vm291_vm12, %v5441_v43, %v2718_v7 }
 0x51f   :  { %6178 = vst [vmem:[#allocation25_spill] sm:$0xff] %v5447_v52  ;;  %v2860_v38 = vmul.f32 %v5445_v27, %v6180_v34  ;;  %v2875_v6 = vmul.f32 %v5452_v44, %v6181_v31  ;;  %v5465_v24 = vsel %vm186_vm8, %v2682_v4, %v5447_v52 }
 0x520   :  { %6179 = vst [vmem:[#allocation33_spill] sm:$0xff] %v5452_v44  ;;  %v2862_v4 = vmul.f32 %v5465_v24, %v6188_v61  ;;  %v6190_v61 = vld [vmem:[#allocation44_spill] sm:$0xff] }
 0x521   :  { %2995 = vmatpush.msra.mxu1 %v2860_v38  ;;  %2974 = vmatpush.msra.mxu0 %v2875_v6  ;;  %6183 = vst [vmem:[#allocation38_spill] sm:$0xff] %v5465_v24  ;;  %v6186_v38 = vld [vmem:[#allocation43_spill] sm:$0xff]  ;;  %v6187_v6 = vld [vmem:[#allocation58_spill] sm:$0xff] }
 0x523   :  { %2813 = vrot.lane.b32.xlu2 %v5379_v19, %s3294_s27 }
 0x525   :  { %v2638_v13 = vpop.permute.xlu0 %2637  ;;  %v5460_v0 = vpop.permute.xlu2 %2723 }
 0x526   :  { %6182 = vst [vmem:[#allocation28_spill] sm:$0xff] %v5460_v0  ;;  %v5469_v7 = vsel %vm105_vm2, %v2638_v13, %v2640_v26  ;;  %v5471_v55 = vpop.permute.xlu1 %2643  ;;  %v5476_v34 = vsel %vm291_vm12, %v2722_v9, %v5460_v0 }
 0x527   :  { %6184 = vst [vmem:[#allocation29_spill] sm:$0xff] %v5471_v55  ;;  %v2844_v31 = vmul.f32 %v5469_v7, %v6186_v38  ;;  %v2878_v19 = vmul.f32 %v5476_v34, %v6187_v6 }
 0x528   :  { %6185 = vst [vmem:[#allocation24_spill] sm:$0xff] %v5476_v34 }
 0x529   :  { %2996 = vmatpush.msra.mxu1 %v2844_v31  ;;  %3034 = vmatpush.msra.mxu3 %v2878_v19  ;;  %v6191_v31 = vld [vmem:[#allocation45_spill] sm:$0xff] }
 0x52b   :  { %2763 = vrot.lane.b32.xlu2 %v5333_v39, %s3293_s26  ;;  %3035 = vmatpush.msra.mxu3 %v2862_v4  ;;  %v1636_v39 = vmul.f32 %v5295_v60, %v5295_v60 }
 0x52d   :  { %v5486_v52 = vpop.permute.xlu0 %2809  ;;  %v2642_v12 = vpop.permute.xlu2 %2641 }
 0x52e   :  { %v5488_v9 = vpop.permute.xlu1 %2727  ;;  %v5493_v38 = vsel %vm105_vm2, %v2642_v12, %v5471_v55  ;;  %v5497_v6 = vsel %vm105_vm2, %v2640_v26, %v2642_v12  ;;  %v1637_v55 = vmul.f32 %v5297_v62, %v5297_v62  ;;  %v1639_v62 = vmul.f32 %v5301_v1, %v5301_v1 }
 0x52f   :  { %6189 = vst [vmem:[#allocation19_spill] sm:$0xff] %v5493_v38  ;;  %v2845_v19 = vmul.f32 %v5497_v6, %v6190_v61  ;;  %v2846_v4 = vmul.f32 %v5493_v38, %v6191_v31  ;;  %v6193_v61 = vld [vmem:[#allocation55_spill] sm:$0xff] }
 0x530   :  { %v1644_v31 = vadd.f32 %v1637_v55, %v1636_v39  ;;  %v6194_v55 = vld [vmem:[#allocation46_spill] sm:$0xff] }
 0x531   :  { %3016 = vmatpush.msra.mxu2 %v2845_v19  ;;  %3036 = vmatpush.msra.mxu3 %v2846_v4  ;;  %v1638_v4 = vmul.f32 %v5299_v40, %v5299_v40 }
 0x533   :  { %v1645_v0 = vadd.f32 %v1644_v31, %v1638_v4  ;;  %v1640_v4 = vmul.f32 %v5303_v15, %v5303_v15 }
 0x535   :  { %v5503_v24 = vpop.permute.xlu0 %2803  ;;  %v5505_v34 = vpop.permute.xlu2 %2675  ;;  %v1646_v31 = vadd.f32 %v1645_v0, %v1639_v62  ;;  %v6196_v0 = vld [vmem:[#allocation35_spill] sm:$0xff] }
 0x536   :  { %v2806_v12 = vpop.permute.xlu1 %2805  ;;  %v5514_v26 = vsel %vm186_vm8, %v5505_v34, %v2678_v18 }
 0x537   :  { %6192 = vst [vmem:[#allocation40_spill] sm:$0xff] %v5514_v26  ;;  %v2859_v19 = vmul.f32 %v5514_v26, %v6193_v61  ;;  %v2825_v18 = vsel %vm508_vm13, %v5503_v24, %v2806_v12  ;;  %v1647_v51 = vadd.f32 %v1646_v31, %v1640_v4  ;;  %v1642_v31 = vmul.f32 %v5307_v42, %v5307_v42 }
 0x539   :  { %2975 = vmatpush.msra.mxu0 %v2859_v19  ;;  %v6195_v19 = vld [vmem:[#allocation37_spill] sm:$0xff] }
 0x53a   :  { %v2827_v40 = vmul.f32 %v2825_v18, %v6195_v19 }
 0x53d   :  { %v5520_v38 = vpop.permute.xlu0 %2687  ;;  %v5522_v60 = vpop.permute.xlu2 %2635 }
 0x53e   :  { %v5529_v44 = vpop.permute.xlu1 %2689  ;;  %v5534_v39 = vsel %vm105_vm2, %v5522_v60, %v2638_v13  ;;  %v1641_v13 = vmul.f32 %v5305_v37, %v5305_v37 }
 0x53f   :  { %v2843_v61 = vmul.f32 %v5534_v39, %v6194_v55 }
 0x540   :  { %v1648_v19 = vadd.f32 %v1647_v51, %v1641_v13  ;;  %v2701_v13 = vmul.f32 %v5445_v27, %v6126_v48 }
 0x541   :  { %2976 = vmatpush.msra.mxu0 %v2843_v61 }
 0x543   :  { %2977 = vmatpush.msra.mxu0 %v2827_v40  ;;  %v6197_v40 = vld [vmem:[#allocation30_spill] sm:$0xff] }
 0x545   :  { %v5541_v1 = vpop.permute.xlu0 %2757  ;;  %2978 = vmatpush.msra.mxu0 %v5356_v54  ;;  %v2808_v26 = vpop.permute.xlu2 %2807 }
 0x546   :  { %v2760_v36 = vpop.permute.xlu1 %2759  ;;  %v2823_v18 = vsel %vm508_vm13, %v2808_v26, %v5486_v52  ;;  %v2824_v62 = vsel %vm508_vm13, %v2806_v12, %v2808_v26  ;;  %v2741_v12 = vmul.f32 %v5434_v33, %v6125_v5  ;;  %v2661_v5 = vmul.f32 %v5469_v7, %v6086_v28 }
 0x547   :  { %v2828_v55 = vmul.f32 %v2824_v62, %v6196_v0  ;;  %v2829_v61 = vmul.f32 %v2823_v18, %v6197_v40  ;;  %v2776_v54 = vsel %vm372_vm10, %v5541_v1, %v2760_v36  ;;  %v1649_v62 = vadd.f32 %v1648_v19, %v1642_v31 }
 0x548   :  { %v2781_v4 = vmul.f32 %v2776_v54, %v6124_v23  ;;  %v1643_v0 = vmul.f32 %v5309_v50, %v5309_v50 }
 0x549   :  { %2997 = vmatpush.msra.mxu1 %v2828_v55  ;;  %3017 = vmatpush.msra.mxu2 %v2829_v61  ;;  %v6198_v61 = vld [vmem:[#allocation49_spill] sm:$0xff] }
 0x54a   :  { %v1650_v33 = vadd.f32 %v1649_v62, %v1643_v0  ;;  %v2742_v54 = vmul.f32 %v5413_v25, %v6198_v61  ;;  %v6201_v0 = vld [vmem:[#allocation33_spill] sm:$0xff]  ;;  %v6210_v61 = vld [vmem:[#allocation31_spill] sm:$0xff] }
 0x54b   :  { %2998 = vmatpush.msra.mxu1 %v5323_v16  ;;  %3018 = vmatpush.msra.mxu2 %v5321_v53  ;;  %v5578_v53 = vsel %vm186_vm8, %v5520_v38, %v5529_v44 }
 0x54c   :  { %v2865_v48 = vmul.f32 %v5578_v53, %v6095_v47 }
 0x54d   :  { %v2650_v26 = vpop.permute.xlu0 %2649  ;;  %3019 = vmatpush.msra.mxu2 %v2781_v4  ;;  %v2730_v18 = vpop.permute.xlu2 %2729 }
 0x54e   :  { %v5565_v51 = vpop.permute.xlu1 %2685  ;;  %v2731_v23 = vsel %vm291_vm12, %v5488_v9, %v2730_v18 }
 0x54f   :  { %3020 = vmatpush.msra.mxu2 %v2741_v12  ;;  %v2881_v16 = vmul.f32 %v2731_v23, %v6093_v41 }
 0x551   :  { %3021 = vmatpush.msra.mxu2 %v2701_v13 }
 0x553   :  { %3022 = vmatpush.msra.mxu2 %v2661_v5 }
 0x554   :  { %1651 = vadd.xlane.f32.xlu2 %v1650_v33  ;;  %3261 = vmatmul.msk.f32.vlgmr.msra.gmra.mxu2 %vm1463_vm14, %v5152_v10  ;;  %v6204_v33 = vld [vmem:[#allocation77_spill] sm:$0xff] }
 0x555   :  { %3094 = vmatpush.msrb.mxu2 %v2881_v16  ;;  %v5583_v27 = vpop.permute.xlu0 %2761  ;;  %v5585_v55 = vpop.permute.xlu2 %2811  ;;  %v6203_v16 = vld [vmem:[#allocation15_spill] sm:$0xff] }
 0x556   :  { %v2770_v28 = vpop.permute.xlu1 %2769  ;;  %v2822_v41 = vsel %vm508_vm13, %v5486_v52, %v5585_v55  ;;  %v2775_v47 = vsel %vm372_vm10, %v2760_v36, %v5583_v27  ;;  %v2738_v36 = vsel %vm291_vm12, %v2730_v18, %v5441_v43 }
 0x557   :  { %3095 = vmatpush.msrb.mxu2 %v2865_v48  ;;  %v2830_v7 = vmul.f32 %v2822_v41, %v6127_v30  ;;  %v2782_v40 = vmul.f32 %v2775_v47, %v6128_v49  ;;  %v2702_v30 = vmul.f32 %v5427_v32, %v6090_v11  ;;  %v2662_v49 = vmul.f32 %v5497_v6, %v6089_v45  ;;  %v6206_v48 = vld [vmem:[#allocation40_spill] sm:$0xff]  ;;  %v6209_v47 = vld [vmem:[#allocation25_spill] sm:$0xff] }
 0x558   :  { %v2882_v25 = vmul.f32 %v2738_v36, %v6094_v63  ;;  %v2658_v11 = vsel %vm105_vm2, %v2650_v26, %v5522_v60  ;;  %v6208_v41 = vld [vmem:[#allocation28_spill] sm:$0xff] }
 0x559   :  { %3037 = vmatpush.msra.mxu3 %v2830_v7 }
 0x55b   :  { %3038 = vmatpush.msra.mxu3 %v5331_v14  ;;  %v2698_v14 = vsel %vm186_vm8, %v5529_v44, %v5505_v34  ;;  %v2850_v44 = vmul.f32 %v2658_v11, %v6099_v2 }
 0x55c   :  { %v2866_v32 = vmul.f32 %v2698_v14, %v6096_v46 }
 0x55d   :  { %v5601_v19 = vpop.permute.xlu0 %2815  ;;  %3039 = vmatpush.msra.mxu3 %v2782_v40  ;;  %v2726_v31 = vpop.permute.xlu2 %2725  ;;  %v2693_v40 = vsel %vm186_vm8, %v6209_v47, %v5565_v51 }
 0x55e   :  { %v2818_v52 = vpop.permute.xlu1 %2817  ;;  %v2733_v7 = vsel %vm291_vm12, %v6208_v41, %v2726_v31 }
 0x55f   :  { %3040 = vmatpush.msra.mxu3 %v2742_v54  ;;  %v2826_v45 = vsel %vm508_vm13, %v2818_v52, %v5503_v24  ;;  %v2819_v63 = vsel %vm508_vm13, %v5601_v19, %v2818_v52  ;;  %v2659_v54 = vmul.f32 %v2658_v11, %v6210_v61  ;;  %v6214_v11 = vld [vmem:[#allocation29_spill] sm:$0xff] }
 0x560   :  { %v2834_v24 = vmul.f32 %v2826_v45, %v4217_v22 }
 0x561   :  { %3041 = vmatpush.msra.mxu3 %v2702_v30  ;;  %v6211_v30 = vld [vmem:[#allocation57_spill] sm:$0xff] }
 0x563   :  { %3042 = vmatpush.msra.mxu3 %v2662_v49  ;;  %v6212_v49 = vld [vmem:[#allocation12_spill] sm:$0xff] }
 0x564   :  { %3262 = vmatmul.msk.f32.vlgmr.msra.gmra.mxu3 %vm1463_vm14, %v5152_v10  ;;  %v2833_v10 = vmul.f32 %v2819_v63, %v4214_v58 }
 0x565   :  { %3114 = vmatpush.msrb.mxu3 %v2882_v25  ;;  %v2648_v43 = vpop.permute.xlu2 %2647  ;;  %v5630_v46 = vpop.permute.xlu0 %2765  ;;  %v3289_v25 = vld [vmem:[%s5787_s2] sm:$0xff] }
 0x566   :  { %v2768_v34 = vpop.permute.xlu1 %2767  ;;  %v2651_v60 = vsel %vm105_vm2, %v2648_v43, %v2650_v26  ;;  %v2746_v26 = vmul.f32 %v2731_v23, %v4375_v57  ;;  %v2706_v57 = vmul.f32 %v5578_v53, %v6163_v59  ;;  %v6202_v23 = vld [vmem:[#allocation67_spill] sm:$0xff]  ;;  %v6207_v59 = vld [vmem:[#allocation65_spill] sm:$0xff] }
 0x567   :  { %3115 = vmatpush.msrb.mxu3 %v2866_v32  ;;  %v2849_v6 = vmul.f32 %v2651_v60, %v4211_v21  ;;  %v2771_v2 = vsel %vm372_vm10, %v2768_v34, %v2770_v28  ;;  %v2772_v4 = vsel %vm372_vm10, %v5630_v46, %v2768_v34  ;;  %v2732_v21 = vsel %vm291_vm12, %v2726_v31, %v5488_v9  ;;  %v6199_v9 = vld [vmem:[#allocation27_spill] sm:$0xff] }
 0x568   :  { %v2786_v12 = vmul.f32 %v2771_v2, %v6160_v8  ;;  %v2785_v58 = vmul.f32 %v2772_v4, %v6159_v29  ;;  %v2745_v62 = vmul.f32 %v2732_v21, %v6199_v9  ;;  %v2739_v5 = vmul.f32 %v2738_v36, %v6202_v23  ;;  %v6225_v9 = vld [vmem:[#allocation7_spill] sm:$0xff]  ;;  %v6228_v23 = vld [vmem:[#allocation6_spill] sm:$0xff] }
 0x569   :  { %3116 = vmatpush.msrb.mxu3 %v2850_v44  ;;  %3096 = vmatpush.msrb.mxu2 %v2849_v6  ;;  %v2699_v53 = vmul.f32 %v2698_v14, %v6207_v59  ;;  %v2660_v36 = vmul.f32 %v5534_v39, %v6211_v30  ;;  %v2879_v14 = vmul.f32 %v2733_v7, %v6212_v49  ;;  %v6215_v44 = vld [vmem:[#allocation76_spill] sm:$0xff] }
 0x56a   :  { %v6216_v39 = vld [vmem:[#allocation72_spill] sm:$0xff] }
 0x56b   :  { %3117 = vmatpush.msrb.mxu3 %v2834_v24  ;;  %3097 = vmatpush.msrb.mxu2 %v2833_v10  ;;  %v2863_v34 = vmul.f32 %v2693_v40, %v6216_v39  ;;  %v6218_v6 = vld [vmem:[#allocation68_spill] sm:$0xff] }
 0x56c   :  { %v6219_v10 = vld [vmem:[#allocation8_spill] sm:$0xff] }
 0x56d   :  { %3118 = vmatpush.msrb.mxu3 %v5364_v3  ;;  %3098 = vmatpush.msrb.mxu2 %v5347_v56  ;;  %v2756_v22 = vpop.permute.xlu2 %2755  ;;  %v2692_v3 = vsel %vm186_vm8, %v5565_v51, %v5520_v38  ;;  %v6213_v51 = vld [vmem:[#allocation71_spill] sm:$0xff] }
 0x56e   :  { %v2777_v18 = vsel %vm372_vm10, %v2756_v22, %v5541_v1  ;;  %v2778_v8 = vsel %vm372_vm10, %v2770_v28, %v2756_v22  ;;  %v6200_v1 = vld [vmem:[#allocation64_spill] sm:$0xff]  ;;  %v2705_v38 = vmul.f32 %v2692_v3, %v6203_v16  ;;  %v2880_v32 = vmul.f32 %v2732_v21, %v6213_v51  ;;  %v6229_v16 = vld [vmem:[#allocation9_spill] sm:$0xff]  ;;  %v6235_v51 = vld [vmem:[#allocation63_spill] sm:$0xff] }
 0x56f   :  { %3119 = vmatpush.msrb.mxu3 %v2786_v12  ;;  %v2779_v29 = vmul.f32 %v2778_v8, %v6134_v35  ;;  %v2780_v56 = vmul.f32 %v2777_v18, %v6135_v17  ;;  %3099 = vmatpush.msrb.mxu2 %v2785_v58  ;;  %v2740_v13 = vmul.f32 %v6201_v0, %v6200_v1  ;;  %v6205_v17 = vld [vmem:[#allocation61_spill] sm:$0xff]  ;;  %v6226_v1 = vld [vmem:[#allocation16_spill] sm:$0xff] }
 0x570   :  { %v2666_v35 = vmul.f32 %v2651_v60, %v6204_v33  ;;  %v2700_v28 = vmul.f32 %v6206_v48, %v6205_v17  ;;  %v6220_v58 = vld [vmem:[#allocation21_spill] sm:$0xff]  ;;  %v6227_v0 = vld [vmem:[#allocation24_spill] sm:$0xff] }
 0x571   :  { %3120 = vmatpush.msrb.mxu3 %v2746_v26  ;;  %2979 = vmatpush.msra.mxu0 %v2779_v29  ;;  %v6221_v26 = vld [vmem:[#allocation13_spill] sm:$0xff] }
 0x572   :  { %2999 = vmatpush.msra.mxu1 %v2780_v56  ;;  %3100 = vmatpush.msrb.mxu2 %v2745_v62  ;;  %v6222_v8 = vld [vmem:[#allocation17_spill] sm:$0xff] }
 0x573   :  { %3121 = vmatpush.msrb.mxu3 %v2706_v57  ;;  %2980 = vmatpush.msra.mxu0 %v2739_v5  ;;  %v2744_v5 = vmul.f32 %v2733_v7, %v6228_v23  ;;  %v6234_v48 = vld [vmem:[#allocation5_spill] sm:$0xff] }
 0x574   :  { %3000 = vmatpush.msra.mxu1 %v2740_v13  ;;  %3101 = vmatpush.msrb.mxu2 %v2705_v38  ;;  %v2743_v13 = vmul.f32 %v6227_v0, %v6226_v1  ;;  %v6230_v38 = vld [vmem:[#allocation38_spill] sm:$0xff] }
 0x575   :  { %3122 = vmatpush.msrb.mxu3 %v2666_v35  ;;  %2981 = vmatpush.msra.mxu0 %v2699_v53  ;;  %v2646_v52 = vpop.permute.xlu2 %2645  ;;  %v2703_v33 = vmul.f32 %v6230_v38, %v6229_v16  ;;  %v6231_v35 = vld [vmem:[#allocation75_spill] sm:$0xff] }
 0x576   :  { %3001 = vmatpush.msra.mxu1 %v2700_v28  ;;  %v2652_v31 = vsel %vm105_vm2, %v2646_v52, %v2648_v43  ;;  %3266 = vmatmul.msk.f32.vlgmr.msrb.gmra.mxu3 %vm1463_vm14, %v3289_v25  ;;  %v2653_v45 = vsel %vm105_vm2, %v6214_v11, %v2646_v52  ;;  %v6217_v43 = vld [vmem:[#allocation73_spill] sm:$0xff] }
 0x577   :  { %v2665_v63 = vmul.f32 %v2652_v31, %v6215_v44  ;;  %2982 = vmatpush.msra.mxu0 %v2659_v54  ;;  %v2864_v60 = vmul.f32 %v2692_v3, %v6217_v43  ;;  %v2847_v24 = vmul.f32 %v2653_v45, %v6218_v6  ;;  %v2848_v2 = vmul.f32 %v2652_v31, %v6219_v10  ;;  %v6223_v3 = vld [vmem:[#allocation41_spill] sm:$0xff] }
 0x578   :  { %3002 = vmatpush.msra.mxu1 %v2660_v36  ;;  %3259 = vmatmul.msk.f32.vlgmr.msra.gmra.mxu0 %vm1463_vm14, %v3289_v25  ;;  %v2664_v28 = vmul.f32 %v2653_v45, %v6234_v48  ;;  %v6237_v45 = vld [vmem:[#allocation36_spill] sm:$0xff] }
 0x579   :  { %3054 = vmatpush.msrb.mxu0 %v2879_v14  ;;  %3102 = vmatpush.msrb.mxu2 %v2665_v63  ;;  %v6238_v63 = vld [vmem:[#allocation26_spill] sm:$0xff] }
 0x57a   :  { %3074 = vmatpush.msrb.mxu1 %v2880_v32  ;;  %3265 = vmatmul.msk.f32.vlgmr.msrb.gmra.mxu2 %vm1463_vm14, %v3289_v25 }
 0x57b   :  { %3055 = vmatpush.msrb.mxu0 %v2863_v34  ;;  %3260 = vmatmul.msk.f32.vlgmr.msra.gmra.mxu1 %vm1463_vm14, %v3289_v25 }
 0x57c   :  { %3075 = vmatpush.msrb.mxu1 %v2864_v60 }
 0x57d   :  { %3056 = vmatpush.msrb.mxu0 %v2847_v24  ;;  %v2814_v4 = vpop.permute.xlu2 %2813 }
 0x57e   :  { %3076 = vmatpush.msrb.mxu1 %v2848_v2  ;;  %v2820_v12 = vsel %vm508_vm13, %v2814_v4, %v5601_v19  ;;  %v2821_v21 = vsel %vm508_vm13, %v5585_v55, %v2814_v4  ;;  %v6224_v55 = vld [vmem:[#allocation23_spill] sm:$0xff] }
 0x57f   :  { %v2831_v22 = vmul.f32 %v2821_v21, %v6220_v58  ;;  %v2832_v18 = vmul.f32 %v2820_v12, %v6221_v26 }
 0x581   :  { %3057 = vmatpush.msrb.mxu0 %v2831_v22  ;;  %3077 = vmatpush.msrb.mxu1 %v2832_v18 }
 0x583   :  { %3058 = vmatpush.msrb.mxu0 %v6222_v8  ;;  %3078 = vmatpush.msrb.mxu1 %v6223_v3 }
 0x585   :  { %v2764_v29 = vpop.permute.xlu2 %2763 }
 0x586   :  { %v2773_v56 = vsel %vm372_vm10, %v2764_v29, %v5630_v46  ;;  %v2774_v19 = vsel %vm372_vm10, %v5583_v27, %v2764_v29  ;;  %v2704_v46 = vmul.f32 %v2693_v40, %v6231_v35  ;;  %v6233_v27 = vld [vmem:[#allocation19_spill] sm:$0xff] }
 0x587   :  { %v2783_v57 = vmul.f32 %v2774_v19, %v6224_v55  ;;  %v2784_v62 = vmul.f32 %v2773_v56, %v6225_v9  ;;  %v2663_v17 = vmul.f32 %v6233_v27, %v6232_v20 }
 0x589   :  { %3059 = vmatpush.msrb.mxu0 %v2783_v57  ;;  %3079 = vmatpush.msrb.mxu1 %v2784_v62 }
 0x58b   :  { %3060 = vmatpush.msrb.mxu0 %v2743_v13  ;;  %3080 = vmatpush.msrb.mxu1 %v2744_v5 }
 0x58d   :  { %3061 = vmatpush.msrb.mxu0 %v2703_v33  ;;  %3081 = vmatpush.msrb.mxu1 %v2704_v46 }
 0x58f   :  { %3062 = vmatpush.msrb.mxu0 %v2663_v17  ;;  %3082 = vmatpush.msrb.mxu1 %v2664_v28 }
 0x590   :  { %3263 = vmatmul.msk.f32.vlgmr.msrb.gmra.mxu0 %vm1463_vm14, %v3289_v25  ;;  %3264 = vmatmul.msk.f32.vlgmr.msrb.gmra.mxu1 %vm1463_vm14, %v3289_v25  ;;  %v1635_v59 = vpop.xlane.xlu0 %1634  ;;  %v6236_v25 = vld [vmem:[#allocation22_spill] sm:$0xff] }
 0x591   :  { %v1653_v53 = vmul.f32 0.0009765625, %v1635_v59 }
 0x593   :  { %v1655_v7 = vmul.f32 %v1653_v53, %v1653_v53  ;;  %v1658_v32 = vsub.f32 %v6235_v51, %v1653_v53  ;;  %v1659_v11 = vsub.f32 %v6236_v25, %v1653_v53  ;;  %v1660_v44 = vsub.f32 %v6237_v45, %v1653_v53 }
 0x594   :  { %v1661_v39 = vsub.f32 %v6238_v63, %v1653_v53  ;;  %v1662_v34 = vsub.f32 %v5303_v15, %v1653_v53  ;;  %v1663_v43 = vsub.f32 %v5305_v37, %v1653_v53  ;;  %v1664_v60 = vsub.f32 %v5307_v42, %v1653_v53 }
 0x595   :  { %v1665_v12 = vsub.f32 %v5309_v50, %v1653_v53 }
 0x5c7   :  { %v1652_v41 = vpop.xlane.xlu2 %1651 }
 0x5c8   :  { %v1654_v47 = vmul.f32 0.0009765625, %v1652_v41 }
 0x5ca   :  { %v1656_v40 = vsub.f32 %v1654_v47, %v1655_v7 }
 0x5cc   :  { %v1657_v61 = vmax.f32 %v1656_v40, 0.0 }
 0x5ce   :  { %v1666_v54 = vadd.f32 1e-05, %v1657_v61 }
 0x5d0   :  { %3285 = vrsqrt.f32 %v1666_v54  ;;  %vm1673_vm10 = vweird.f32 %v1666_v54 }
 0x5d6   :  { %v3286_v52 = vpop.eup %3285 }
 0x5d7   :  { %v1668_v30 = vmul.f32 %v3286_v52, %v1666_v54  ;;  %vm1674_vm8 = vweird.f32 %v3286_v52  ;;  %v3024_v9 = vpop.f32.mrf.mxu2 }
 0x5d8   :  { %vm1675_vm12 = vmor %vm1673_vm10, %vm1674_vm8  ;;  %v3138_v0 = vmul.f32 %v3024_v9, %v3024_v9 }
 0x5d9   :  { %v1669_v36 = vmul.f32 %v3286_v52, %v1668_v30 }
 0x5db   :  { %v1670_v49 = vmul.f32 0.5, %v1669_v36 }
 0x5dd   :  { %v1671_v14 = vsub.f32 1.5, %v1670_v49 }
 0x5df   :  { %v1672_v31 = vmul.f32 %v3286_v52, %v1671_v14 }
 0x5e1   :  { %v1676_v6 = vsel %vm1675_vm12, %v3286_v52, %v1672_v31 }
 0x5e2   :  { %v1677_v24 = vmul.f32 %v1676_v6, %v1658_v32  ;;  %v1678_v10 = vmul.f32 %v1676_v6, %v1659_v11  ;;  %v1679_v2 = vmul.f32 %v1676_v6, %v1660_v44  ;;  %v1680_v4 = vmul.f32 %v1676_v6, %v1661_v39 }
 0x5e3   :  { %v1681_v21 = vmul.f32 %v1676_v6, %v1662_v34  ;;  %v1682_v58 = vmul.f32 %v1676_v6, %v1663_v43  ;;  %v1683_v22 = vmul.f32 %v1676_v6, %v1664_v60  ;;  %v1684_v3 = vmul.f32 %v1676_v6, %v1665_v12 }
 0x5e4   :  { %v1685_v26 = vmax.f32 %v1677_v24, 0.0  ;;  %v1686_v18 = vmax.f32 %v1678_v10, 0.0  ;;  %v1687_v8 = vmax.f32 %v1679_v2, 0.0  ;;  %v1688_v29 = vmax.f32 %v1680_v4, 0.0 }
 0x5e5   :  { %v1689_v15 = vmax.f32 %v1681_v21, 0.0  ;;  %v1690_v37 = vmax.f32 %v1682_v58, 0.0  ;;  %v1691_v42 = vmax.f32 %v1683_v22, 0.0  ;;  %v1692_v50 = vmax.f32 %v1684_v3, 0.0 }
 0x5e6   :  { %1693 = vst [vmem:[%s5788_s4] sm:$0xff] %v1685_v26 }
 0x5e7   :  { %1694 = vst [vmem:[%s5788_s4 + $0x8] sm:$0xff] %v1686_v18  ;;  %v3044_v13 = vpop.f32.mrf.mxu3 }
 0x5e8   :  { %1695 = vst [vmem:[%s5788_s4 + $0x10] sm:$0xff] %v1687_v8  ;;  %v3139_v16 = vmul.f32 %v3044_v13, %v3044_v13 }
 0x5e9   :  { %1696 = vst [vmem:[%s5788_s4 + $0x18] sm:$0xff] %v1688_v29 }
 0x5ea   :  { %1697 = vst [vmem:[%s5788_s4 + $0x20] sm:$0xff] %v1689_v15 }
 0x5eb   :  { %1698 = vst [vmem:[%s5788_s4 + $0x28] sm:$0xff] %v1690_v37 }
 0x5ec   :  { %1699 = vst [vmem:[%s5788_s4 + $0x30] sm:$0xff] %v1691_v42 }
 0x5ed   :  { %1700 = vst [vmem:[%s5788_s4 + $0x38] sm:$0xff] %v1692_v50 }
 0x5f5   :  { %v2984_v56 = vpop.f32.mrf.mxu0 }
 0x5f6   :  { %v3136_v55 = vmul.f32 %v2984_v56, %v2984_v56 }
 0x5f8   :  { %v3004_v19 = vpop.f32.mrf.mxu1 }
 0x5f9   :  { %v3137_v57 = vmul.f32 %v3004_v19, %v3004_v19  ;;  %v3127_v62 = vadd.f32 %v3004_v19, %v2984_v56  ;;  %v3124_v28 = vpop.f32.mrf.mxu3 }
 0x5fa   :  { %v3143_v40 = vmul.f32 %v3124_v28, %v3124_v28 }
 0x5fb   :  { %v3144_v1 = vadd.f32 %v3137_v57, %v3136_v55  ;;  %v3128_v23 = vadd.f32 %v3127_v62, %v3024_v9 }
 0x5fd   :  { %v3145_v5 = vadd.f32 %v3144_v1, %v3138_v0  ;;  %v3129_v38 = vadd.f32 %v3128_v23, %v3044_v13  ;;  %v3104_v33 = vpop.f32.mrf.mxu2 }
 0x5fe   :  { %v3142_v41 = vmul.f32 %v3104_v33, %v3104_v33 }
 0x5ff   :  { %v3146_v20 = vadd.f32 %v3145_v5, %v3139_v16 }
 0x60d   :  { %v3064_v35 = vpop.f32.mrf.mxu0  ;;  %v3084_v46 = vpop.f32.mrf.mxu1 }
 0x60e   :  { %v3130_v27 = vadd.f32 %v3129_v38, %v3064_v35  ;;  %v3140_v17 = vmul.f32 %v3064_v35, %v3064_v35  ;;  %v3141_v48 = vmul.f32 %v3084_v46, %v3084_v46 }
 0x610   :  { %v3147_v59 = vadd.f32 %v3146_v20, %v3140_v17  ;;  %v3131_v53 = vadd.f32 %v3130_v27, %v3084_v46 }
 0x612   :  { %v3148_v7 = vadd.f32 %v3147_v59, %v3141_v48  ;;  %v3132_v47 = vadd.f32 %v3131_v53, %v3104_v33 }
 0x614   :  { %v3149_v61 = vadd.f32 %v3148_v7, %v3142_v41  ;;  %v3133_v54 = vadd.f32 %v3132_v47, %v3124_v28 }
 0x616   :  { %v3150_v52 = vadd.f32 %v3149_v61, %v3143_v40  ;;  %3134 = vadd.xlane.f32.xlu1 %v3133_v54 }
 0x618   :  { %3151 = vadd.xlane.f32.xlu0 %v3150_v52 }
 0x689   :  { %v3135_v30 = vpop.xlane.xlu1 %3134 }
 0x68a   :  { %v3153_v36 = vmul.f32 0.0009765625, %v3135_v30 }
 0x68b   :  { %v3152_v49 = vpop.xlane.xlu0 %3151 }
 0x68c   :  { %v3154_v14 = vmul.f32 0.0009765625, %v3152_v49  ;;  %v3155_v31 = vmul.f32 %v3153_v36, %v3153_v36  ;;  %v3158_v43 = vsub.f32 %v2984_v56, %v3153_v36  ;;  %v3159_v60 = vsub.f32 %v3004_v19, %v3153_v36 }
 0x68d   :  { %v3160_v6 = vsub.f32 %v3024_v9, %v3153_v36  ;;  %v3161_v24 = vsub.f32 %v3044_v13, %v3153_v36  ;;  %v3162_v10 = vsub.f32 %v3064_v35, %v3153_v36  ;;  %v3163_v2 = vsub.f32 %v3084_v46, %v3153_v36 }
 0x68e   :  { %v3156_v51 = vsub.f32 %v3154_v14, %v3155_v31  ;;  %v3164_v4 = vsub.f32 %v3104_v33, %v3153_v36  ;;  %v3165_v18 = vsub.f32 %v3124_v28, %v3153_v36 }
 0x690   :  { %v3157_v32 = vmax.f32 %v3156_v51, 0.0 }
 0x692   :  { %v3166_v25 = vadd.f32 1e-05, %v3157_v32 }
 0x694   :  { %3287 = vrsqrt.f32 %v3166_v25  ;;  %vm3173_vm2 = vweird.f32 %v3166_v25 }
 0x69a   :  { %v3288_v11 = vpop.eup %3287 }
 0x69b   :  { %v3168_v45 = vmul.f32 %v3288_v11, %v3166_v25  ;;  %vm3174_vm13 = vweird.f32 %v3288_v11 }
 0x69c   :  { %vm3175_vm3 = vmor %vm3173_vm2, %vm3174_vm13 }
 0x69d   :  { %v3169_v44 = vmul.f32 %v3288_v11, %v3168_v45 }
 0x69f   :  { %v3170_v63 = vmul.f32 0.5, %v3169_v44 }
 0x6a1   :  { %v3171_v39 = vsub.f32 1.5, %v3170_v63 }
 0x6a3   :  { %v3172_v34 = vmul.f32 %v3288_v11, %v3171_v39 }
 0x6a5   :  { %v3176_v12 = vsel %vm3175_vm3, %v3288_v11, %v3172_v34 }
 0x6a6   :  { %v3177_v21 = vmul.f32 %v3176_v12, %v3158_v43  ;;  %v3178_v58 = vmul.f32 %v3176_v12, %v3159_v60  ;;  %v3179_v22 = vmul.f32 %v3176_v12, %v3160_v6  ;;  %v3180_v26 = vmul.f32 %v3176_v12, %v3161_v24 }
 0x6a7   :  { %v3181_v8 = vmul.f32 %v3176_v12, %v3162_v10  ;;  %v3182_v3 = vmul.f32 %v3176_v12, %v3163_v2  ;;  %v3183_v29 = vmul.f32 %v3176_v12, %v3164_v4  ;;  %v3184_v50 = vmul.f32 %v3176_v12, %v3165_v18 }
 0x6a8   :  { %v3185_v15 = vmax.f32 %v3177_v21, 0.0  ;;  %v3186_v37 = vmax.f32 %v3178_v58, 0.0  ;;  %v3187_v42 = vmax.f32 %v3179_v22, 0.0  ;;  %v3188_v56 = vmax.f32 %v3180_v26, 0.0 }
 0x6a9   :  { %v3189_v19 = vmax.f32 %v3181_v8, 0.0  ;;  %v3190_v55 = vmax.f32 %v3182_v3, 0.0  ;;  %v3191_v57 = vmax.f32 %v3183_v29, 0.0  ;;  %v3192_v9 = vmax.f32 %v3184_v50, 0.0 }
 0x6aa   :  { %3267 = vst [vmem:[%s5788_s4 + $0x40] sm:$0xff] %v3185_v15 }
 0x6ab   :  { %3268 = vst [vmem:[%s5788_s4 + $0x48] sm:$0xff] %v3186_v37 }
 0x6ac   :  { %3269 = vst [vmem:[%s5788_s4 + $0x50] sm:$0xff] %v3187_v42 }
 0x6ad   :  { %3270 = vst [vmem:[%s5788_s4 + $0x58] sm:$0xff] %v3188_v56 }
 0x6ae   :  { %3271 = vst [vmem:[%s5788_s4 + $0x60] sm:$0xff] %v3189_v19 }
 0x6af   :  { %3272 = vst [vmem:[%s5788_s4 + $0x68] sm:$0xff] %v3190_v55 }
 0x6b0   :  { %3273 = vst [vmem:[%s5788_s4 + $0x70] sm:$0xff] %v3191_v57 }
 0x6b1   :  { %3274 = vst [vmem:[%s5788_s4 + $0x78] sm:$0xff] %v3192_v9 }

</bundles_post_ra>
